<compile_context>
chip_gen: v6e
topology: v6e:2x2x1
jax: 0.10.0
libtpu: 0.0.40
codegen_flags: <defaults>
</compile_context>

<pallas_src>
import functools

import jax
import jax.numpy as jnp
from jax.experimental import pallas as pl
from jax.experimental.pallas import tpu as pltpu

BN_EPS = 1e-5


# ----------------------------------------------------------------------------
# Fused ResEncoder kernel (one grid step = one batch element)
# ----------------------------------------------------------------------------
def _res_encoder_kernel(xp_ref, w1_ref, s1_ref, t1_ref,
                        w1x1_ref, b1x1_ref,
                        w2_ref, s2_ref, t2_ref,
                        o_ref, h1p_ref,
                        *, H, W, C_in, C_out, WPAD):
    HW = H * W
    f32 = jnp.float32
    bf16 = jnp.bfloat16

    # ---- conv1 (3x3, pad=1): 9 shifted matmuls, im2col never leaves VMEM ----
    acc1 = jnp.zeros((HW, C_out), f32)
    for kh in range(3):
        for kw in range(3):
            patch = xp_ref[0, kh:kh + H, kw:kw + W, :]
            patch = patch.reshape(HW, C_in).astype(bf16)
            acc1 = acc1 + jnp.dot(patch, w1_ref[kh * 3 + kw],
                                  preferred_element_type=f32)
    # BN1 (pre-folded scale/shift) + ReLU, all in f32
    h1 = jnp.maximum(acc1 * s1_ref[...] + t1_ref[...], 0.0)

    # ---- residual = conv1x1(x) + bias (reads the un-padded interior of x) --
    center = xp_ref[0, 1:1 + H, 1:1 + W, :].reshape(HW, C_in).astype(bf16)
    residual = jnp.dot(center, w1x1_ref[...], preferred_element_type=f32)
    residual = residual + b1x1_ref[...]

    # ---- stage zero-padded h1 in VMEM scratch (sublane-aligned store) ------
    h1p_ref[...] = jnp.zeros_like(h1p_ref)
    h1p_ref[1:1 + H, WPAD:WPAD + W, :] = h1.reshape(H, W, C_out)

    # ---- conv2 (3x3, pad=1) + BN2 + ReLU, then + residual, final ReLU ------
    acc2 = jnp.zeros((HW, C_out), f32)
    for kh in range(3):
        for kw in range(3):
            c0 = WPAD - 1 + kw
            patch = h1p_ref[kh:kh + H, c0:c0 + W, :]
            patch = patch.reshape(HW, C_out).astype(bf16)
            acc2 = acc2 + jnp.dot(patch, w2_ref[kh * 3 + kw],
                                  preferred_element_type=f32)
    h2 = jnp.maximum(acc2 * s2_ref[...] + t2_ref[...], 0.0)
    o_ref[0] = jnp.maximum(h2 + residual, 0.0).astype(o_ref.dtype)


def _full_spec(shape):
    nd = len(shape)
    return pl.BlockSpec(tuple(shape), lambda n: (0,) * nd)


def res_encoder_forward(x_nchw, prep):
    """x_nchw: (N, C_in, H, W) f32; prep: output of prepare_params."""
    x = jnp.transpose(x_nchw, (0, 2, 3, 1)).astype(jnp.float32)   # NHWC
    N, H, W, C_in = x.shape
    C_out = prep["w1"].shape[-1]
    Hp, Wp = H + 2, W + 2
    WPAD = 8                       # f32 sublane-aligned interior offset
    HW = H * W

    xp = jnp.pad(x, ((0, 0), (1, 1), (1, 1), (0, 0)))   # spatial pad=1 only

    kernel = functools.partial(_res_encoder_kernel, H=H, W=W,
                               C_in=C_in, C_out=C_out, WPAD=WPAD)

    out = pl.pallas_call(
        kernel,
        out_shape=jax.ShapeDtypeStruct((N, HW, C_out), jnp.float32),
        grid_spec=pltpu.PrefetchScalarGridSpec(
            num_scalar_prefetch=0,
            grid=(N,),
            in_specs=[
                pl.BlockSpec((1, Hp, Wp, C_in), lambda n: (n, 0, 0, 0)),
                _full_spec(prep["w1"].shape),
                _full_spec(prep["s1"].shape),
                _full_spec(prep["t1"].shape),
                _full_spec(prep["w1x1"].shape),
                _full_spec(prep["b1x1"].shape),
                _full_spec(prep["w2"].shape),
                _full_spec(prep["s2"].shape),
                _full_spec(prep["t2"].shape),
            ],
            out_specs=pl.BlockSpec((1, HW, C_out), lambda n: (n, 0, 0)),
            scratch_shapes=[
                pltpu.VMEM((Hp, WPAD + W + 1, C_out), jnp.float32),
            ],
        ),
        compiler_params=pltpu.CompilerParams(
            dimension_semantics=("parallel",)),
    )(xp, prep["w1"], prep["s1"], prep["t1"],
      prep["w1x1"], prep["b1x1"],
      prep["w2"], prep["s2"], prep["t2"])

    y = out.reshape(N, H, W, C_out)
    return jnp.transpose(y, (0, 3, 1, 2))               # back to NCHW


# ----------------------------------------------------------------------------
# Parameters: PyTorch-style init + one-time kernel-ready prep (BN fold, bf16)
# ----------------------------------------------------------------------------
def init_res_encoder_params(key, c_in, c_out):
    ks = jax.random.split(key, 5)

    def conv_init(k, kh, kw, cin, cout):
        fan_in = kh * kw * cin
        bound = (1.0 / fan_in) ** 0.5
        kw_, kb_ = jax.random.split(k)
        w = jax.random.uniform(kw_, (kh, kw, cin, cout), jnp.float32,
                               -bound, bound)
        b = jax.random.uniform(kb_, (cout,), jnp.float32, -bound, bound)
        return {"w": w, "b": b}

    def bn_init(k, c):
        k1, k2, k3, k4 = jax.random.split(k, 4)
        return {"gamma": 1.0 + 0.1 * jax.random.normal(k1, (c,), jnp.float32),
                "beta": 0.1 * jax.random.normal(k2, (c,), jnp.float32),
                "mean": 0.1 * jax.random.normal(k3, (c,), jnp.float32),
                "var": jax.random.uniform(k4, (c,), jnp.float32, 0.5, 1.5)}

    return {"conv1": conv_init(ks[0], 3, 3, c_in, c_out),
            "bn1": bn_init(ks[1], c_out),
            "conv2": conv_init(ks[2], 3, 3, c_out, c_out),
            "bn2": bn_init(ks[3], c_out),
            "conv1x1": conv_init(ks[4], 1, 1, c_in, c_out)}


def prepare_params(P):
    """Fold BN running stats + conv bias once; reshape/cast weights to bf16."""
    def fold(bn, bias):
        s = bn["gamma"] * jax.lax.rsqrt(bn["var"] + BN_EPS)
        t = s * (bias - bn["mean"]) + bn["beta"]
        return (s.astype(jnp.float32).reshape(1, -1),
                t.astype(jnp.float32).reshape(1, -1))

    c_in, c_out = P["conv1"]["w"].shape[2], P["conv1"]["w"].shape[3]
    s1, t1 = fold(P["bn1"], P["conv1"]["b"])
    s2, t2 = fold(P["bn2"], P["conv2"]["b"])
    return {
        "w1": P["conv1"]["w"].reshape(9, c_in, c_out).astype(jnp.bfloat16),
        "s1": s1, "t1": t1,
        "w2": P["conv2"]["w"].reshape(9, c_out, c_out).astype(jnp.bfloat16),
        "s2": s2, "t2": t2,
        "w1x1": P["conv1x1"]["w"].reshape(c_in, c_out).astype(jnp.bfloat16),
        "b1x1": P["conv1x1"]["b"].reshape(1, c_out).astype(jnp.float32),
    }


# ----------------------------------------------------------------------------
# Pure-JAX reference (inference-mode BatchNorm with running stats)
# ----------------------------------------------------------------------------
def res_encoder_ref(x_nhwc, P):
    def conv(x, w, b, pad):
        y = jax.lax.conv_general_dilated(
            x, w, window_strides=(1, 1), padding=[(pad, pad), (pad, pad)],
            dimension_numbers=("NHWC", "HWIO", "NHWC"),
            precision=jax.lax.Precision.HIGHEST)
        return y + b

    def bn(x, p):
        return (p["gamma"] * (x - p["mean"]) * jax.lax.rsqrt(p["var"] + BN_EPS)
                + p["beta"])

    residual = conv(x_nhwc, P["conv1x1"]["w"], P["conv1x1"]["b"], 0)
    out = jax.nn.relu(bn(conv(x_nhwc, P["conv1"]["w"], P["conv1"]["b"], 1),
                         P["bn1"]))
    out = jax.nn.relu(bn(conv(out, P["conv2"]["w"], P["conv2"]["b"], 1),
                         P["bn2"]))
    return jax.nn.relu(out + residual)


# ----------------------------------------------------------------------------
if __name__ == "__main__":
    key = jax.random.PRNGKey(0)
    in_channels, out_channels = 4, 32
    B, H, W = 2, 16, 16

    pkey, xkey = jax.random.split(key)
    params = init_res_encoder_params(pkey, in_channels, out_channels)
    prep = prepare_params(params)
    x = jax.random.normal(xkey, (B, in_channels, H, W), dtype=jnp.float32)

    fwd = jax.jit(res_encoder_forward)
    out = jax.block_until_ready(fwd(x, prep))
    assert out.shape == (B, out_channels, H, W), out.shape

    # Correctness check against the pure-JAX reference (bf16-MXU tolerance).
    ref = res_encoder_ref(jnp.transpose(x, (0, 2, 3, 1)), params)
    ref = jnp.transpose(ref, (0, 3, 1, 2))
    err = float(jnp.max(jnp.abs(out - ref)))
    scale = float(jnp.max(jnp.abs(ref))) + 1.0
    assert err <= 5e-2 * scale, f"max abs err {err} (scale {scale})"

    print("KERNEL_OK")
</pallas_src>

<mosaic_0001>
module attributes {stable_mosaic.version = 11 : i64} {
  func.func @_res_encoder_kernel(%arg0: i32, %arg1: memref<1x18x18x4xf32, #tpu.memory_space<vmem>>, %arg2: memref<9x4x32xbf16, #tpu.memory_space<vmem>>, %arg3: memref<1x32xf32, #tpu.memory_space<vmem>>, %arg4: memref<1x32xf32, #tpu.memory_space<vmem>>, %arg5: memref<4x32xbf16, #tpu.memory_space<vmem>>, %arg6: memref<1x32xf32, #tpu.memory_space<vmem>>, %arg7: memref<9x32x32xbf16, #tpu.memory_space<vmem>>, %arg8: memref<1x32xf32, #tpu.memory_space<vmem>>, %arg9: memref<1x32xf32, #tpu.memory_space<vmem>>, %arg10: memref<1x256x32xf32, #tpu.memory_space<vmem>>, %arg11: memref<18x25x32xf32, #tpu.memory_space<vmem>>) attributes {dimension_semantics = [#tpu.dimension_semantics<parallel>], iteration_bounds = array<i64: 2>, scalar_prefetch = 0 : i64, scratch_operands = 1 : i64, tpu.core_type = #tpu.core_type<tc>, window_params = [{transform_indices = @transform_0, window_bounds = array<i64: 1, 18, 18, 4>}, {pipeline_mode = #tpu.pipeline_mode<synchronous>, transform_indices = @transform_1, window_bounds = array<i64: 9, 4, 32>}, {pipeline_mode = #tpu.pipeline_mode<synchronous>, transform_indices = @transform_2, window_bounds = array<i64: 1, 32>}, {pipeline_mode = #tpu.pipeline_mode<synchronous>, transform_indices = @transform_3, window_bounds = array<i64: 1, 32>}, {pipeline_mode = #tpu.pipeline_mode<synchronous>, transform_indices = @transform_4, window_bounds = array<i64: 4, 32>}, {pipeline_mode = #tpu.pipeline_mode<synchronous>, transform_indices = @transform_5, window_bounds = array<i64: 1, 32>}, {pipeline_mode = #tpu.pipeline_mode<synchronous>, transform_indices = @transform_6, window_bounds = array<i64: 9, 32, 32>}, {pipeline_mode = #tpu.pipeline_mode<synchronous>, transform_indices = @transform_7, window_bounds = array<i64: 1, 32>}, {pipeline_mode = #tpu.pipeline_mode<synchronous>, transform_indices = @transform_8, window_bounds = array<i64: 1, 32>}, {transform_indices = @transform_9, window_bounds = array<i64: 1, 256, 32>}]} {
    %cst = arith.constant 0.000000e+00 : f32
    %0 = vector.broadcast %cst : f32 to vector<256x32xf32>
    %c0 = arith.constant 0 : index
    %c0_0 = arith.constant 0 : index
    %c0_1 = arith.constant 0 : index
    %c0_2 = arith.constant 0 : index
    %1 = vector.load %arg1[%c0, %c0_0, %c0_1, %c0_2] : memref<1x18x18x4xf32, #tpu.memory_space<vmem>>, vector<1x16x16x4xf32>
    %2 = vector.shape_cast %1 : vector<1x16x16x4xf32> to vector<16x16x4xf32>
    %3 = vector.shape_cast %2 : vector<16x16x4xf32> to vector<256x4xf32>
    %4 = arith.truncf %3 : vector<256x4xf32> to vector<256x4xbf16>
    %c0_3 = arith.constant 0 : index
    %c0_4 = arith.constant 0 : index
    %c0_5 = arith.constant 0 : index
    %5 = vector.load %arg2[%c0_3, %c0_4, %c0_5] : memref<9x4x32xbf16, #tpu.memory_space<vmem>>, vector<1x4x32xbf16>
    %6 = vector.shape_cast %5 : vector<1x4x32xbf16> to vector<4x32xbf16>
    %cst_6 = arith.constant dense<0.000000e+00> : vector<256x32xf32>
    %7 = tpu.matmul %4, %6, %cst_6 {dimension_numbers = #tpu.dot_dimension_numbers<[1], [0], [0], [1], [0, 0, 1, 1], [], []>} : vector<256x4xbf16>, vector<4x32xbf16>, vector<256x32xf32> -> vector<256x32xf32>
    %8 = arith.addf %0, %7 : vector<256x32xf32>
    %c0_7 = arith.constant 0 : index
    %c0_8 = arith.constant 0 : index
    %c1 = arith.constant 1 : index
    %c0_9 = arith.constant 0 : index
    %9 = vector.load %arg1[%c0_7, %c0_8, %c1, %c0_9] : memref<1x18x18x4xf32, #tpu.memory_space<vmem>>, vector<1x16x16x4xf32>
    %10 = vector.shape_cast %9 : vector<1x16x16x4xf32> to vector<16x16x4xf32>
    %11 = vector.shape_cast %10 : vector<16x16x4xf32> to vector<256x4xf32>
    %12 = arith.truncf %11 : vector<256x4xf32> to vector<256x4xbf16>
    %c1_10 = arith.constant 1 : index
    %c0_11 = arith.constant 0 : index
    %c0_12 = arith.constant 0 : index
    %13 = vector.load %arg2[%c1_10, %c0_11, %c0_12] : memref<9x4x32xbf16, #tpu.memory_space<vmem>>, vector<1x4x32xbf16>
    %14 = vector.shape_cast %13 : vector<1x4x32xbf16> to vector<4x32xbf16>
    %cst_13 = arith.constant dense<0.000000e+00> : vector<256x32xf32>
    %15 = tpu.matmul %12, %14, %cst_13 {dimension_numbers = #tpu.dot_dimension_numbers<[1], [0], [0], [1], [0, 0, 1, 1], [], []>} : vector<256x4xbf16>, vector<4x32xbf16>, vector<256x32xf32> -> vector<256x32xf32>
    %16 = arith.addf %8, %15 : vector<256x32xf32>
    %c0_14 = arith.constant 0 : index
    %c0_15 = arith.constant 0 : index
    %c2 = arith.constant 2 : index
    %c0_16 = arith.constant 0 : index
    %17 = vector.load %arg1[%c0_14, %c0_15, %c2, %c0_16] : memref<1x18x18x4xf32, #tpu.memory_space<vmem>>, vector<1x16x16x4xf32>
    %18 = vector.shape_cast %17 : vector<1x16x16x4xf32> to vector<16x16x4xf32>
    %19 = vector.shape_cast %18 : vector<16x16x4xf32> to vector<256x4xf32>
    %20 = arith.truncf %19 : vector<256x4xf32> to vector<256x4xbf16>
    %c2_17 = arith.constant 2 : index
    %c0_18 = arith.constant 0 : index
    %c0_19 = arith.constant 0 : index
    %21 = vector.load %arg2[%c2_17, %c0_18, %c0_19] : memref<9x4x32xbf16, #tpu.memory_space<vmem>>, vector<1x4x32xbf16>
    %22 = vector.shape_cast %21 : vector<1x4x32xbf16> to vector<4x32xbf16>
    %cst_20 = arith.constant dense<0.000000e+00> : vector<256x32xf32>
    %23 = tpu.matmul %20, %22, %cst_20 {dimension_numbers = #tpu.dot_dimension_numbers<[1], [0], [0], [1], [0, 0, 1, 1], [], []>} : vector<256x4xbf16>, vector<4x32xbf16>, vector<256x32xf32> -> vector<256x32xf32>
    %24 = arith.addf %16, %23 : vector<256x32xf32>
    %c0_21 = arith.constant 0 : index
    %c1_22 = arith.constant 1 : index
    %c0_23 = arith.constant 0 : index
    %c0_24 = arith.constant 0 : index
    %25 = vector.load %arg1[%c0_21, %c1_22, %c0_23, %c0_24] : memref<1x18x18x4xf32, #tpu.memory_space<vmem>>, vector<1x16x16x4xf32>
    %26 = vector.shape_cast %25 : vector<1x16x16x4xf32> to vector<16x16x4xf32>
    %27 = vector.shape_cast %26 : vector<16x16x4xf32> to vector<256x4xf32>
    %28 = arith.truncf %27 : vector<256x4xf32> to vector<256x4xbf16>
    %c3 = arith.constant 3 : index
    %c0_25 = arith.constant 0 : index
    %c0_26 = arith.constant 0 : index
    %29 = vector.load %arg2[%c3, %c0_25, %c0_26] : memref<9x4x32xbf16, #tpu.memory_space<vmem>>, vector<1x4x32xbf16>
    %30 = vector.shape_cast %29 : vector<1x4x32xbf16> to vector<4x32xbf16>
    %cst_27 = arith.constant dense<0.000000e+00> : vector<256x32xf32>
    %31 = tpu.matmul %28, %30, %cst_27 {dimension_numbers = #tpu.dot_dimension_numbers<[1], [0], [0], [1], [0, 0, 1, 1], [], []>} : vector<256x4xbf16>, vector<4x32xbf16>, vector<256x32xf32> -> vector<256x32xf32>
    %32 = arith.addf %24, %31 : vector<256x32xf32>
    %c0_28 = arith.constant 0 : index
    %c1_29 = arith.constant 1 : index
    %c1_30 = arith.constant 1 : index
    %c0_31 = arith.constant 0 : index
    %33 = vector.load %arg1[%c0_28, %c1_29, %c1_30, %c0_31] : memref<1x18x18x4xf32, #tpu.memory_space<vmem>>, vector<1x16x16x4xf32>
    %34 = vector.shape_cast %33 : vector<1x16x16x4xf32> to vector<16x16x4xf32>
    %35 = vector.shape_cast %34 : vector<16x16x4xf32> to vector<256x4xf32>
    %36 = arith.truncf %35 : vector<256x4xf32> to vector<256x4xbf16>
    %c4 = arith.constant 4 : index
    %c0_32 = arith.constant 0 : index
    %c0_33 = arith.constant 0 : index
    %37 = vector.load %arg2[%c4, %c0_32, %c0_33] : memref<9x4x32xbf16, #tpu.memory_space<vmem>>, vector<1x4x32xbf16>
    %38 = vector.shape_cast %37 : vector<1x4x32xbf16> to vector<4x32xbf16>
    %cst_34 = arith.constant dense<0.000000e+00> : vector<256x32xf32>
    %39 = tpu.matmul %36, %38, %cst_34 {dimension_numbers = #tpu.dot_dimension_numbers<[1], [0], [0], [1], [0, 0, 1, 1], [], []>} : vector<256x4xbf16>, vector<4x32xbf16>, vector<256x32xf32> -> vector<256x32xf32>
    %40 = arith.addf %32, %39 : vector<256x32xf32>
    %c0_35 = arith.constant 0 : index
    %c1_36 = arith.constant 1 : index
    %c2_37 = arith.constant 2 : index
    %c0_38 = arith.constant 0 : index
    %41 = vector.load %arg1[%c0_35, %c1_36, %c2_37, %c0_38] : memref<1x18x18x4xf32, #tpu.memory_space<vmem>>, vector<1x16x16x4xf32>
    %42 = vector.shape_cast %41 : vector<1x16x16x4xf32> to vector<16x16x4xf32>
    %43 = vector.shape_cast %42 : vector<16x16x4xf32> to vector<256x4xf32>
    %44 = arith.truncf %43 : vector<256x4xf32> to vector<256x4xbf16>
    %c5 = arith.constant 5 : index
    %c0_39 = arith.constant 0 : index
    %c0_40 = arith.constant 0 : index
    %45 = vector.load %arg2[%c5, %c0_39, %c0_40] : memref<9x4x32xbf16, #tpu.memory_space<vmem>>, vector<1x4x32xbf16>
    %46 = vector.shape_cast %45 : vector<1x4x32xbf16> to vector<4x32xbf16>
    %cst_41 = arith.constant dense<0.000000e+00> : vector<256x32xf32>
    %47 = tpu.matmul %44, %46, %cst_41 {dimension_numbers = #tpu.dot_dimension_numbers<[1], [0], [0], [1], [0, 0, 1, 1], [], []>} : vector<256x4xbf16>, vector<4x32xbf16>, vector<256x32xf32> -> vector<256x32xf32>
    %48 = arith.addf %40, %47 : vector<256x32xf32>
    %c0_42 = arith.constant 0 : index
    %c2_43 = arith.constant 2 : index
    %c0_44 = arith.constant 0 : index
    %c0_45 = arith.constant 0 : index
    %49 = vector.load %arg1[%c0_42, %c2_43, %c0_44, %c0_45] : memref<1x18x18x4xf32, #tpu.memory_space<vmem>>, vector<1x16x16x4xf32>
    %50 = vector.shape_cast %49 : vector<1x16x16x4xf32> to vector<16x16x4xf32>
    %51 = vector.shape_cast %50 : vector<16x16x4xf32> to vector<256x4xf32>
    %52 = arith.truncf %51 : vector<256x4xf32> to vector<256x4xbf16>
    %c6 = arith.constant 6 : index
    %c0_46 = arith.constant 0 : index
    %c0_47 = arith.constant 0 : index
    %53 = vector.load %arg2[%c6, %c0_46, %c0_47] : memref<9x4x32xbf16, #tpu.memory_space<vmem>>, vector<1x4x32xbf16>
    %54 = vector.shape_cast %53 : vector<1x4x32xbf16> to vector<4x32xbf16>
    %cst_48 = arith.constant dense<0.000000e+00> : vector<256x32xf32>
    %55 = tpu.matmul %52, %54, %cst_48 {dimension_numbers = #tpu.dot_dimension_numbers<[1], [0], [0], [1], [0, 0, 1, 1], [], []>} : vector<256x4xbf16>, vector<4x32xbf16>, vector<256x32xf32> -> vector<256x32xf32>
    %56 = arith.addf %48, %55 : vector<256x32xf32>
    %c0_49 = arith.constant 0 : index
    %c2_50 = arith.constant 2 : index
    %c1_51 = arith.constant 1 : index
    %c0_52 = arith.constant 0 : index
    %57 = vector.load %arg1[%c0_49, %c2_50, %c1_51, %c0_52] : memref<1x18x18x4xf32, #tpu.memory_space<vmem>>, vector<1x16x16x4xf32>
    %58 = vector.shape_cast %57 : vector<1x16x16x4xf32> to vector<16x16x4xf32>
    %59 = vector.shape_cast %58 : vector<16x16x4xf32> to vector<256x4xf32>
    %60 = arith.truncf %59 : vector<256x4xf32> to vector<256x4xbf16>
    %c7 = arith.constant 7 : index
    %c0_53 = arith.constant 0 : index
    %c0_54 = arith.constant 0 : index
    %61 = vector.load %arg2[%c7, %c0_53, %c0_54] : memref<9x4x32xbf16, #tpu.memory_space<vmem>>, vector<1x4x32xbf16>
    %62 = vector.shape_cast %61 : vector<1x4x32xbf16> to vector<4x32xbf16>
    %cst_55 = arith.constant dense<0.000000e+00> : vector<256x32xf32>
    %63 = tpu.matmul %60, %62, %cst_55 {dimension_numbers = #tpu.dot_dimension_numbers<[1], [0], [0], [1], [0, 0, 1, 1], [], []>} : vector<256x4xbf16>, vector<4x32xbf16>, vector<256x32xf32> -> vector<256x32xf32>
    %64 = arith.addf %56, %63 : vector<256x32xf32>
    %c0_56 = arith.constant 0 : index
    %c2_57 = arith.constant 2 : index
    %c2_58 = arith.constant 2 : index
    %c0_59 = arith.constant 0 : index
    %65 = vector.load %arg1[%c0_56, %c2_57, %c2_58, %c0_59] : memref<1x18x18x4xf32, #tpu.memory_space<vmem>>, vector<1x16x16x4xf32>
    %66 = vector.shape_cast %65 : vector<1x16x16x4xf32> to vector<16x16x4xf32>
    %67 = vector.shape_cast %66 : vector<16x16x4xf32> to vector<256x4xf32>
    %68 = arith.truncf %67 : vector<256x4xf32> to vector<256x4xbf16>
    %c8 = arith.constant 8 : index
    %c0_60 = arith.constant 0 : index
    %c0_61 = arith.constant 0 : index
    %69 = vector.load %arg2[%c8, %c0_60, %c0_61] : memref<9x4x32xbf16, #tpu.memory_space<vmem>>, vector<1x4x32xbf16>
    %70 = vector.shape_cast %69 : vector<1x4x32xbf16> to vector<4x32xbf16>
    %cst_62 = arith.constant dense<0.000000e+00> : vector<256x32xf32>
    %71 = tpu.matmul %68, %70, %cst_62 {dimension_numbers = #tpu.dot_dimension_numbers<[1], [0], [0], [1], [0, 0, 1, 1], [], []>} : vector<256x4xbf16>, vector<4x32xbf16>, vector<256x32xf32> -> vector<256x32xf32>
    %72 = arith.addf %64, %71 : vector<256x32xf32>
    %c0_63 = arith.constant 0 : index
    %c0_64 = arith.constant 0 : index
    %73 = vector.load %arg3[%c0_63, %c0_64] : memref<1x32xf32, #tpu.memory_space<vmem>>, vector<1x32xf32>
    %74 = vector.broadcast %73 : vector<1x32xf32> to vector<256x32xf32>
    %75 = arith.mulf %72, %74 : vector<256x32xf32>
    %c0_65 = arith.constant 0 : index
    %c0_66 = arith.constant 0 : index
    %76 = vector.load %arg4[%c0_65, %c0_66] : memref<1x32xf32, #tpu.memory_space<vmem>>, vector<1x32xf32>
    %77 = vector.broadcast %76 : vector<1x32xf32> to vector<256x32xf32>
    %78 = arith.addf %75, %77 : vector<256x32xf32>
    %cst_67 = arith.constant 0.000000e+00 : f32
    %79 = vector.broadcast %cst_67 : f32 to vector<256x32xf32>
    %80 = arith.maximumf %78, %79 : vector<256x32xf32>
    %c0_68 = arith.constant 0 : index
    %c1_69 = arith.constant 1 : index
    %c1_70 = arith.constant 1 : index
    %c0_71 = arith.constant 0 : index
    %81 = vector.load %arg1[%c0_68, %c1_69, %c1_70, %c0_71] : memref<1x18x18x4xf32, #tpu.memory_space<vmem>>, vector<1x16x16x4xf32>
    %82 = vector.shape_cast %81 : vector<1x16x16x4xf32> to vector<16x16x4xf32>
    %83 = vector.shape_cast %82 : vector<16x16x4xf32> to vector<256x4xf32>
    %84 = arith.truncf %83 : vector<256x4xf32> to vector<256x4xbf16>
    %c0_72 = arith.constant 0 : index
    %c0_73 = arith.constant 0 : index
    %85 = vector.load %arg5[%c0_72, %c0_73] : memref<4x32xbf16, #tpu.memory_space<vmem>>, vector<4x32xbf16>
    %cst_74 = arith.constant dense<0.000000e+00> : vector<256x32xf32>
    %86 = tpu.matmul %84, %85, %cst_74 {dimension_numbers = #tpu.dot_dimension_numbers<[1], [0], [0], [1], [0, 0, 1, 1], [], []>} : vector<256x4xbf16>, vector<4x32xbf16>, vector<256x32xf32> -> vector<256x32xf32>
    %c0_75 = arith.constant 0 : index
    %c0_76 = arith.constant 0 : index
    %87 = vector.load %arg6[%c0_75, %c0_76] : memref<1x32xf32, #tpu.memory_space<vmem>>, vector<1x32xf32>
    %88 = vector.broadcast %87 : vector<1x32xf32> to vector<256x32xf32>
    %89 = arith.addf %86, %88 : vector<256x32xf32>
    %cst_77 = arith.constant 0.000000e+00 : f32
    %90 = vector.broadcast %cst_77 : f32 to vector<18x25x32xf32>
    %c0_78 = arith.constant 0 : index
    %c0_79 = arith.constant 0 : index
    %c0_80 = arith.constant 0 : index
    %91 = vector.load %arg11[%c0_78, %c0_79, %c0_80] : memref<18x25x32xf32, #tpu.memory_space<vmem>>, vector<18x25x32xf32>
    tpu.vector_store %arg11[%c0_78, %c0_79, %c0_80], %90 {strides = array<i32>} : memref<18x25x32xf32, #tpu.memory_space<vmem>>, vector<18x25x32xf32>,
    %92 = vector.shape_cast %80 : vector<256x32xf32> to vector<16x16x32xf32>
    %c1_81 = arith.constant 1 : index
    %c8_82 = arith.constant 8 : index
    %c0_83 = arith.constant 0 : index
    %93 = vector.load %arg11[%c1_81, %c8_82, %c0_83] : memref<18x25x32xf32, #tpu.memory_space<vmem>>, vector<16x16x32xf32>
    tpu.vector_store %arg11[%c1_81, %c8_82, %c0_83], %92 {strides = array<i32>} : memref<18x25x32xf32, #tpu.memory_space<vmem>>, vector<16x16x32xf32>,
    %cst_84 = arith.constant 0.000000e+00 : f32
    %94 = vector.broadcast %cst_84 : f32 to vector<256x32xf32>
    %c0_85 = arith.constant 0 : index
    %c7_86 = arith.constant 7 : index
    %c0_87 = arith.constant 0 : index
    %95 = vector.load %arg11[%c0_85, %c7_86, %c0_87] : memref<18x25x32xf32, #tpu.memory_space<vmem>>, vector<16x16x32xf32>
    %96 = vector.shape_cast %95 : vector<16x16x32xf32> to vector<256x32xf32>
    %97 = arith.truncf %96 : vector<256x32xf32> to vector<256x32xbf16>
    %c0_88 = arith.constant 0 : index
    %c0_89 = arith.constant 0 : index
    %c0_90 = arith.constant 0 : index
    %98 = vector.load %arg7[%c0_88, %c0_89, %c0_90] : memref<9x32x32xbf16, #tpu.memory_space<vmem>>, vector<1x32x32xbf16>
    %99 = vector.shape_cast %98 : vector<1x32x32xbf16> to vector<32x32xbf16>
    %cst_91 = arith.constant dense<0.000000e+00> : vector<256x32xf32>
    %100 = tpu.matmul %97, %99, %cst_91 {dimension_numbers = #tpu.dot_dimension_numbers<[1], [0], [0], [1], [0, 0, 1, 1], [], []>} : vector<256x32xbf16>, vector<32x32xbf16>, vector<256x32xf32> -> vector<256x32xf32>
    %101 = arith.addf %94, %100 : vector<256x32xf32>
    %c0_92 = arith.constant 0 : index
    %c8_93 = arith.constant 8 : index
    %c0_94 = arith.constant 0 : index
    %102 = vector.load %arg11[%c0_92, %c8_93, %c0_94] : memref<18x25x32xf32, #tpu.memory_space<vmem>>, vector<16x16x32xf32>
    %103 = vector.shape_cast %102 : vector<16x16x32xf32> to vector<256x32xf32>
    %104 = arith.truncf %103 : vector<256x32xf32> to vector<256x32xbf16>
    %c1_95 = arith.constant 1 : index
    %c0_96 = arith.constant 0 : index
    %c0_97 = arith.constant 0 : index
    %105 = vector.load %arg7[%c1_95, %c0_96, %c0_97] : memref<9x32x32xbf16, #tpu.memory_space<vmem>>, vector<1x32x32xbf16>
    %106 = vector.shape_cast %105 : vector<1x32x32xbf16> to vector<32x32xbf16>
    %cst_98 = arith.constant dense<0.000000e+00> : vector<256x32xf32>
    %107 = tpu.matmul %104, %106, %cst_98 {dimension_numbers = #tpu.dot_dimension_numbers<[1], [0], [0], [1], [0, 0, 1, 1], [], []>} : vector<256x32xbf16>, vector<32x32xbf16>, vector<256x32xf32> -> vector<256x32xf32>
    %108 = arith.addf %101, %107 : vector<256x32xf32>
    %c0_99 = arith.constant 0 : index
    %c9 = arith.constant 9 : index
    %c0_100 = arith.constant 0 : index
    %109 = vector.load %arg11[%c0_99, %c9, %c0_100] : memref<18x25x32xf32, #tpu.memory_space<vmem>>, vector<16x16x32xf32>
    %110 = vector.shape_cast %109 : vector<16x16x32xf32> to vector<256x32xf32>
    %111 = arith.truncf %110 : vector<256x32xf32> to vector<256x32xbf16>
    %c2_101 = arith.constant 2 : index
    %c0_102 = arith.constant 0 : index
    %c0_103 = arith.constant 0 : index
    %112 = vector.load %arg7[%c2_101, %c0_102, %c0_103] : memref<9x32x32xbf16, #tpu.memory_space<vmem>>, vector<1x32x32xbf16>
    %113 = vector.shape_cast %112 : vector<1x32x32xbf16> to vector<32x32xbf16>
    %cst_104 = arith.constant dense<0.000000e+00> : vector<256x32xf32>
    %114 = tpu.matmul %111, %113, %cst_104 {dimension_numbers = #tpu.dot_dimension_numbers<[1], [0], [0], [1], [0, 0, 1, 1], [], []>} : vector<256x32xbf16>, vector<32x32xbf16>, vector<256x32xf32> -> vector<256x32xf32>
    %115 = arith.addf %108, %114 : vector<256x32xf32>
    %c1_105 = arith.constant 1 : index
    %c7_106 = arith.constant 7 : index
    %c0_107 = arith.constant 0 : index
    %116 = vector.load %arg11[%c1_105, %c7_106, %c0_107] : memref<18x25x32xf32, #tpu.memory_space<vmem>>, vector<16x16x32xf32>
    %117 = vector.shape_cast %116 : vector<16x16x32xf32> to vector<256x32xf32>
    %118 = arith.truncf %117 : vector<256x32xf32> to vector<256x32xbf16>
    %c3_108 = arith.constant 3 : index
    %c0_109 = arith.constant 0 : index
    %c0_110 = arith.constant 0 : index
    %119 = vector.load %arg7[%c3_108, %c0_109, %c0_110] : memref<9x32x32xbf16, #tpu.memory_space<vmem>>, vector<1x32x32xbf16>
    %120 = vector.shape_cast %119 : vector<1x32x32xbf16> to vector<32x32xbf16>
    %cst_111 = arith.constant dense<0.000000e+00> : vector<256x32xf32>
    %121 = tpu.matmul %118, %120, %cst_111 {dimension_numbers = #tpu.dot_dimension_numbers<[1], [0], [0], [1], [0, 0, 1, 1], [], []>} : vector<256x32xbf16>, vector<32x32xbf16>, vector<256x32xf32> -> vector<256x32xf32>
    %122 = arith.addf %115, %121 : vector<256x32xf32>
    %c1_112 = arith.constant 1 : index
    %c8_113 = arith.constant 8 : index
    %c0_114 = arith.constant 0 : index
    %123 = vector.load %arg11[%c1_112, %c8_113, %c0_114] : memref<18x25x32xf32, #tpu.memory_space<vmem>>, vector<16x16x32xf32>
    %124 = vector.shape_cast %123 : vector<16x16x32xf32> to vector<256x32xf32>
    %125 = arith.truncf %124 : vector<256x32xf32> to vector<256x32xbf16>
    %c4_115 = arith.constant 4 : index
    %c0_116 = arith.constant 0 : index
    %c0_117 = arith.constant 0 : index
    %126 = vector.load %arg7[%c4_115, %c0_116, %c0_117] : memref<9x32x32xbf16, #tpu.memory_space<vmem>>, vector<1x32x32xbf16>
    %127 = vector.shape_cast %126 : vector<1x32x32xbf16> to vector<32x32xbf16>
    %cst_118 = arith.constant dense<0.000000e+00> : vector<256x32xf32>
    %128 = tpu.matmul %125, %127, %cst_118 {dimension_numbers = #tpu.dot_dimension_numbers<[1], [0], [0], [1], [0, 0, 1, 1], [], []>} : vector<256x32xbf16>, vector<32x32xbf16>, vector<256x32xf32> -> vector<256x32xf32>
    %129 = arith.addf %122, %128 : vector<256x32xf32>
    %c1_119 = arith.constant 1 : index
    %c9_120 = arith.constant 9 : index
    %c0_121 = arith.constant 0 : index
    %130 = vector.load %arg11[%c1_119, %c9_120, %c0_121] : memref<18x25x32xf32, #tpu.memory_space<vmem>>, vector<16x16x32xf32>
    %131 = vector.shape_cast %130 : vector<16x16x32xf32> to vector<256x32xf32>
    %132 = arith.truncf %131 : vector<256x32xf32> to vector<256x32xbf16>
    %c5_122 = arith.constant 5 : index
    %c0_123 = arith.constant 0 : index
    %c0_124 = arith.constant 0 : index
    %133 = vector.load %arg7[%c5_122, %c0_123, %c0_124] : memref<9x32x32xbf16, #tpu.memory_space<vmem>>, vector<1x32x32xbf16>
    %134 = vector.shape_cast %133 : vector<1x32x32xbf16> to vector<32x32xbf16>
    %cst_125 = arith.constant dense<0.000000e+00> : vector<256x32xf32>
    %135 = tpu.matmul %132, %134, %cst_125 {dimension_numbers = #tpu.dot_dimension_numbers<[1], [0], [0], [1], [0, 0, 1, 1], [], []>} : vector<256x32xbf16>, vector<32x32xbf16>, vector<256x32xf32> -> vector<256x32xf32>
    %136 = arith.addf %129, %135 : vector<256x32xf32>
    %c2_126 = arith.constant 2 : index
    %c7_127 = arith.constant 7 : index
    %c0_128 = arith.constant 0 : index
    %137 = vector.load %arg11[%c2_126, %c7_127, %c0_128] : memref<18x25x32xf32, #tpu.memory_space<vmem>>, vector<16x16x32xf32>
    %138 = vector.shape_cast %137 : vector<16x16x32xf32> to vector<256x32xf32>
    %139 = arith.truncf %138 : vector<256x32xf32> to vector<256x32xbf16>
    %c6_129 = arith.constant 6 : index
    %c0_130 = arith.constant 0 : index
    %c0_131 = arith.constant 0 : index
    %140 = vector.load %arg7[%c6_129, %c0_130, %c0_131] : memref<9x32x32xbf16, #tpu.memory_space<vmem>>, vector<1x32x32xbf16>
    %141 = vector.shape_cast %140 : vector<1x32x32xbf16> to vector<32x32xbf16>
    %cst_132 = arith.constant dense<0.000000e+00> : vector<256x32xf32>
    %142 = tpu.matmul %139, %141, %cst_132 {dimension_numbers = #tpu.dot_dimension_numbers<[1], [0], [0], [1], [0, 0, 1, 1], [], []>} : vector<256x32xbf16>, vector<32x32xbf16>, vector<256x32xf32> -> vector<256x32xf32>
    %143 = arith.addf %136, %142 : vector<256x32xf32>
    %c2_133 = arith.constant 2 : index
    %c8_134 = arith.constant 8 : index
    %c0_135 = arith.constant 0 : index
    %144 = vector.load %arg11[%c2_133, %c8_134, %c0_135] : memref<18x25x32xf32, #tpu.memory_space<vmem>>, vector<16x16x32xf32>
    %145 = vector.shape_cast %144 : vector<16x16x32xf32> to vector<256x32xf32>
    %146 = arith.truncf %145 : vector<256x32xf32> to vector<256x32xbf16>
    %c7_136 = arith.constant 7 : index
    %c0_137 = arith.constant 0 : index
    %c0_138 = arith.constant 0 : index
    %147 = vector.load %arg7[%c7_136, %c0_137, %c0_138] : memref<9x32x32xbf16, #tpu.memory_space<vmem>>, vector<1x32x32xbf16>
    %148 = vector.shape_cast %147 : vector<1x32x32xbf16> to vector<32x32xbf16>
    %cst_139 = arith.constant dense<0.000000e+00> : vector<256x32xf32>
    %149 = tpu.matmul %146, %148, %cst_139 {dimension_numbers = #tpu.dot_dimension_numbers<[1], [0], [0], [1], [0, 0, 1, 1], [], []>} : vector<256x32xbf16>, vector<32x32xbf16>, vector<256x32xf32> -> vector<256x32xf32>
    %150 = arith.addf %143, %149 : vector<256x32xf32>
    %c2_140 = arith.constant 2 : index
    %c9_141 = arith.constant 9 : index
    %c0_142 = arith.constant 0 : index
    %151 = vector.load %arg11[%c2_140, %c9_141, %c0_142] : memref<18x25x32xf32, #tpu.memory_space<vmem>>, vector<16x16x32xf32>
    %152 = vector.shape_cast %151 : vector<16x16x32xf32> to vector<256x32xf32>
    %153 = arith.truncf %152 : vector<256x32xf32> to vector<256x32xbf16>
    %c8_143 = arith.constant 8 : index
    %c0_144 = arith.constant 0 : index
    %c0_145 = arith.constant 0 : index
    %154 = vector.load %arg7[%c8_143, %c0_144, %c0_145] : memref<9x32x32xbf16, #tpu.memory_space<vmem>>, vector<1x32x32xbf16>
    %155 = vector.shape_cast %154 : vector<1x32x32xbf16> to vector<32x32xbf16>
    %cst_146 = arith.constant dense<0.000000e+00> : vector<256x32xf32>
    %156 = tpu.matmul %153, %155, %cst_146 {dimension_numbers = #tpu.dot_dimension_numbers<[1], [0], [0], [1], [0, 0, 1, 1], [], []>} : vector<256x32xbf16>, vector<32x32xbf16>, vector<256x32xf32> -> vector<256x32xf32>
    %157 = arith.addf %150, %156 : vector<256x32xf32>
    %c0_147 = arith.constant 0 : index
    %c0_148 = arith.constant 0 : index
    %158 = vector.load %arg8[%c0_147, %c0_148] : memref<1x32xf32, #tpu.memory_space<vmem>>, vector<1x32xf32>
    %159 = vector.broadcast %158 : vector<1x32xf32> to vector<256x32xf32>
    %160 = arith.mulf %157, %159 : vector<256x32xf32>
    %c0_149 = arith.constant 0 : index
    %c0_150 = arith.constant 0 : index
    %161 = vector.load %arg9[%c0_149, %c0_150] : memref<1x32xf32, #tpu.memory_space<vmem>>, vector<1x32xf32>
    %162 = vector.broadcast %161 : vector<1x32xf32> to vector<256x32xf32>
    %163 = arith.addf %160, %162 : vector<256x32xf32>
    %cst_151 = arith.constant 0.000000e+00 : f32
    %164 = vector.broadcast %cst_151 : f32 to vector<256x32xf32>
    %165 = arith.maximumf %163, %164 : vector<256x32xf32>
    %166 = arith.addf %165, %89 : vector<256x32xf32>
    %cst_152 = arith.constant 0.000000e+00 : f32
    %167 = vector.broadcast %cst_152 : f32 to vector<256x32xf32>
    %168 = arith.maximumf %166, %167 : vector<256x32xf32>
    %c0_153 = arith.constant 0 : index
    %c0_154 = arith.constant 0 : index
    %c0_155 = arith.constant 0 : index
    %169 = vector.load %arg10[%c0_153, %c0_154, %c0_155] : memref<1x256x32xf32, #tpu.memory_space<vmem>>, vector<1x256x32xf32>
    %170 = vector.shape_cast %169 : vector<1x256x32xf32> to vector<256x32xf32>
    %171 = vector.shape_cast %168 : vector<256x32xf32> to vector<1x256x32xf32>
    tpu.vector_store %arg10[%c0_153, %c0_154, %c0_155], %171 {strides = array<i32>} : memref<1x256x32xf32, #tpu.memory_space<vmem>>, vector<1x256x32xf32>,
    return
  }
  func.func @transform_0(%arg0: i32) -> (i32, i32, i32, i32) {
    %c0_i32 = arith.constant 0 : i32
    %c0_i32_0 = arith.constant 0 : i32
    %c0_i32_1 = arith.constant 0 : i32
    %c0_i32_2 = arith.constant 0 : i32
    return %arg0, %c0_i32, %c0_i32_0, %c0_i32_1 : i32, i32, i32, i32
  }
  func.func @transform_1(%arg0: i32) -> (i32, i32, i32) {
    %c0_i32 = arith.constant 0 : i32
    %c0_i32_0 = arith.constant 0 : i32
    %c0_i32_1 = arith.constant 0 : i32
    %c0_i32_2 = arith.constant 0 : i32
    return %c0_i32, %c0_i32_0, %c0_i32_1 : i32, i32, i32
  }
  func.func @transform_2(%arg0: i32) -> (i32, i32) {
    %c0_i32 = arith.constant 0 : i32
    %c0_i32_0 = arith.constant 0 : i32
    %c0_i32_1 = arith.constant 0 : i32
    return %c0_i32, %c0_i32_0 : i32, i32
  }
  func.func @transform_3(%arg0: i32) -> (i32, i32) {
    %c0_i32 = arith.constant 0 : i32
    %c0_i32_0 = arith.constant 0 : i32
    %c0_i32_1 = arith.constant 0 : i32
    return %c0_i32, %c0_i32_0 : i32, i32
  }
  func.func @transform_4(%arg0: i32) -> (i32, i32) {
    %c0_i32 = arith.constant 0 : i32
    %c0_i32_0 = arith.constant 0 : i32
    %c0_i32_1 = arith.constant 0 : i32
    return %c0_i32, %c0_i32_0 : i32, i32
  }
  func.func @transform_5(%arg0: i32) -> (i32, i32) {
    %c0_i32 = arith.constant 0 : i32
    %c0_i32_0 = arith.constant 0 : i32
    %c0_i32_1 = arith.constant 0 : i32
    return %c0_i32, %c0_i32_0 : i32, i32
  }
  func.func @transform_6(%arg0: i32) -> (i32, i32, i32) {
    %c0_i32 = arith.constant 0 : i32
    %c0_i32_0 = arith.constant 0 : i32
    %c0_i32_1 = arith.constant 0 : i32
    %c0_i32_2 = arith.constant 0 : i32
    return %c0_i32, %c0_i32_0, %c0_i32_1 : i32, i32, i32
  }
  func.func @transform_7(%arg0: i32) -> (i32, i32) {
    %c0_i32 = arith.constant 0 : i32
    %c0_i32_0 = arith.constant 0 : i32
    %c0_i32_1 = arith.constant 0 : i32
    return %c0_i32, %c0_i32_0 : i32, i32
  }
  func.func @transform_8(%arg0: i32) -> (i32, i32) {
    %c0_i32 = arith.constant 0 : i32
    %c0_i32_0 = arith.constant 0 : i32
    %c0_i32_1 = arith.constant 0 : i32
    return %c0_i32, %c0_i32_0 : i32, i32
  }
  func.func @transform_9(%arg0: i32) -> (i32, i32, i32) {
    %c0_i32 = arith.constant 0 : i32
    %c0_i32_0 = arith.constant 0 : i32
    %c0_i32_1 = arith.constant 0 : i32
    return %arg0, %c0_i32, %c0_i32_0 : i32, i32, i32
  }
}

</mosaic_0001>

<bundles_post_ra>
// kernel: res_encoder_forward.1
= control target key start
LH: loop header
LB: loop body
LE: loop exit
PB: predicated region body
PF: predicated region fallthrough
CT: control target
= control target key end

     0   :  { %14 = vsyncpa [#allocation4], 0  ;;  %s10918_s0 = inlined_call_operand.vmem [shape: f32[2,18,18,4], index: 0, kind: input, shape index: {}]   ;;  %s10919_s1 = inlined_call_operand.vmem [shape: bf16[9,4,32], index: 1, kind: input, shape index: {}]   ;;  %s10920_s2 = inlined_call_operand.vmem [shape: f32[1,32], index: 2, kind: input, shape index: {}]   ;;  %s10921_s3 = inlined_call_operand.vmem [shape: f32[1,32], index: 3, kind: input, shape index: {}]   ;;  %s10922_s4 = inlined_call_operand.vmem [shape: bf16[4,32], index: 4, kind: input, shape index: {}]   ;;  %s10923_s5 = inlined_call_operand.vmem [shape: f32[1,32], index: 5, kind: input, shape index: {}]   ;;  %s10924_s6 = inlined_call_operand.vmem [shape: bf16[9,32,32], index: 6, kind: input, shape index: {}]   ;;  %s10925_s7 = inlined_call_operand.vmem [shape: f32[1,32], index: 7, kind: input, shape index: {}]   ;;  %s10926_s8 = inlined_call_operand.vmem [shape: f32[1,32], index: 8, kind: input, shape index: {}]   ;;  %s10927_s9 = inlined_call_operand.hbm [shape: f32[2,256,32], index: 9, kind: output, shape index: {}]  }
   0x1   :  { %16 = vsyncpa [#allocation4 + $0x1], 0  ;;  %s8035_s30 = smov 0   ;;  %s8037_s10 = smov 0  }
   0x2   :  { %s8039_s11 = smov 0   ;;  %s8041_s12 = smov 0  }
   0x3 LB: > { %s8056_s13 = sadd.s32 4294967295, %s7979_s12   ;;  %s6278_s14 = sadd.s32 4294967294, %s7979_s12   ;;  %s7979_s12 = sphi %s8041_s12, %s11307_s12   ;;  %s7975_s11 = sphi %s8039_s11, %s11306_s11   ;;  %s7971_s10 = sphi %s8037_s10, %s11305_s10   ;;  %s7967_s30 = sphi %s8035_s30, %s11304_s30  }
   0x4   : > { %s8060_s15 = sadd.s32 1, %s7979_s12   ;;  %s223_s16 = sadd.s32 1, %s7975_s11 }
   0x5   : > { %s220_s17 = ssub.s32 %s7979_s12, %s8060_s15  ;;  %p233_p0 = scmp.ne.s32.totalorder %s7975_s11, %s7971_s10 }
   0x6   : > { %p221_p1 = scmp.eq.s32.totalorder %s220_s17, 0  ;;  %p234_p2 = scmp.eq.s32.totalorder %s8056_s13, 1 }
   0x7   : > { %p239_p3 = scmp.ne.s32.totalorder %s7971_s10, %s7967_s30  ;;  %p240_p4 = scmp.eq.s32.totalorder %s6278_s14, 1 }
   0x8   : > { %s8071_s18 = scalar_select %p221_p1, %s7975_s11, %s223_s16  }
   0x9   : > { %p8073_p5 = por %p234_p2, %p233_p0  ;;  %p8077_p6 = por %p240_p4, %p239_p3 }
   0xa   : > { %p6281_p7 = scmp.ge.s32.totalorder %s7979_s12, 1  ;;  %p290_p8 = scmp.lt.s32.totalorder %s7979_s12, 3 }
   0xc   : > { %p291_p9 = pnand %p6281_p7, %p290_p8 }
   0xe   : > { %294 = sbr.rel (%p291_p9) target bundleno = 1013 (0x3f5), region = 56 }
  0x13   : > { %v6284_v0 = vld [vmem:[%s10919_s1 + $0x2] sm:$0x3]  ;;  %vm480_vm0 = vcmask 1041408   ;;  %p326_p10 = scmp.lt.s32.totalorder %s8056_s13, 1  ;;  %v380_v2 = vld [vmem:[%s10919_s1] sm:$0x3] }
  0x14   : > { %7848 = vmatprep.subr.msk.bf16.mxu1 %vm480_vm0, %v6284_v0  ;;  %7847 = vmatprep.subr.msk.bf16.mxu0 %vm480_vm0, %v6284_v0  ;;  %v482_v1 = vsel %vm480_vm0, %v6284_v0, 0  ;;  %v6317_v3 = vld [vmem:[%s10919_s1 + $0x4] sm:$0x3]  ;;  %vm431_vm1 = vcmask 31744   ;;  %v694_v18 = vsel %vm480_vm0, %v380_v2, 0  ;;  %vm3199_vm2 = vcmask 261120  }
  0x15   : > { %7846 = vmatpush3.bf16.msra.mxu1 %v482_v1  ;;  %7182 = vmatpush3.bf16.msra.mxu0 %v482_v1  ;;  %s327_s27 = scalar_select %p326_p10, %s8056_s13, 1  ;;  %v956_v15 = vsel %vm480_vm0, %v6317_v3, 0  ;;  %v8136_v24 = vld [vmem:[%s10919_s1 + $0x6] sm:$0x3]  ;;  %v8141_v25 = vld [vmem:[%s10919_s1 + $0x8] sm:$0x3] }
  0x16   : > { %7849 = vmatprep.subr.msk.bf16.mxu1 %vm480_vm0, %v380_v2  ;;  %7850 = vmatprep.subr.msk.bf16.mxu0 %vm480_vm0, %v6317_v3  ;;  %vm3203_vm3 = vcmask 253952   ;;  %s323_s21 = sand.u32 1, %s7971_s10   ;;  %s6848_s24 = sshll.u32 %s8056_s13, 12 }
  0x17   : > { %s7858_s28 = smul.u32 432, %s327_s27  ;;  %s6282_s22 = sshll.u32 %s323_s21, 8 }
  0x18   : > { %s10636_s23 = scalar_lea.vmem [#allocation3], %s6282_s22  ;;  %s10868_s27 = scalar_lea.hbm %s10927_s9, %s6848_s24 }
  0x19   : > { %s8102_s16 = scalar_lea.vmem %s10918_s0, %s7858_s28  ;;  %s10878_s13 = scalar_lea.sflag [#allocation4], %s323_s21 }
  0x1a   : > { %v381_v4 = vld [vmem:[%s8102_s16 + $0x1] sm:$0xff]  ;;  %v382_v5 = vld [vmem:[%s8102_s16 + $0x9] sm:$0xff]  ;;  %v383_v9 = vld [vmem:[%s8102_s16 + $0x19] sm:$0xff]  ;;  %s7982_s29 = smov [#allocation3]  }
  0x1b   : > { %v397_v6 = vld [vmem:[%s8102_s16 + $0xc1] sm:$0xff]  ;;  %v413_v7 = vpack.c.bf16 %v382_v5, %v381_v4  ;;  %v398_v8 = vld [vmem:[%s8102_s16 + $0xc9] sm:$0xff]  ;;  %v399_v13 = vld [vmem:[%s8102_s16 + $0xd9] sm:$0xff]  ;;  %s7923_s14 = sshll.u32 %s7982_s29, 4  ;;  %s7924_s14 = int_to_ptr.vmem [resolvable:$false] %s7923_s14 }
  0x1c   : > { %v384_v10 = vld [vmem:[%s8102_s16 + $0x21] sm:$0xff]  ;;  %v8110_v11 = vpack.c.bf16 %v398_v8, %v397_v6  ;;  %v385_v16 = vld [vmem:[%s8102_s16 + $0x31] sm:$0xff]  ;;  %v386_v19 = vld [vmem:[%s8102_s16 + $0x39] sm:$0xff]  ;;  %v1251_v8 = vsel %vm480_vm0, %v8136_v24, 0  ;;  %s7925_s17 = scalar_lea.vmem %s7924_s14, 8192 }
  0x1d   : > { %v8112_v12 = vpack.c.bf16 %v384_v10, %v383_v9  ;;  %v400_v14 = vld [vmem:[%s8102_s16 + $0xe1] sm:$0xff]  ;;  %7183 = vmatprep.mubr.msk.bf16.mxu0 %vm431_vm1, %v413_v7  ;;  %v401_v20 = vld [vmem:[%s8102_s16 + $0xf1] sm:$0xff]  ;;  %v402_v21 = vld [vmem:[%s8102_s16 + $0xf9] sm:$0xff]  ;;  %v8129_v22 = vpack.c.bf16 %v386_v19, %v385_v16  ;;  %v1545_v9 = vsel %vm480_vm0, %v8141_v25, 0 }
  0x1e   : > { %10946 = vst [vmem:[#allocation6_spill] sm:$0xff] %v8110_v11  ;;  %v8119_v17 = vpack.c.bf16 %v400_v14, %v399_v13  ;;  %7199 = vmatprep.mubr.msk.bf16.mxu1 %vm431_vm1, %v8110_v11  ;;  %v8131_v23 = vpack.c.bf16 %v402_v21, %v401_v20  ;;  %v387_v26 = vld [vmem:[%s8102_s16 + $0x49] sm:$0xff]  ;;  %v388_v27 = vld [vmem:[%s8102_s16 + $0x51] sm:$0xff]  ;;  %v389_v30 = vld [vmem:[%s8102_s16 + $0x61] sm:$0xff] }
  0x1f   : > { %7184 = vmatmul.mubr.msk.bf16.vlgmr.msra.gmra.mxu0 %vm431_vm1, %v8112_v12  ;;  %v403_v28 = vld [vmem:[%s8102_s16 + $0x109] sm:$0xff]  ;;  %v404_v29 = vld [vmem:[%s8102_s16 + $0x111] sm:$0xff]  ;;  %v405_v32 = vld [vmem:[%s8102_s16 + $0x121] sm:$0xff]  ;;  %v8159_v34 = vpack.c.bf16 %v388_v27, %v387_v26 }
  0x20   : > { %10947 = vst [vmem:[#allocation7_spill] sm:$0xff] %v8119_v17  ;;  %10948 = vst [vmem:[#allocation8_spill] sm:$0xff] %v8131_v23  ;;  %7200 = vmatmul.mubr.msk.bf16.vlgmr.msra.gmra.mxu1 %vm431_vm1, %v8119_v17  ;;  %7250 = vmatpush3.bf16.msra.mxu0 %v956_v15  ;;  %v390_v31 = vld [vmem:[%s8102_s16 + $0x69] sm:$0xff]  ;;  %v8163_v35 = vpack.c.bf16 %v404_v29, %v403_v28  ;;  %v391_v38 = vld [vmem:[%s8102_s16 + $0x79] sm:$0xff] }
  0x21   : > { %7216 = vmatpush3.bf16.msra.mxu1 %v694_v18  ;;  %7187 = vmatprep.mubr.msk.bf16.mxu0 %vm431_vm1, %v8129_v22  ;;  %v406_v33 = vld [vmem:[%s8102_s16 + $0x129] sm:$0xff]  ;;  %10949 = vst [vmem:[#allocation9_spill] sm:$0xff] %v8159_v34  ;;  %v8165_v36 = vpack.c.bf16 %v390_v31, %v389_v30  ;;  %v392_v39 = vld [vmem:[%s8102_s16 + $0x81] sm:$0xff]  ;;  %v407_v40 = vld [vmem:[%s8102_s16 + $0x139] sm:$0xff] }
  0x22   : > { %7203 = vmatprep.mubr.msk.bf16.mxu1 %vm431_vm1, %v8131_v23  ;;  %7851 = vmatprep.subr.msk.bf16.mxu1 %vm480_vm0, %v8136_v24  ;;  %10950 = vst [vmem:[#allocation10_spill] sm:$0xff] %v8163_v35  ;;  %v8167_v37 = vpack.c.bf16 %v406_v33, %v405_v32  ;;  %v408_v41 = vld [vmem:[%s8102_s16 + $0x141] sm:$0xff]  ;;  %v393_v42 = vld [vmem:[%s8102_s16 + $0x91] sm:$0xff]  ;;  %v394_v43 = vld [vmem:[%s8102_s16 + $0x99] sm:$0xff]  ;;  %v8185_v46 = vpack.c.bf16 %v392_v39, %v391_v38 }
  0x23   : > { %7852 = vmatprep.subr.msk.bf16.mxu0 %vm480_vm0, %v8141_v25  ;;  %10951 = vst [vmem:[#allocation11_spill] sm:$0xff] %v8165_v36  ;;  %v409_v44 = vld [vmem:[%s8102_s16 + $0x151] sm:$0xff]  ;;  %v410_v45 = vld [vmem:[%s8102_s16 + $0x159] sm:$0xff]  ;;  %v8187_v47 = vpack.c.bf16 %v408_v41, %v407_v40  ;;  %v8189_v48 = vpack.c.bf16 %v394_v43, %v393_v42  ;;  %v395_v50 = vld [vmem:[%s8102_s16 + $0xa9] sm:$0xff] }
  0x24   : > { %10952 = vst [vmem:[#allocation12_spill] sm:$0xff] %v8167_v37  ;;  %v8191_v49 = vpack.c.bf16 %v410_v45, %v409_v44  ;;  %v396_v51 = vld [vmem:[%s8102_s16 + $0xb1] sm:$0xff]  ;;  %v411_v52 = vld [vmem:[%s8102_s16 + $0x169] sm:$0xff]  ;;  %v332_v56 = vld [vmem:[%s8102_s16] sm:$0xff] }
  0x25   : > { %10953 = vst [vmem:[#allocation13_spill] sm:$0xff] %v8187_v47  ;;  %10954 = vst [vmem:[#allocation14_spill] sm:$0xff] %v8189_v48  ;;  %v412_v53 = vld [vmem:[%s8102_s16 + $0x171] sm:$0xff]  ;;  %v857_v54 = vld [vmem:[%s8102_s16 + $0x2] sm:$0xff]  ;;  %v8209_v58 = vpack.c.bf16 %v396_v51, %v395_v50 }
  0x26   : > { %10955 = vst [vmem:[#allocation15_spill] sm:$0xff] %v8191_v49  ;;  %v858_v55 = vld [vmem:[%s8102_s16 + $0xa] sm:$0xff]  ;;  %v8211_v59 = vpack.c.bf16 %v412_v53, %v411_v52  ;;  %v859_v62 = vld [vmem:[%s8102_s16 + $0x1a] sm:$0xff]  ;;  %v860_v63 = vld [vmem:[%s8102_s16 + $0x22] sm:$0xff] }
  0x27   : > { %7188 = vmatmul.mubr.msk.bf16.gmra.mxu0 %vm431_vm1, %v8159_v34  ;;  %v333_v57 = vld [vmem:[%s8102_s16 + $0x8] sm:$0xff]  ;;  %10956 = vst [vmem:[#allocation16_spill] sm:$0xff] %v8209_v58  ;;  %v889_v60 = vpack.c.bf16 %v858_v55, %v857_v54  ;;  %v334_v0 = vld [vmem:[%s8102_s16 + $0x18] sm:$0xff]  ;;  %v335_v1 = vld [vmem:[%s8102_s16 + $0x20] sm:$0xff]  ;;  %v8225_v4 = vpack.c.bf16 %v860_v63, %v859_v62 }
  0x28   : > { %7204 = vmatmul.mubr.msk.bf16.gmra.mxu1 %vm431_vm1, %v8163_v35  ;;  %7191 = vmatprep.mubr.msk.bf16.mxu0 %vm431_vm1, %v8165_v36  ;;  %10957 = vst [vmem:[#allocation17_spill] sm:$0xff] %v8211_v59  ;;  %v364_v61 = vpack.c.bf16 %v333_v57, %v332_v56  ;;  %v336_v2 = vld [vmem:[%s8102_s16 + $0x30] sm:$0xff]  ;;  %v337_v3 = vld [vmem:[%s8102_s16 + $0x38] sm:$0xff]  ;;  %v8229_v7 = vpack.c.bf16 %v335_v1, %v334_v0  ;;  %v8240_v13 = vld [vmem:[%s10919_s1 + $0xa] sm:$0x3] }
  0x29   : > { %7207 = vmatprep.mubr.msk.bf16.mxu1 %vm431_vm1, %v8167_v37  ;;  %v861_v5 = vld [vmem:[%s8102_s16 + $0x32] sm:$0xff]  ;;  %v862_v6 = vld [vmem:[%s8102_s16 + $0x3a] sm:$0xff]  ;;  %v8235_v10 = vpack.c.bf16 %v337_v3, %v336_v2  ;;  %v863_v15 = vld [vmem:[%s8102_s16 + $0x4a] sm:$0xff] }
  0x2a   : > { %v8242_v14 = vpack.c.bf16 %v862_v6, %v861_v5  ;;  %v864_v16 = vld [vmem:[%s8102_s16 + $0x52] sm:$0xff]  ;;  %v8249_v18 = vld [vmem:[%s10919_s1 + $0xc] sm:$0x3]  ;;  %v340_v21 = vld [vmem:[%s8102_s16 + $0x60] sm:$0xff] }
  0x2b   : > { %v338_v19 = vld [vmem:[%s8102_s16 + $0x48] sm:$0xff]  ;;  %v339_v20 = vld [vmem:[%s8102_s16 + $0x50] sm:$0xff]  ;;  %v8267_v27 = vpack.c.bf16 %v864_v16, %v863_v15  ;;  %v342_v31 = vld [vmem:[%s8102_s16 + $0x78] sm:$0xff] }
  0x2c   : > { %v865_v24 = vld [vmem:[%s8102_s16 + $0x62] sm:$0xff]  ;;  %v866_v25 = vld [vmem:[%s8102_s16 + $0x6a] sm:$0xff]  ;;  %v8271_v28 = vpack.c.bf16 %v339_v20, %v338_v19  ;;  %v867_v32 = vld [vmem:[%s8102_s16 + $0x7a] sm:$0xff] }
  0x2d   : > { %v341_v26 = vld [vmem:[%s8102_s16 + $0x68] sm:$0xff]  ;;  %v8273_v29 = vpack.c.bf16 %v866_v25, %v865_v24  ;;  %v343_v38 = vld [vmem:[%s8102_s16 + $0x80] sm:$0xff]  ;;  %v869_v39 = vld [vmem:[%s8102_s16 + $0x92] sm:$0xff] }
  0x2e   : > { %v8275_v30 = vpack.c.bf16 %v341_v26, %v340_v21  ;;  %v868_v33 = vld [vmem:[%s8102_s16 + $0x82] sm:$0xff]  ;;  %v870_v40 = vld [vmem:[%s8102_s16 + $0x9a] sm:$0xff]  ;;  %v344_v41 = vld [vmem:[%s8102_s16 + $0x90] sm:$0xff]  ;;  %v8295_v44 = vpack.c.bf16 %v343_v38, %v342_v31 }
  0x2f   : > { %7192 = vmatmul.mubr.msk.bf16.gmra.mxu0 %vm431_vm1, %v8185_v46  ;;  %v345_v42 = vld [vmem:[%s8102_s16 + $0x98] sm:$0xff]  ;;  %v8293_v43 = vpack.c.bf16 %v868_v33, %v867_v32  ;;  %v8297_v45 = vpack.c.bf16 %v870_v40, %v869_v39  ;;  %v346_v51 = vld [vmem:[%s8102_s16 + $0xa8] sm:$0xff]  ;;  %v347_v54 = vld [vmem:[%s8102_s16 + $0xb0] sm:$0xff] }
  0x30   : > { %7208 = vmatmul.mubr.msk.bf16.gmra.mxu1 %vm431_vm1, %v8187_v47  ;;  %7195 = vmatprep.mubr.msk.bf16.mxu0 %vm431_vm1, %v8189_v48  ;;  %v8299_v50 = vpack.c.bf16 %v345_v42, %v344_v41  ;;  %v871_v52 = vld [vmem:[%s8102_s16 + $0xaa] sm:$0xff]  ;;  %v872_v53 = vld [vmem:[%s8102_s16 + $0xb2] sm:$0xff]  ;;  %v873_v55 = vld [vmem:[%s8102_s16 + $0xc2] sm:$0xff]  ;;  %v8319_v62 = vpack.c.bf16 %v347_v54, %v346_v51 }
  0x31   : > { %7211 = vmatprep.mubr.msk.bf16.mxu1 %vm431_vm1, %v8191_v49  ;;  %v874_v56 = vld [vmem:[%s8102_s16 + $0xca] sm:$0xff]  ;;  %v348_v57 = vld [vmem:[%s8102_s16 + $0xc0] sm:$0xff]  ;;  %v350_v1 = vld [vmem:[%s8102_s16 + $0xd8] sm:$0xff] }
  0x32   : > { %v8321_v63 = vpack.c.bf16 %v874_v56, %v873_v55  ;;  %v875_v2 = vld [vmem:[%s8102_s16 + $0xda] sm:$0xff]  ;;  %v876_v3 = vld [vmem:[%s8102_s16 + $0xe2] sm:$0xff]  ;;  %v877_v6 = vld [vmem:[%s8102_s16 + $0xf2] sm:$0xff] }
  0x33   : > { %v351_v5 = vld [vmem:[%s8102_s16 + $0xe0] sm:$0xff]  ;;  %v353_v15 = vld [vmem:[%s8102_s16 + $0xf8] sm:$0xff]  ;;  %v8341_v16 = vpack.c.bf16 %v876_v3, %v875_v2  ;;  %v354_v24 = vld [vmem:[%s8102_s16 + $0x108] sm:$0xff] }
  0x34   : > { %v8343_v19 = vpack.c.bf16 %v351_v5, %v350_v1  ;;  %v879_v25 = vld [vmem:[%s8102_s16 + $0x10a] sm:$0xff]  ;;  %v880_v26 = vld [vmem:[%s8102_s16 + $0x112] sm:$0xff]  ;;  %v881_v32 = vld [vmem:[%s8102_s16 + $0x122] sm:$0xff] }
  0x35   : > { %v355_v31 = vld [vmem:[%s8102_s16 + $0x110] sm:$0xff]  ;;  %v356_v38 = vld [vmem:[%s8102_s16 + $0x120] sm:$0xff]  ;;  %v357_v39 = vld [vmem:[%s8102_s16 + $0x128] sm:$0xff]  ;;  %v8365_v40 = vpack.c.bf16 %v880_v26, %v879_v25 }
  0x36   : > { %v882_v33 = vld [vmem:[%s8102_s16 + $0x12a] sm:$0xff]  ;;  %v8367_v41 = vpack.c.bf16 %v355_v31, %v354_v24  ;;  %v8371_v51 = vpack.c.bf16 %v357_v39, %v356_v38  ;;  %v884_v54 = vld [vmem:[%s8102_s16 + $0x142] sm:$0xff]  ;;  %v885_v56 = vld [vmem:[%s8102_s16 + $0x152] sm:$0xff]  ;;  %v2134_v31 = vsel %vm480_vm0, %v8249_v18, 0 }
  0x37   : > { %7196 = vmatmul.mubr.msk.bf16.gmra.mxu0 %vm431_vm1, %v8209_v58  ;;  %v8369_v42 = vpack.c.bf16 %v882_v33, %v881_v32  ;;  %v359_v55 = vld [vmem:[%s8102_s16 + $0x140] sm:$0xff]  ;;  %v361_v1 = vld [vmem:[%s8102_s16 + $0x158] sm:$0xff]  ;;  %v363_v24 = vld [vmem:[%s8102_s16 + $0x170] sm:$0xff]  ;;  %v1839_v32 = vsel %vm480_vm0, %v8240_v13, 0 }
  0x38   : > { %7212 = vmatmul.mubr.msk.bf16.gmra.mxu1 %vm431_vm1, %v8211_v59  ;;  %7251 = vmatprep.mubr.msk.bf16.mxu0 %vm431_vm1, %v889_v60  ;;  %v349_v60 = vld [vmem:[%s8102_s16 + $0xc8] sm:$0xff]  ;;  %v6364_v38 = vld [vmem:[%s8102_s16 + $0x180] sm:$0xff] }
  0x39   : > { %7217 = vmatprep.mubr.msk.bf16.mxu1 %vm431_vm1, %v364_v61  ;;  %v8317_v61 = vpack.c.bf16 %v872_v53, %v871_v52  ;;  %v8323_v0 = vpack.c.bf16 %v349_v60, %v348_v57  ;;  %v358_v52 = vld [vmem:[%s8102_s16 + $0x138] sm:$0xff]  ;;  %v360_v60 = vld [vmem:[%s8102_s16 + $0x150] sm:$0xff]  ;;  %v6562_v33 = vld [vmem:[%s10919_s1 + $0xe] sm:$0x3] }
  0x3a   : > { %v883_v53 = vld [vmem:[%s8102_s16 + $0x13a] sm:$0xff]  ;;  %v8391_v3 = vpack.c.bf16 %v359_v55, %v358_v52  ;;  %v6365_v39 = vld [vmem:[%s8102_s16 + $0x188] sm:$0xff]  ;;  %v2428_v55 = vsel %vm480_vm0, %v6562_v33, 0 }
  0x3b   : > { %v886_v57 = vld [vmem:[%s8102_s16 + $0x15a] sm:$0xff]  ;;  %v8389_v2 = vpack.c.bf16 %v884_v54, %v883_v53  ;;  %v1199_v53 = vpack.c.bf16 %v6365_v39, %v6364_v38 }
  0x3c   : > { %v8393_v5 = vpack.c.bf16 %v886_v57, %v885_v56 }
  0x3f   : > { %7252 = vmatmul.mubr.msk.bf16.vlgmr.msra.gmra.mxu0 %vm431_vm1, %v8225_v4 }
  0x40   : > { %7218 = vmatmul.mubr.msk.bf16.vlgmr.msra.gmra.mxu1 %vm431_vm1, %v8229_v7  ;;  %7318 = vmatpush3.bf16.msra.mxu0 %v1545_v9  ;;  %v352_v9 = vld [vmem:[%s8102_s16 + $0xf0] sm:$0xff] }
  0x41   : > { %7284 = vmatpush3.bf16.msra.mxu1 %v1251_v8  ;;  %7221 = vmatprep.mubr.msk.bf16.mxu1 %vm431_vm1, %v8235_v10  ;;  %v878_v8 = vld [vmem:[%s8102_s16 + $0xfa] sm:$0xff]  ;;  %v8347_v21 = vpack.c.bf16 %v353_v15, %v352_v9  ;;  %v888_v9 = vld [vmem:[%s8102_s16 + $0x172] sm:$0xff]  ;;  %v362_v15 = vld [vmem:[%s8102_s16 + $0x168] sm:$0xff] }
  0x42   : > { %7255 = vmatprep.mubr.msk.bf16.mxu0 %vm431_vm1, %v8242_v14  ;;  %7853 = vmatprep.subr.msk.bf16.mxu1 %vm480_vm0, %v8240_v13  ;;  %v8345_v20 = vpack.c.bf16 %v878_v8, %v877_v6  ;;  %v8395_v6 = vpack.c.bf16 %v361_v1, %v360_v60  ;;  %v887_v8 = vld [vmem:[%s8102_s16 + $0x16a] sm:$0xff]  ;;  %v8411_v26 = vpack.c.bf16 %v363_v24, %v362_v15  ;;  %v6413_v13 = vld [vmem:[%s8102_s16 + $0x181] sm:$0xff] }
  0x43   : > { %7854 = vmatprep.subr.msk.bf16.mxu0 %vm480_vm0, %v8249_v18  ;;  %v8409_v25 = vpack.c.bf16 %v888_v9, %v887_v8  ;;  %v6414_v18 = vld [vmem:[%s8102_s16 + $0x189] sm:$0xff]  ;;  %v6511_v8 = vld [vmem:[%s8102_s16 + $0x198] sm:$0xff]  ;;  %v6512_v9 = vld [vmem:[%s8102_s16 + $0x1a0] sm:$0xff] }
  0x44   : > { %v8493_v52 = vpack.c.bf16 %v6414_v18, %v6413_v13  ;;  %v6462_v24 = vld [vmem:[%s8102_s16 + $0x182] sm:$0xff] }
  0x47   : > { %7256 = vmatmul.mubr.msk.bf16.gmra.mxu0 %vm431_vm1, %v8267_v27 }
  0x48   : > { %7222 = vmatmul.mubr.msk.bf16.gmra.mxu1 %vm431_vm1, %v8271_v28  ;;  %7259 = vmatprep.mubr.msk.bf16.mxu0 %vm431_vm1, %v8273_v29 }
  0x49   : > { %7225 = vmatprep.mubr.msk.bf16.mxu1 %vm431_vm1, %v8275_v30 }
  0x4f   : > { %7260 = vmatmul.mubr.msk.bf16.gmra.mxu0 %vm431_vm1, %v8293_v43 }
  0x50   : > { %7226 = vmatmul.mubr.msk.bf16.gmra.mxu1 %vm431_vm1, %v8295_v44  ;;  %7263 = vmatprep.mubr.msk.bf16.mxu0 %vm431_vm1, %v8297_v45 }
  0x51   : > { %7229 = vmatprep.mubr.msk.bf16.mxu1 %vm431_vm1, %v8299_v50 }
  0x57   : > { %7264 = vmatmul.mubr.msk.bf16.gmra.mxu0 %vm431_vm1, %v8317_v61 }
  0x58   : > { %7230 = vmatmul.mubr.msk.bf16.gmra.mxu1 %vm431_vm1, %v8319_v62  ;;  %7267 = vmatprep.mubr.msk.bf16.mxu0 %vm431_vm1, %v8321_v63 }
  0x59   : > { %7233 = vmatprep.mubr.msk.bf16.mxu1 %vm431_vm1, %v8323_v0 }
  0x5f   : > { %7268 = vmatmul.mubr.msk.bf16.gmra.mxu0 %vm431_vm1, %v8341_v16 }
  0x60   : > { %7234 = vmatmul.mubr.msk.bf16.gmra.mxu1 %vm431_vm1, %v8343_v19  ;;  %7271 = vmatprep.mubr.msk.bf16.mxu0 %vm431_vm1, %v8345_v20 }
  0x61   : > { %7237 = vmatprep.mubr.msk.bf16.mxu1 %vm431_vm1, %v8347_v21 }
  0x67   : > { %7272 = vmatmul.mubr.msk.bf16.gmra.mxu0 %vm431_vm1, %v8365_v40 }
  0x68   : > { %7238 = vmatmul.mubr.msk.bf16.gmra.mxu1 %vm431_vm1, %v8367_v41  ;;  %7275 = vmatprep.mubr.msk.bf16.mxu0 %vm431_vm1, %v8369_v42 }
  0x69   : > { %7241 = vmatprep.mubr.msk.bf16.mxu1 %vm431_vm1, %v8371_v51 }
  0x6f   : > { %7276 = vmatmul.mubr.msk.bf16.gmra.mxu0 %vm431_vm1, %v8389_v2 }
  0x70   : > { %7242 = vmatmul.mubr.msk.bf16.gmra.mxu1 %vm431_vm1, %v8391_v3  ;;  %7279 = vmatprep.mubr.msk.bf16.mxu0 %vm431_vm1, %v8393_v5 }
  0x71   : > { %7245 = vmatprep.mubr.msk.bf16.mxu1 %vm431_vm1, %v8395_v6 }
  0x77   : > { %7280 = vmatmul.mubr.msk.bf16.gmra.mxu0 %vm431_vm1, %v8409_v25 }
  0x78   : > { %7246 = vmatmul.mubr.msk.bf16.gmra.mxu1 %vm431_vm1, %v8411_v26  ;;  %7319 = vmatprep.mubr.msk.bf16.mxu0 %vm431_vm1, %v8112_v12 }
  0x79   : > { %7285 = vmatprep.mubr.msk.bf16.mxu1 %vm431_vm1, %v8229_v7  ;;  %v6611_v7 = vld [vmem:[%s10919_s1 + $0x10] sm:$0x3] }
  0x7a   : > { %v2722_v54 = vsel %vm480_vm0, %v6611_v7, 0 }
  0x7f   : > { %7320 = vmatmul.mubr.msk.bf16.vlgmr.msra.gmra.mxu0 %vm431_vm1, %v8129_v22 }
  0x80   : > { %7286 = vmatmul.mubr.msk.bf16.vlgmr.msra.gmra.mxu1 %vm431_vm1, %v8235_v10  ;;  %7386 = vmatpush3.bf16.msra.mxu0 %v2134_v31  ;;  %v6463_v31 = vld [vmem:[%s8102_s16 + $0x18a] sm:$0xff] }
  0x81   : > { %7352 = vmatpush3.bf16.msra.mxu1 %v1839_v32  ;;  %7289 = vmatprep.mubr.msk.bf16.mxu1 %vm431_vm1, %v8271_v28  ;;  %v8601_v13 = vpack.c.bf16 %v6463_v31, %v6462_v24 }
  0x82   : > { %7323 = vmatprep.mubr.msk.bf16.mxu0 %vm431_vm1, %v8159_v34  ;;  %7855 = vmatprep.subr.msk.bf16.mxu1 %vm480_vm0, %v6562_v33 }
  0x83   : > { %7856 = vmatprep.subr.msk.bf16.mxu0 %vm480_vm0, %v6611_v7 }
  0x87   : > { %7324 = vmatmul.mubr.msk.bf16.gmra.mxu0 %vm431_vm1, %v8165_v36 }
  0x88   : > { %7290 = vmatmul.mubr.msk.bf16.gmra.mxu1 %vm431_vm1, %v8275_v30  ;;  %7327 = vmatprep.mubr.msk.bf16.mxu0 %vm431_vm1, %v8185_v46 }
  0x89   : > { %7293 = vmatprep.mubr.msk.bf16.mxu1 %vm431_vm1, %v8295_v44 }
  0x8f   : > { %7328 = vmatmul.mubr.msk.bf16.gmra.mxu0 %vm431_vm1, %v8189_v48 }
  0x90   : > { %7294 = vmatmul.mubr.msk.bf16.gmra.mxu1 %vm431_vm1, %v8299_v50  ;;  %7331 = vmatprep.mubr.msk.bf16.mxu0 %vm431_vm1, %v8209_v58 }
  0x91   : > { %7297 = vmatprep.mubr.msk.bf16.mxu1 %vm431_vm1, %v8319_v62 }
  0x97   : > { %7332 = vmatmul.mubr.msk.bf16.gmra.mxu0 %vm431_vm1, %v8110_v11 }
  0x98   : > { %7298 = vmatmul.mubr.msk.bf16.gmra.mxu1 %vm431_vm1, %v8323_v0  ;;  %7335 = vmatprep.mubr.msk.bf16.mxu0 %vm431_vm1, %v8119_v17 }
  0x99   : > { %7301 = vmatprep.mubr.msk.bf16.mxu1 %vm431_vm1, %v8343_v19 }
  0x9f   : > { %7336 = vmatmul.mubr.msk.bf16.gmra.mxu0 %vm431_vm1, %v8131_v23 }
  0xa0   : > { %7302 = vmatmul.mubr.msk.bf16.gmra.mxu1 %vm431_vm1, %v8347_v21  ;;  %7339 = vmatprep.mubr.msk.bf16.mxu0 %vm431_vm1, %v8163_v35 }
  0xa1   : > { %7305 = vmatprep.mubr.msk.bf16.mxu1 %vm431_vm1, %v8367_v41 }
  0xa7   : > { %7340 = vmatmul.mubr.msk.bf16.gmra.mxu0 %vm431_vm1, %v8167_v37  ;;  %v6539_v37 = vld [vmem:[%s8102_s16 + $0x99] sm:$0xff] }
  0xa8   : > { %7306 = vmatmul.mubr.msk.bf16.gmra.mxu1 %vm431_vm1, %v8371_v51  ;;  %7343 = vmatprep.mubr.msk.bf16.mxu0 %vm431_vm1, %v8187_v47  ;;  %v6538_v47 = vld [vmem:[%s8102_s16 + $0x91] sm:$0xff] }
  0xa9   : > { %7309 = vmatprep.mubr.msk.bf16.mxu1 %vm431_vm1, %v8391_v3 }
  0xaf   : > { %7344 = vmatmul.mubr.msk.bf16.gmra.mxu0 %vm431_vm1, %v8191_v49 }
  0xb0   : > { %7310 = vmatmul.mubr.msk.bf16.gmra.mxu1 %vm431_vm1, %v8395_v6  ;;  %7347 = vmatprep.mubr.msk.bf16.mxu0 %vm431_vm1, %v8211_v59 }
  0xb1   : > { %7313 = vmatprep.mubr.msk.bf16.mxu1 %vm431_vm1, %v8411_v26 }
  0xb7   : > { %7348 = vmatmul.mubr.msk.bf16.gmra.mxu0 %vm431_vm1, %v8493_v52 }
  0xb8   : > { %7314 = vmatmul.mubr.msk.bf16.gmra.mxu1 %vm431_vm1, %v1199_v53  ;;  %7387 = vmatprep.mubr.msk.bf16.mxu0 %vm431_vm1, %v8235_v10 }
  0xb9   : > { %7353 = vmatprep.mubr.msk.bf16.mxu1 %vm431_vm1, %v8225_v4 }
  0xbf   : > { %7388 = vmatmul.mubr.msk.bf16.vlgmr.msra.gmra.mxu0 %vm431_vm1, %v8271_v28 }
  0xc0   : > { %7354 = vmatmul.mubr.msk.bf16.vlgmr.msra.gmra.mxu1 %vm431_vm1, %v8242_v14  ;;  %7454 = vmatpush3.bf16.msra.mxu0 %v2722_v54 }
  0xc1   : > { %7420 = vmatpush3.bf16.msra.mxu1 %v2428_v55  ;;  %7357 = vmatprep.mubr.msk.bf16.mxu1 %vm431_vm1, %v8267_v27 }
  0xc2   : > { %7391 = vmatprep.mubr.msk.bf16.mxu0 %vm431_vm1, %v8275_v30 }
  0xc7   : > { %7392 = vmatmul.mubr.msk.bf16.gmra.mxu0 %vm431_vm1, %v8295_v44 }
  0xc8   : > { %7358 = vmatmul.mubr.msk.bf16.gmra.mxu1 %vm431_vm1, %v8273_v29  ;;  %7395 = vmatprep.mubr.msk.bf16.mxu0 %vm431_vm1, %v8299_v50 }
  0xc9   : > { %7361 = vmatprep.mubr.msk.bf16.mxu1 %vm431_vm1, %v8293_v43 }
  0xcf   : > { %7396 = vmatmul.mubr.msk.bf16.gmra.mxu0 %vm431_vm1, %v8319_v62 }
  0xd0   : > { %7362 = vmatmul.mubr.msk.bf16.gmra.mxu1 %vm431_vm1, %v8297_v45  ;;  %7399 = vmatprep.mubr.msk.bf16.mxu0 %vm431_vm1, %v8323_v0 }
  0xd1   : > { %7365 = vmatprep.mubr.msk.bf16.mxu1 %vm431_vm1, %v8317_v61 }
  0xd7   : > { %7400 = vmatmul.mubr.msk.bf16.gmra.mxu0 %vm431_vm1, %v8343_v19 }
  0xd8   : > { %7366 = vmatmul.mubr.msk.bf16.gmra.mxu1 %vm431_vm1, %v8321_v63  ;;  %7403 = vmatprep.mubr.msk.bf16.mxu0 %vm431_vm1, %v8347_v21 }
  0xd9   : > { %7369 = vmatprep.mubr.msk.bf16.mxu1 %vm431_vm1, %v8341_v16 }
  0xdf   : > { %v7185_v4 = vpop.f32.mrf.mxu0  ;;  %7404 = vmatmul.mubr.msk.bf16.gmra.mxu0 %vm431_vm1, %v8367_v41 }
  0xe0   : > { %v8538_v10 = vpop.f32.mrf.mxu1  ;;  %7370 = vmatmul.mubr.msk.bf16.gmra.mxu1 %vm431_vm1, %v8345_v20  ;;  %7407 = vmatprep.mubr.msk.bf16.mxu0 %vm431_vm1, %v8371_v51 }
  0xe1   : > { %v518_v28 = vpop.f32.mrf.mxu0  ;;  %7373 = vmatprep.mubr.msk.bf16.mxu1 %vm431_vm1, %v8365_v40 }
  0xe2   : > { %v8546_v30 = vpop.f32.mrf.mxu1 }
  0xe3   : > { %v7186_v44 = vpop.f32.mrf.mxu0 }
  0xe4   : > { %v8548_v50 = vpop.f32.mrf.mxu1 }
  0xe5   : > { %v8550_v62 = vpop.f32.mrf.mxu0 }
  0xe6   : > { %v8552_v0 = vpop.f32.mrf.mxu1 }
  0xe7   : > { %v8554_v19 = vpop.f32.mrf.mxu0  ;;  %7408 = vmatmul.mubr.msk.bf16.gmra.mxu0 %vm431_vm1, %v8391_v3 }
  0xe8   : > { %v8558_v21 = vpop.f32.mrf.mxu1  ;;  %7374 = vmatmul.mubr.msk.bf16.gmra.mxu1 %vm431_vm1, %v8369_v42  ;;  %7411 = vmatprep.mubr.msk.bf16.mxu0 %vm431_vm1, %v8395_v6 }
  0xe9   : > { %v8564_v41 = vpop.f32.mrf.mxu0  ;;  %7377 = vmatprep.mubr.msk.bf16.mxu1 %vm431_vm1, %v8389_v2 }
  0xea   : > { %v8568_v51 = vpop.f32.mrf.mxu1 }
  0xeb   : > { %v8570_v56 = vpop.f32.mrf.mxu0 }
  0xec   : > { %v8572_v57 = vpop.f32.mrf.mxu1 }
  0xed   : > { %v8574_v60 = vpop.f32.mrf.mxu0 }
  0xee   : > { %v8576_v1 = vpop.f32.mrf.mxu1 }
  0xef   : > { %v8578_v3 = vpop.f32.mrf.mxu0  ;;  %7412 = vmatmul.mubr.msk.bf16.gmra.mxu0 %vm431_vm1, %v8411_v26  ;;  %v2082_v26 = vpack.c.bf16 %v6512_v9, %v6511_v8 }
  0xf0   : > { %v8582_v6 = vpop.f32.mrf.mxu1  ;;  %7378 = vmatmul.mubr.msk.bf16.gmra.mxu1 %vm431_vm1, %v8393_v5  ;;  %7415 = vmatprep.mubr.msk.bf16.mxu0 %vm431_vm1, %v1199_v53 }
  0xf1   : > { %v8589_v15 = vpop.f32.mrf.mxu0  ;;  %7381 = vmatprep.mubr.msk.bf16.mxu1 %vm431_vm1, %v8409_v25 }
  0xf2   : > { %v8595_v32 = vpop.f32.mrf.mxu1 }
  0xf3   : > { %v8597_v33 = vpop.f32.mrf.mxu0 }
  0xf4   : > { %v8599_v7 = vpop.f32.mrf.mxu1 }
  0xf5   : > { %v8603_v18 = vpop.f32.mrf.mxu0 }
  0xf6   : > { %v8605_v38 = vpop.f32.mrf.mxu1 }
  0xf7   : > { %v8607_v39 = vpop.f32.mrf.mxu0  ;;  %7416 = vmatmul.mubr.msk.bf16.gmra.mxu0 %vm431_vm1, %v2082_v26 }
  0xf8   : > { %v8610_v25 = vpop.f32.mrf.mxu1  ;;  %7382 = vmatmul.mubr.msk.bf16.gmra.mxu1 %vm431_vm1, %v8601_v13  ;;  %7455 = vmatprep.mubr.msk.bf16.mxu0 %vm431_vm1, %v8242_v14 }
  0xf9   : > { %v8616_v53 = vpop.f32.mrf.mxu0  ;;  %7421 = vmatprep.mubr.msk.bf16.mxu1 %vm431_vm1, %v8129_v22 }
  0xfa   : > { %v8620_v54 = vpop.f32.mrf.mxu1 }
  0xfb   : > { %v8622_v55 = vpop.f32.mrf.mxu0 }
  0xfc   : > { %v8624_v8 = vpop.f32.mrf.mxu1 }
  0xfd   : > { %v8626_v9 = vpop.f32.mrf.mxu0 }
  0xfe   : > { %v8628_v24 = vpop.f32.mrf.mxu1 }
  0xff   : > { %v7253_v31 = vpop.f32.mrf.mxu0  ;;  %7456 = vmatmul.mubr.msk.bf16.vlgmr.msra.gmra.mxu0 %vm431_vm1, %v8267_v27 }
 0x100   : > { %v7219_v14 = vpop.f32.mrf.mxu1  ;;  %7422 = vmatmul.mubr.msk.bf16.vlgmr.msra.gmra.mxu1 %vm431_vm1, %v8159_v34  ;;  %7459 = vmatprep.mubr.msk.bf16.mxu0 %vm431_vm1, %v8273_v29  ;;  %v2365_v29 = vpack.c.bf16 %v6539_v37, %v6538_v47 }
 0x101   : > { %v739_v26 = vadd.f32 %v7219_v14, %v7185_v4  ;;  %v992_v59 = vpop.f32.mrf.mxu0  ;;  %7425 = vmatprep.mubr.msk.bf16.mxu1 %vm431_vm1, %v8165_v36 }
 0x102   : > { %v730_v49 = vpop.f32.mrf.mxu1 }
 0x103   : > { %v8640_v35 = vadd.f32 %v7253_v31, %v739_v26  ;;  %v731_v23 = vadd.f32 %v730_v49, %v518_v28  ;;  %v7254_v17 = vpop.f32.mrf.mxu0  ;;  %v6542_v28 = vld [vmem:[%s8102_s16 + $0xc1] sm:$0xff] }
 0x104   : > { %v7220_v27 = vpop.f32.mrf.mxu1 }
 0x105   : > { %v8642_v11 = vadd.f32 %v992_v59, %v731_v23  ;;  %v742_v58 = vadd.f32 %v7220_v27, %v7186_v44  ;;  %v995_v48 = vpop.f32.mrf.mxu0  ;;  %v6543_v44 = vld [vmem:[%s8102_s16 + $0xc9] sm:$0xff] }
 0x106   : > { %v733_v4 = vpop.f32.mrf.mxu1 }
 0x107   : > { %v8644_v14 = vadd.f32 %v7254_v17, %v742_v58  ;;  %v734_v36 = vadd.f32 %v733_v4, %v8550_v62  ;;  %v7257_v34 = vpop.f32.mrf.mxu0  ;;  %7460 = vmatmul.mubr.msk.bf16.gmra.mxu0 %vm431_vm1, %v8293_v43  ;;  %v6540_v17 = vld [vmem:[%s8102_s16 + $0xa9] sm:$0xff]  ;;  %v6541_v58 = vld [vmem:[%s8102_s16 + $0xb1] sm:$0xff] }
 0x108   : > { %v7223_v49 = vpop.f32.mrf.mxu1  ;;  %7426 = vmatmul.mubr.msk.bf16.gmra.mxu1 %vm431_vm1, %v8185_v46  ;;  %7463 = vmatprep.mubr.msk.bf16.mxu0 %vm431_vm1, %v8297_v45  ;;  %v2366_v27 = vpack.c.bf16 %v6541_v58, %v6540_v17  ;;  %v6544_v17 = vld [vmem:[%s8102_s16 + $0xd9] sm:$0xff]  ;;  %v6545_v58 = vld [vmem:[%s8102_s16 + $0xe1] sm:$0xff] }
 0x109   : > { %v8653_v23 = vadd.f32 %v995_v48, %v734_v36  ;;  %v755_v37 = vadd.f32 %v7223_v49, %v8554_v19  ;;  %v1008_v47 = vpop.f32.mrf.mxu0  ;;  %7429 = vmatprep.mubr.msk.bf16.mxu1 %vm431_vm1, %v2365_v29  ;;  %v2367_v19 = vpack.c.bf16 %v6543_v44, %v6542_v28  ;;  %v6547_v28 = vld [vmem:[%s8102_s16 + $0xf9] sm:$0xff] }
 0x10a   : > { %v746_v59 = vpop.f32.mrf.mxu1 }
 0x10b   : > { %v8661_v43 = vadd.f32 %v7257_v34, %v755_v37  ;;  %v747_v62 = vadd.f32 %v746_v59, %v8564_v41  ;;  %v7258_v31 = vpop.f32.mrf.mxu0  ;;  %v6546_v59 = vld [vmem:[%s8102_s16 + $0xf1] sm:$0xff] }
 0x10c   : > { %v7224_v26 = vpop.f32.mrf.mxu1 }
 0x10d   : > { %v8664_v45 = vadd.f32 %v1008_v47, %v747_v62  ;;  %v758_v36 = vadd.f32 %v7224_v26, %v8570_v56  ;;  %v1011_v48 = vpop.f32.mrf.mxu0  ;;  %v2368_v26 = vpack.c.bf16 %v6545_v58, %v6544_v17  ;;  %v6549_v17 = vld [vmem:[%s8102_s16 + $0x111] sm:$0xff]  ;;  %v6550_v58 = vld [vmem:[%s8102_s16 + $0x121] sm:$0xff] }
 0x10e   : > { %v749_v29 = vpop.f32.mrf.mxu1 }
 0x10f   : > { %v8667_v4 = vadd.f32 %v7258_v31, %v758_v36  ;;  %v750_v34 = vadd.f32 %v749_v29, %v8574_v60  ;;  %v7261_v49 = vpop.f32.mrf.mxu0  ;;  %7464 = vmatmul.mubr.msk.bf16.gmra.mxu0 %vm431_vm1, %v8317_v61  ;;  %v2369_v36 = vpack.c.bf16 %v6547_v28, %v6546_v59 }
 0x110   : > { %v7227_v41 = vpop.f32.mrf.mxu1  ;;  %7430 = vmatmul.mubr.msk.bf16.gmra.mxu1 %vm431_vm1, %v2366_v27  ;;  %7467 = vmatprep.mubr.msk.bf16.mxu0 %vm431_vm1, %v8321_v63 }
 0x111   : > { %v8675_v56 = vadd.f32 %v1011_v48, %v750_v34  ;;  %v771_v37 = vadd.f32 %v7227_v41, %v8578_v3  ;;  %v1024_v47 = vpop.f32.mrf.mxu0  ;;  %7433 = vmatprep.mubr.msk.bf16.mxu1 %vm431_vm1, %v2367_v19  ;;  %v3027_v19 = vld [vmem:[%s10922_s4] sm:$0x3] }
 0x112   : > { %v762_v60 = vpop.f32.mrf.mxu1  ;;  %7857 = vmatprep.subr.msk.bf16.mxu1 %vm480_vm0, %v3027_v19 }
 0x113   : > { %v8683_v44 = vadd.f32 %v7261_v49, %v771_v37  ;;  %v763_v61 = vadd.f32 %v762_v60, %v8589_v15  ;;  %v7262_v62 = vpop.f32.mrf.mxu0  ;;  %v6551_v60 = vld [vmem:[%s8102_s16 + $0x129] sm:$0xff] }
 0x114   : > { %v7228_v31 = vpop.f32.mrf.mxu1 }
 0x115   : > { %v8686_v63 = vadd.f32 %v1024_v47, %v763_v61  ;;  %v774_v27 = vadd.f32 %v7228_v31, %v8597_v33  ;;  %v1027_v3 = vpop.f32.mrf.mxu0  ;;  %v3036_v33 = vsel %vm480_vm0, %v3027_v19, 0  ;;  %v6548_v47 = vld [vmem:[%s8102_s16 + $0x109] sm:$0xff] }
 0x116   : > { %v765_v48 = vpop.f32.mrf.mxu1  ;;  %7488 = vmatpush3.bf16.msra.mxu1 %v3036_v33 }
 0x117   : > { %v8692_v29 = vadd.f32 %v7262_v62, %v774_v27  ;;  %v766_v15 = vadd.f32 %v765_v48, %v8603_v18  ;;  %v7265_v34 = vpop.f32.mrf.mxu0  ;;  %7468 = vmatmul.mubr.msk.bf16.gmra.mxu0 %vm431_vm1, %v8341_v16  ;;  %v2371_v27 = vpack.c.bf16 %v6551_v60, %v6550_v58 }
 0x118   : > { %v7231_v49 = vpop.f32.mrf.mxu1  ;;  %7434 = vmatmul.mubr.msk.bf16.gmra.mxu1 %vm431_vm1, %v2368_v26  ;;  %7471 = vmatprep.mubr.msk.bf16.mxu0 %vm431_vm1, %v8345_v20  ;;  %v2370_v20 = vpack.c.bf16 %v6549_v17, %v6548_v47 }
 0x119   : > { %v8702_v41 = vadd.f32 %v1027_v3, %v766_v15  ;;  %v787_v18 = vadd.f32 %v7231_v49, %v8607_v39  ;;  %v1040_v37 = vpop.f32.mrf.mxu0  ;;  %7437 = vmatprep.mubr.msk.bf16.mxu1 %vm431_vm1, %v2369_v36  ;;  %v7901_v3 = vld [vmem:[%s10924_s6 + $0x18] sm:$0xff]   ;;  %v6553_v49 = vld [vmem:[%s8102_s16 + $0x141] sm:$0xff] }
 0x11a   : > { %v778_v16 = vpop.f32.mrf.mxu1  ;;  %7521 = vmatprep.subr.bf16.mxu0 %v7901_v3 }
 0x11b   : > { %v8710_v59 = vadd.f32 %v7265_v34, %v787_v18  ;;  %v779_v28 = vadd.f32 %v778_v16, %v8616_v53  ;;  %v7266_v61 = vpop.f32.mrf.mxu0  ;;  %7522 = vmatpush3.bf16.msra.mxu0 %v7901_v3 }
 0x11c   : > { %v7232_v62 = vpop.f32.mrf.mxu1 }
 0x11d   : > { %v8713_v31 = vadd.f32 %v1040_v37, %v779_v28  ;;  %v790_v39 = vadd.f32 %v7232_v62, %v8622_v55  ;;  %v1043_v26 = vpop.f32.mrf.mxu0  ;;  %v6554_v37 = vld [vmem:[%s8102_s16 + $0x151] sm:$0xff] }
 0x11e   : > { %v781_v36 = vpop.f32.mrf.mxu1 }
 0x11f   : > { %v8719_v48 = vadd.f32 %v7266_v61, %v790_v39  ;;  %v782_v53 = vadd.f32 %v781_v36, %v8626_v9  ;;  %v7269_v19 = vpop.f32.mrf.mxu0  ;;  %7472 = vmatmul.mubr.msk.bf16.gmra.mxu0 %vm431_vm1, %v8365_v40  ;;  %v6552_v9 = vld [vmem:[%s8102_s16 + $0x139] sm:$0xff] }
 0x120   : > { %v7235_v55 = vpop.f32.mrf.mxu1  ;;  %7438 = vmatmul.mubr.msk.bf16.gmra.mxu1 %vm431_vm1, %v2370_v20  ;;  %7475 = vmatprep.mubr.msk.bf16.mxu0 %vm431_vm1, %v8369_v42  ;;  %v6555_v40 = vld [vmem:[%s8102_s16 + $0x159] sm:$0xff]  ;;  %v2372_v58 = vpack.c.bf16 %v6553_v49, %v6552_v9 }
 0x121   : > { %v8727_v15 = vadd.f32 %v1043_v26, %v782_v53  ;;  %v803_v34 = vadd.f32 %v7235_v55, %v8538_v10  ;;  %v1056_v33 = vpop.f32.mrf.mxu0  ;;  %7441 = vmatprep.mubr.msk.bf16.mxu1 %vm431_vm1, %v2371_v27  ;;  %v2373_v61 = vpack.c.bf16 %v6555_v40, %v6554_v37  ;;  %v6606_v27 = vld [vmem:[%s8102_s16 + $0x172] sm:$0xff]  ;;  %v6556_v53 = vld [vmem:[%s8102_s16 + $0x169] sm:$0xff] }
 0x122   : > { %v794_v18 = vpop.f32.mrf.mxu1 }
 0x123   : > { %v8735_v47 = vadd.f32 %v7269_v19, %v803_v34  ;;  %v795_v17 = vadd.f32 %v794_v18, %v8546_v30  ;;  %v7270_v16 = vpop.f32.mrf.mxu0 }
 0x124   : > { %v7236_v42 = vpop.f32.mrf.mxu1 }
 0x125   : > { %v8738_v60 = vadd.f32 %v1056_v33, %v795_v17  ;;  %v806_v10 = vadd.f32 %v7236_v42, %v8548_v50  ;;  %v8741_v28 = vpop.f32.mrf.mxu0  ;;  %v6605_v50 = vld [vmem:[%s8102_s16 + $0x16a] sm:$0xff]  ;;  %v6609_v42 = vld [vmem:[%s8102_s16 + $0x19a] sm:$0xff] }
 0x126   : > { %v797_v62 = vpop.f32.mrf.mxu1  ;;  %v2668_v33 = vpack.c.bf16 %v6606_v27, %v6605_v50 }
 0x127   : > { %v8743_v20 = vadd.f32 %v7270_v16, %v806_v10  ;;  %v8746_v39 = vadd.f32 %v797_v62, %v8552_v0  ;;  %v7273_v30 = vpop.f32.mrf.mxu0  ;;  %7476 = vmatmul.mubr.msk.bf16.gmra.mxu0 %vm431_vm1, %v8389_v2  ;;  %v6557_v0 = vld [vmem:[%s8102_s16 + $0x171] sm:$0xff] }
 0x128   : > { %v7239_v26 = vpop.f32.mrf.mxu1  ;;  %7442 = vmatmul.mubr.msk.bf16.gmra.mxu1 %vm431_vm1, %v2372_v58  ;;  %7479 = vmatprep.mubr.msk.bf16.mxu0 %vm431_vm1, %v8393_v5  ;;  %v2374_v5 = vpack.c.bf16 %v6557_v0, %v6556_v53 }
 0x129   : > { %v819_v3 = vadd.f32 %v7239_v26, %v8558_v21  ;;  %v1072_v36 = vpop.f32.mrf.mxu0  ;;  %7445 = vmatprep.mubr.msk.bf16.mxu1 %vm431_vm1, %v2373_v61  ;;  %v6560_v61 = vld [vmem:[%s8102_s16 + $0x199] sm:$0xff] }
 0x12a   : > { %v810_v19 = vpop.f32.mrf.mxu1 }
 0x12b   : > { %v8759_v55 = vadd.f32 %v7273_v30, %v819_v3  ;;  %v811_v2 = vadd.f32 %v810_v19, %v8568_v51  ;;  %v7274_v34 = vpop.f32.mrf.mxu0 }
 0x12c   : > { %v7240_v9 = vpop.f32.mrf.mxu1 }
 0x12d   : > { %v8762_v49 = vadd.f32 %v1072_v36, %v811_v2  ;;  %v822_v21 = vadd.f32 %v7240_v9, %v8572_v57  ;;  %v8765_v18 = vpop.f32.mrf.mxu0  ;;  %v6610_v57 = vld [vmem:[%s8102_s16 + $0x1a2] sm:$0xff] }
 0x12e   : > { %v813_v37 = vpop.f32.mrf.mxu1  ;;  %v2670_v27 = vpack.c.bf16 %v6610_v57, %v6609_v42 }
 0x12f   : > { %v8767_v40 = vadd.f32 %v7274_v34, %v822_v21  ;;  %v8770_v17 = vadd.f32 %v813_v37, %v8576_v1  ;;  %v7277_v51 = vpop.f32.mrf.mxu0  ;;  %7480 = vmatmul.mubr.msk.bf16.gmra.mxu0 %vm431_vm1, %v2668_v33  ;;  %v6561_v1 = vld [vmem:[%s8102_s16 + $0x1a1] sm:$0xff]  ;;  %s6216_s16 = sshll.u32 %s10636_s23, 4  ;;  %s10870_s16 = int_to_ptr.vmem [resolvable:$true] %s6216_s16 }
 0x130   : > { %v7243_v16 = vpop.f32.mrf.mxu1  ;;  %7446 = vmatmul.mubr.msk.bf16.gmra.mxu1 %vm431_vm1, %v2374_v5  ;;  %7483 = vmatprep.mubr.msk.bf16.mxu0 %vm431_vm1, %v8601_v13  ;;  %v2376_v36 = vpack.c.bf16 %v6561_v1, %v6560_v61  ;;  %v10958_v1 = vld [vmem:[#allocation9_spill] sm:$0xff]  ;;  %s7919_s28 = scalar_lea.vmem %s10870_s16, 4096  ;;  %p7926_p0 = scmp.lt.s32.totalorder %s10870_s16, %s7924_s14 }
 0x131   : > { %v835_v58 = vadd.f32 %v7243_v16, %v8582_v6  ;;  %v1088_v10 = vpop.f32.mrf.mxu0  ;;  %7449 = vmatprep.mubr.msk.bf16.mxu1 %vm431_vm1, %v8493_v52  ;;  %p7920_p11 = scmp.ne.s32.totalorder %s10870_s16, %s7919_s28  ;;  %p7927_p1 = scmp.lt.s32.totalorder %s7925_s17, %s7919_s28 }
 0x132   : > { %v826_v62 = vpop.f32.mrf.mxu1 }
 0x133   : > { %v8783_v30 = vadd.f32 %v7277_v51, %v835_v58  ;;  %v827_v26 = vadd.f32 %v826_v62, %v8595_v32  ;;  %v7278_v50 = vpop.f32.mrf.mxu0  ;;  %p7921_p12 = pnand %p7920_p11, %p8073_p5  ;;  %p7928_p2 = por %p7927_p1, %p7926_p0 }
 0x134   : > { %v7244_v3 = vpop.f32.mrf.mxu1 }
 0x135   : > { %v8786_v13 = vadd.f32 %v1088_v10, %v827_v26  ;;  %v838_v53 = vadd.f32 %v7244_v3, %v8599_v7  ;;  %v8789_v6 = vpop.f32.mrf.mxu0  ;;  %p7922_p13 = pneg %p7921_p12 }
 0x136   : > { %v829_v0 = vpop.f32.mrf.mxu1 }
 0x137   : > { %v8791_v19 = vadd.f32 %v7278_v50, %v838_v53  ;;  %v8794_v2 = vadd.f32 %v829_v0, %v8605_v38  ;;  %v7281_v34 = vpop.f32.mrf.mxu0  ;;  %7484 = vmatmul.mubr.msk.bf16.gmra.mxu0 %vm431_vm1, %v2670_v27  ;;  %p7929_p3 = pnand %p7928_p2, %p7922_p13 }
 0x138   : > { %v7247_v32 = vpop.f32.mrf.mxu1  ;;  %7450 = vmatmul.mubr.msk.bf16.gmra.mxu1 %vm431_vm1, %v2376_v36 }
 0x139   : > { %v851_v33 = vadd.f32 %v7247_v32, %v8610_v25  ;;  %v1104_v9 = vpop.f32.mrf.mxu0  ;;  %7489 = vmatprep.mubr.msk.bf16.mxu1 %vm431_vm1, %v8112_v12  ;;  %v7902_v25 = vld [vmem:[%s10924_s6 + $0x10] sm:$0xff]  }
 0x13a   : > { %v842_v7 = vpop.f32.mrf.mxu1  ;;  %7523 = vmatprep.subr.bf16.mxu0 %v7902_v25 }
 0x13b   : > { %v8801_v5 = vadd.f32 %v7281_v34, %v851_v33  ;;  %v843_v21 = vadd.f32 %v842_v7, %v8620_v54  ;;  %v7282_v37 = vpop.f32.mrf.mxu0  ;;  %7524 = vmatpush3.bf16.msra.mxu0 %v7902_v25  ;;  %v10959_v33 = vld [vmem:[#allocation11_spill] sm:$0xff]  ;;  %v7981_v7 = vmov 0.0  }
 0x13c   : > { %v7248_v38 = vpop.f32.mrf.mxu1  ;;  %3210 = vst.msk [vmem:[#allocation2 + $0x48] sm:$0xff] %vm3199_vm2, %v7981_v7  ;;  %3200 = vst.msk [vmem:[#allocation2] sm:$0xff] %vm3199_vm2, %v7981_v7 }
 0x13d   : > { %v8804_v51 = vadd.f32 %v1104_v9, %v843_v21  ;;  %v854_v16 = vadd.f32 %v7248_v38, %v8624_v8  ;;  %v8807_v42 = vpop.f32.mrf.mxu0  ;;  %3201 = vst.msk [vmem:[#allocation2 + $0x8] sm:$0xff] %vm3199_vm2, %v7981_v7  ;;  %3202 = vst.msk [vmem:[#allocation2 + $0x10] sm:$0xff] %vm3199_vm2, %v7981_v7 }
 0x13e   : > { %v845_v57 = vpop.f32.mrf.mxu1  ;;  %3205 = vst.msk [vmem:[#allocation2 + $0x20] sm:$0xff] %vm3199_vm2, %v7981_v7  ;;  %3206 = vst.msk [vmem:[#allocation2 + $0x28] sm:$0xff] %vm3199_vm2, %v7981_v7 }
 0x13f   : > { %v8812_v58 = vadd.f32 %v7282_v37, %v854_v16  ;;  %v8815_v12 = vadd.f32 %v845_v57, %v8628_v24  ;;  %v7321_v10 = vpop.f32.mrf.mxu0  ;;  %3207 = vst.msk [vmem:[#allocation2 + $0x30] sm:$0xff] %vm3199_vm2, %v7981_v7  ;;  %3209 = vst.msk [vmem:[#allocation2 + $0x40] sm:$0xff] %vm3199_vm2, %v7981_v7 }
 0x140   : > { %v7287_v54 = vpop.f32.mrf.mxu1  ;;  %7490 = vmatmul.mubr.msk.bf16.vlgmr.msra.gmra.mxu1 %vm431_vm1, %v8129_v22  ;;  %3211 = vst.msk [vmem:[#allocation2 + $0x50] sm:$0xff] %vm3199_vm2, %v7981_v7  ;;  %3213 = vst.msk [vmem:[#allocation2 + $0x60] sm:$0xff] %vm3199_vm2, %v7981_v7 }
 0x141   : > { %v1416_v8 = vadd.f32 %v7287_v54, %v8640_v35  ;;  %v1581_v61 = vpop.f32.mrf.mxu0  ;;  %7493 = vmatprep.mubr.msk.bf16.mxu1 %vm431_vm1, %v10958_v1  ;;  %3214 = vst.msk [vmem:[#allocation2 + $0x68] sm:$0xff] %vm3199_vm2, %v7981_v7  ;;  %3215 = vst.msk [vmem:[#allocation2 + $0x70] sm:$0xff] %vm3199_vm2, %v7981_v7 }
 0x142   : > { %v1287_v62 = vpop.f32.mrf.mxu1  ;;  %3217 = vst.msk [vmem:[#allocation2 + $0x80] sm:$0xff] %vm3199_vm2, %v7981_v7  ;;  %3218 = vst.msk [vmem:[#allocation2 + $0x88] sm:$0xff] %vm3199_vm2, %v7981_v7 }
 0x143   : > { %v8822_v26 = vadd.f32 %v7321_v10, %v1416_v8  ;;  %v1414_v50 = vadd.f32 %v1287_v62, %v8642_v11  ;;  %v7322_v24 = vpop.f32.mrf.mxu0  ;;  %3219 = vst.msk [vmem:[#allocation2 + $0x90] sm:$0xff] %vm3199_vm2, %v7981_v7  ;;  %3221 = vst.msk [vmem:[#allocation2 + $0xa0] sm:$0xff] %vm3199_vm2, %v7981_v7  ;;  %v10961_v62 = vld [vmem:[#allocation16_spill] sm:$0xff] }
 0x144   : > { %v7288_v27 = vpop.f32.mrf.mxu1  ;;  %3222 = vst.msk [vmem:[#allocation2 + $0xa8] sm:$0xff] %vm3199_vm2, %v7981_v7  ;;  %3223 = vst.msk [vmem:[#allocation2 + $0xb0] sm:$0xff] %vm3199_vm2, %v7981_v7 }
 0x145   : > { %v8825_v3 = vadd.f32 %v1581_v61, %v1414_v50  ;;  %v1417_v36 = vadd.f32 %v7288_v27, %v8644_v14  ;;  %v8828_v53 = vpop.f32.mrf.mxu0  ;;  %3225 = vst.msk [vmem:[#allocation2 + $0xc0] sm:$0xff] %vm3199_vm2, %v7981_v7  ;;  %3226 = vst.msk [vmem:[#allocation2 + $0xc8] sm:$0xff] %vm3199_vm2, %v7981_v7  ;;  %v10960_v61 = vld [vmem:[#allocation14_spill] sm:$0xff] }
 0x146   : > { %v1290_v22 = vpop.f32.mrf.mxu1  ;;  %3227 = vst.msk [vmem:[#allocation2 + $0xd0] sm:$0xff] %vm3199_vm2, %v7981_v7  ;;  %3229 = vst.msk [vmem:[#allocation2 + $0xe0] sm:$0xff] %vm3199_vm2, %v7981_v7 }
 0x147   : > { %v8830_v0 = vadd.f32 %v7322_v24, %v1417_v36  ;;  %v8833_v35 = vadd.f32 %v1290_v22, %v8653_v23  ;;  %v8835_v34 = vpop.f32.mrf.mxu0  ;;  %3230 = vst.msk [vmem:[#allocation2 + $0xe8] sm:$0xff] %vm3199_vm2, %v7981_v7  ;;  %3231 = vst.msk [vmem:[#allocation2 + $0xf0] sm:$0xff] %vm3199_vm2, %v7981_v7 }
 0x148   : > { %v7291_v32 = vpop.f32.mrf.mxu1  ;;  %7494 = vmatmul.mubr.msk.bf16.gmra.mxu1 %vm431_vm1, %v10959_v33  ;;  %3233 = vst.msk [vmem:[#allocation2 + $0x100] sm:$0xff] %vm3199_vm2, %v7981_v7  ;;  %3234 = vst.msk [vmem:[#allocation2 + $0x108] sm:$0xff] %vm3199_vm2, %v7981_v7  ;;  %v7904_v33 = vld [vmem:[%s10924_s6] sm:$0xff]  }
 0x149   : > { %v1420_v11 = vadd.f32 %v7291_v32, %v8661_v43  ;;  %v8840_v9 = vpop.f32.mrf.mxu0  ;;  %7497 = vmatprep.mubr.msk.bf16.mxu1 %vm431_vm1, %v8185_v46  ;;  %3235 = vst.msk [vmem:[#allocation2 + $0x110] sm:$0xff] %vm3199_vm2, %v7981_v7  ;;  %3237 = vst.msk [vmem:[#allocation2 + $0x120] sm:$0xff] %vm3199_vm2, %v7981_v7 }
 0x14a   : > { %v1303_v14 = vpop.f32.mrf.mxu1  ;;  %3238 = vst.msk [vmem:[#allocation2 + $0x128] sm:$0xff] %vm3199_vm2, %v7981_v7  ;;  %3239 = vst.msk [vmem:[#allocation2 + $0x130] sm:$0xff] %vm3199_vm2, %v7981_v7 }
 0x14b   : > { %3241 = vst.msk [vmem:[#allocation2 + $0x140] sm:$0xff] %vm3199_vm2, %v7981_v7  ;;  %3242 = vst.msk [vmem:[#allocation2 + $0x148] sm:$0xff] %vm3199_vm2, %v7981_v7  ;;  %v8953_v46 = vadd.f32 %v8835_v34, %v1420_v11  ;;  %v1418_v23 = vadd.f32 %v1303_v14, %v8664_v45  ;;  %v7326_v43 = vpop.f32.mrf.mxu0 }
 0x14c   : > { %3243 = vst.msk [vmem:[#allocation2 + $0x150] sm:$0xff] %vm3199_vm2, %v7981_v7  ;;  %3245 = vst.msk [vmem:[#allocation2 + $0x160] sm:$0xff] %vm3199_vm2, %v7981_v7  ;;  %v7292_v21 = vpop.f32.mrf.mxu1 }
 0x14d   : > { %3246 = vst.msk [vmem:[#allocation2 + $0x168] sm:$0xff] %vm3199_vm2, %v7981_v7  ;;  %3247 = vst.msk [vmem:[#allocation2 + $0x170] sm:$0xff] %vm3199_vm2, %v7981_v7  ;;  %v8957_v37 = vadd.f32 %v8840_v9, %v1418_v23  ;;  %v1421_v38 = vadd.f32 %v7292_v21, %v8667_v4  ;;  %v8960_v16 = vpop.f32.mrf.mxu0  ;;  %v3359_v23 = vld [vmem:[#allocation2 + $0x10] sm:$0xff] }
 0x14e   : > { %3249 = vst.msk [vmem:[#allocation2 + $0x180] sm:$0xff] %vm3199_vm2, %v7981_v7  ;;  %3250 = vst.msk [vmem:[#allocation2 + $0x188] sm:$0xff] %vm3199_vm2, %v7981_v7  ;;  %v1306_v25 = vpop.f32.mrf.mxu1 }
 0x14f   : > { %3251 = vst.msk [vmem:[#allocation2 + $0x190] sm:$0xff] %vm3199_vm2, %v7981_v7  ;;  %3253 = vst.msk [vmem:[#allocation2 + $0x1a0] sm:$0xff] %vm3199_vm2, %v7981_v7  ;;  %v8962_v57 = vadd.f32 %v7326_v43, %v1421_v38  ;;  %v8965_v10 = vadd.f32 %v1306_v25, %v8675_v56  ;;  %v7329_v54 = vpop.f32.mrf.mxu0  ;;  %v7903_v56 = vld [vmem:[%s10924_s6 + $0x8] sm:$0xff]  }
 0x150   : > { %3254 = vst.msk [vmem:[#allocation2 + $0x1a8] sm:$0xff] %vm3199_vm2, %v7981_v7  ;;  %3255 = vst.msk [vmem:[#allocation2 + $0x1b0] sm:$0xff] %vm3199_vm2, %v7981_v7  ;;  %v7295_v8 = vpop.f32.mrf.mxu1  ;;  %7498 = vmatmul.mubr.msk.bf16.gmra.mxu1 %vm431_vm1, %v10960_v61  ;;  %7557 = vmatprep.subr.bf16.mxu1 %v7903_v56  ;;  %v10963_v38 = vld [vmem:[#allocation7_spill] sm:$0xff] }
 0x151   : > { %3257 = vst.msk [vmem:[#allocation2 + $0x1c0] sm:$0xff] %vm3199_vm2, %v7981_v7  ;;  %3258 = vst.msk [vmem:[#allocation2 + $0x1c8] sm:$0xff] %vm3199_vm2, %v7981_v7  ;;  %v1424_v45 = vadd.f32 %v7295_v8, %v8683_v44  ;;  %v1613_v1 = vpop.f32.mrf.mxu0  ;;  %7501 = vmatprep.mubr.msk.bf16.mxu1 %vm431_vm1, %v10961_v62  ;;  %7558 = vmatpush3.bf16.msra.mxu1 %v7903_v56 }
 0x152   : > { %3259 = vst.msk [vmem:[#allocation2 + $0x1d0] sm:$0xff] %vm3199_vm2, %v7981_v7  ;;  %3261 = vst.msk [vmem:[#allocation2 + $0x1e0] sm:$0xff] %vm3199_vm2, %v7981_v7  ;;  %v1319_v4 = vpop.f32.mrf.mxu1  ;;  %7559 = vmatprep.subr.bf16.mxu1 %v7904_v33 }
 0x153   : > { %3262 = vst.msk [vmem:[#allocation2 + $0x1e8] sm:$0xff] %vm3199_vm2, %v7981_v7  ;;  %3263 = vst.msk [vmem:[#allocation2 + $0x1f0] sm:$0xff] %vm3199_vm2, %v7981_v7  ;;  %v9011_v44 = vadd.f32 %v7329_v54, %v1424_v45  ;;  %v1422_v50 = vadd.f32 %v1319_v4, %v8686_v63  ;;  %v7330_v24 = vpop.f32.mrf.mxu0 }
 0x154   : > { %3265 = vst.msk [vmem:[#allocation2 + $0x200] sm:$0xff] %vm3199_vm2, %v7981_v7  ;;  %3266 = vst.msk [vmem:[#allocation2 + $0x208] sm:$0xff] %vm3199_vm2, %v7981_v7  ;;  %v7296_v27 = vpop.f32.mrf.mxu1 }
 0x155   : > { %3267 = vst.msk [vmem:[#allocation2 + $0x210] sm:$0xff] %vm3199_vm2, %v7981_v7  ;;  %3269 = vst.msk [vmem:[#allocation2 + $0x220] sm:$0xff] %vm3199_vm2, %v7981_v7  ;;  %v9014_v36 = vadd.f32 %v1613_v1, %v1422_v50  ;;  %v1425_v22 = vadd.f32 %v7296_v27, %v8692_v29  ;;  %v9017_v34 = vpop.f32.mrf.mxu0  ;;  %v3358_v29 = vld [vmem:[#allocation2 + $0x8] sm:$0xff]  ;;  %7560 = vmatpush3.bf16.msra.mxu1 %v7904_v33  ;;  %v10968_v33 = vld [vmem:[#allocation10_spill] sm:$0xff] }
 0x156   : > { %3270 = vst.msk [vmem:[#allocation2 + $0x228] sm:$0xff] %vm3199_vm2, %v7981_v7  ;;  %3271 = vst.msk [vmem:[#allocation2 + $0x230] sm:$0xff] %vm3199_vm2, %v7981_v7  ;;  %v1322_v32 = vpop.f32.mrf.mxu1  ;;  %v3390_v25 = vpack.c.bf16 %v3359_v23, %v3358_v29 }
 0x157   : > { %3204 = vst.msk [vmem:[#allocation2 + $0x18] sm:$0x1] %vm3203_vm3, %v7981_v7  ;;  %3208 = vst.msk [vmem:[#allocation2 + $0x38] sm:$0x1] %vm3203_vm3, %v7981_v7  ;;  %v9022_v11 = vadd.f32 %v7330_v24, %v1425_v22  ;;  %v9025_v9 = vadd.f32 %v1322_v32, %v8702_v41  ;;  %v7333_v63 = vpop.f32.mrf.mxu0  ;;  %v10967_v22 = vld [vmem:[#allocation8_spill] sm:$0xff] }
 0x158   : > { %3212 = vst.msk [vmem:[#allocation2 + $0x58] sm:$0x1] %vm3203_vm3, %v7981_v7  ;;  %3216 = vst.msk [vmem:[#allocation2 + $0x78] sm:$0x1] %vm3203_vm3, %v7981_v7  ;;  %v7299_v14 = vpop.f32.mrf.mxu1  ;;  %7525 = vmatprep.mubr.msk.bf16.mxu0 %vm3199_vm2, %v3390_v25 }
 0x159   : > { %3220 = vst.msk [vmem:[#allocation2 + $0x98] sm:$0x1] %vm3203_vm3, %v7981_v7  ;;  %3224 = vst.msk [vmem:[#allocation2 + $0xb8] sm:$0x1] %vm3203_vm3, %v7981_v7  ;;  %v1428_v43 = vadd.f32 %v7299_v14, %v8710_v59  ;;  %v1629_v21 = vpop.f32.mrf.mxu0 }
 0x15a   : > { %3228 = vst.msk [vmem:[#allocation2 + $0xd8] sm:$0x1] %vm3203_vm3, %v7981_v7  ;;  %3232 = vst.msk [vmem:[#allocation2 + $0xf8] sm:$0x1] %vm3203_vm3, %v7981_v7  ;;  %v1335_v54 = vpop.f32.mrf.mxu1 }
 0x15b   : > { %3236 = vst.msk [vmem:[#allocation2 + $0x118] sm:$0x1] %vm3203_vm3, %v7981_v7  ;;  %3240 = vst.msk [vmem:[#allocation2 + $0x138] sm:$0x1] %vm3203_vm3, %v7981_v7  ;;  %v9032_v8 = vadd.f32 %v7333_v63, %v1428_v43  ;;  %v1426_v41 = vadd.f32 %v1335_v54, %v8713_v31  ;;  %v7334_v61 = vpop.f32.mrf.mxu0  ;;  %v10973_v54 = vld [vmem:[#allocation12_spill] sm:$0xff] }
 0x15c   : > { %3244 = vst.msk [vmem:[#allocation2 + $0x158] sm:$0x1] %vm3203_vm3, %v7981_v7  ;;  %3248 = vst.msk [vmem:[#allocation2 + $0x178] sm:$0x1] %vm3203_vm3, %v7981_v7  ;;  %v7300_v45 = vpop.f32.mrf.mxu1 }
 0x15d   : > { %3252 = vst.msk [vmem:[#allocation2 + $0x198] sm:$0x1] %vm3203_vm3, %v7981_v7  ;;  %3256 = vst.msk [vmem:[#allocation2 + $0x1b8] sm:$0x1] %vm3203_vm3, %v7981_v7  ;;  %v9036_v1 = vadd.f32 %v1629_v21, %v1426_v41  ;;  %v1429_v62 = vadd.f32 %v7300_v45, %v8719_v48  ;;  %v9039_v59 = vpop.f32.mrf.mxu0 }
 0x15e   : > { %3260 = vst.msk [vmem:[#allocation2 + $0x1d8] sm:$0x1] %vm3203_vm3, %v7981_v7  ;;  %3264 = vst.msk [vmem:[#allocation2 + $0x1f8] sm:$0x1] %vm3203_vm3, %v7981_v7  ;;  %v1338_v4 = vpop.f32.mrf.mxu1 }
 0x15f   : > { %3268 = vst.msk [vmem:[#allocation2 + $0x218] sm:$0x1] %vm3203_vm3, %v7981_v7  ;;  %3272 = vst.msk [vmem:[#allocation2 + $0x238] sm:$0x1] %vm3203_vm3, %v7981_v7  ;;  %v10962_v7 = vld [vmem:[#allocation6_spill] sm:$0xff]  ;;  %v9041_v56 = vadd.f32 %v7334_v61, %v1429_v62  ;;  %v9044_v50 = vadd.f32 %v1338_v4, %v8727_v15  ;;  %v7337_v24 = vpop.f32.mrf.mxu0  ;;  %v10974_v61 = vld [vmem:[#allocation13_spill] sm:$0xff] }
 0x160   : > { %7502 = vmatmul.mubr.msk.bf16.gmra.mxu1 %vm431_vm1, %v10962_v7  ;;  %10964 = vst [vmem:[#allocation9_spill] sm:$0xff] %v9032_v8  ;;  %10965 = vst [vmem:[#allocation11_spill] sm:$0xff] %v9036_v1  ;;  %v7303_v27 = vpop.f32.mrf.mxu1 }
 0x161   : > { %7505 = vmatprep.mubr.msk.bf16.mxu1 %vm431_vm1, %v10963_v38  ;;  %10966 = vst [vmem:[#allocation14_spill] sm:$0xff] %v9041_v56  ;;  %v1432_v31 = vadd.f32 %v7303_v27, %v8735_v47  ;;  %v1645_v32 = vpop.f32.mrf.mxu0  ;;  %v9062_v47 = vld [vmem:[%s10924_s6 + $0x28] sm:$0xff]  }
 0x162   : > { %v1351_v48 = vpop.f32.mrf.mxu1  ;;  %10971 = vst [vmem:[#allocation7_spill] sm:$0xff] %v9062_v47  ;;  %7593 = vmatprep.subr.bf16.mxu0 %v9062_v47 }
 0x163   : > { %v9051_v63 = vadd.f32 %v7337_v24, %v1432_v31  ;;  %v1430_v14 = vadd.f32 %v1351_v48, %v8738_v60  ;;  %v7338_v7 = vpop.f32.mrf.mxu0 }
 0x164   : > { %v7304_v29 = vpop.f32.mrf.mxu1 }
 0x165   : > { %10969 = vst [vmem:[#allocation16_spill] sm:$0xff] %v9051_v63  ;;  %v9054_v15 = vadd.f32 %v1645_v32, %v1430_v14  ;;  %v1433_v23 = vadd.f32 %v7304_v29, %v8743_v20  ;;  %v9057_v43 = vpop.f32.mrf.mxu0 }
 0x166   : > { %v9064_v21 = vpop.f32.mrf.mxu1 }
 0x167   : > { %10970 = vst [vmem:[#allocation6_spill] sm:$0xff] %v9054_v15  ;;  %v9066_v38 = vadd.f32 %v7338_v7, %v1433_v23  ;;  %v7341_v25 = vpop.f32.mrf.mxu0  ;;  %v10978_v7 = vld [vmem:[#allocation15_spill] sm:$0xff]  ;;  %v10979_v23 = vld [vmem:[#allocation17_spill] sm:$0xff] }
 0x168   : > { %7506 = vmatmul.mubr.msk.bf16.gmra.mxu1 %vm431_vm1, %v10967_v22  ;;  %v7307_v60 = vpop.f32.mrf.mxu1 }
 0x169   : > { %7509 = vmatprep.mubr.msk.bf16.mxu1 %vm431_vm1, %v10968_v33  ;;  %10972 = vst [vmem:[#allocation8_spill] sm:$0xff] %v9066_v38  ;;  %v1436_v20 = vadd.f32 %v7307_v60, %v8759_v55  ;;  %v1661_v41 = vpop.f32.mrf.mxu0  ;;  %v3306_v60 = vld [vmem:[#allocation2 + $0x7] sm:$0xff] }
 0x16a   : > { %v1367_v45 = vpop.f32.mrf.mxu1 }
 0x16b   : > { %v9074_v62 = vadd.f32 %v7341_v25, %v1436_v20  ;;  %v1434_v4 = vadd.f32 %v1367_v45, %v8762_v49  ;;  %v7342_v24 = vpop.f32.mrf.mxu0 }
 0x16c   : > { %v7308_v27 = vpop.f32.mrf.mxu1 }
 0x16d   : > { %10975 = vst [vmem:[#allocation10_spill] sm:$0xff] %v9074_v62  ;;  %v9077_v22 = vadd.f32 %v1661_v41, %v1434_v4  ;;  %v1437_v31 = vadd.f32 %v7308_v27, %v8767_v40  ;;  %v9080_v32 = vpop.f32.mrf.mxu0  ;;  %v3307_v40 = vld [vmem:[#allocation2 + $0xf] sm:$0xff] }
 0x16e   : > { %v9082_v33 = vpop.f32.mrf.mxu1 }
 0x16f   : > { %10976 = vst [vmem:[#allocation12_spill] sm:$0xff] %v9077_v22  ;;  %v9084_v55 = vadd.f32 %v7342_v24, %v1437_v31  ;;  %v7345_v48 = vpop.f32.mrf.mxu0 }
 0x170   : > { %7510 = vmatmul.mubr.msk.bf16.gmra.mxu1 %vm431_vm1, %v10973_v54  ;;  %v7311_v14 = vpop.f32.mrf.mxu1 }
 0x171   : > { %7513 = vmatprep.mubr.msk.bf16.mxu1 %vm431_vm1, %v10974_v61  ;;  %10977 = vst [vmem:[#allocation13_spill] sm:$0xff] %v9084_v55  ;;  %v1440_v29 = vadd.f32 %v7311_v14, %v8783_v30  ;;  %v1677_v49 = vpop.f32.mrf.mxu0  ;;  %v3338_v30 = vpack.c.bf16 %v3307_v40, %v3306_v60 }
 0x172   : > { %v1383_v25 = vpop.f32.mrf.mxu1 }
 0x173   : > { %v9091_v54 = vadd.f32 %v7345_v48, %v1440_v29  ;;  %v1438_v20 = vadd.f32 %v1383_v25, %v8786_v13  ;;  %v7346_v41 = vpop.f32.mrf.mxu0 }
 0x174   : > { %v7312_v61 = vpop.f32.mrf.mxu1 }
 0x175   : > { %10980 = vst [vmem:[#allocation15_spill] sm:$0xff] %v9091_v54  ;;  %v9094_v45 = vadd.f32 %v1677_v49, %v1438_v20  ;;  %v1441_v4 = vadd.f32 %v7312_v61, %v8791_v19  ;;  %v9097_v24 = vpop.f32.mrf.mxu0  ;;  %v9160_v54 = vld [vmem:[%s10924_s6 + $0x38] sm:$0xff]  }
 0x176   : > { %v9099_v27 = vpop.f32.mrf.mxu1  ;;  %10988 = vst [vmem:[#allocation24_spill] sm:$0xff] %v9160_v54  ;;  %7629 = vmatprep.subr.bf16.mxu1 %v9160_v54 }
 0x177   : > { %10981 = vst [vmem:[#allocation17_spill] sm:$0xff] %v9094_v45  ;;  %v9101_v31 = vadd.f32 %v7346_v41, %v1441_v4  ;;  %v7349_v14 = vpop.f32.mrf.mxu0 }
 0x178   : > { %7514 = vmatmul.mubr.msk.bf16.gmra.mxu1 %vm431_vm1, %v10978_v7  ;;  %v7315_v7 = vpop.f32.mrf.mxu1 }
 0x179   : > { %7517 = vmatprep.mubr.msk.bf16.mxu1 %vm431_vm1, %v10979_v23  ;;  %10982 = vst [vmem:[#allocation18_spill] sm:$0xff] %v9101_v31  ;;  %v1444_v13 = vadd.f32 %v7315_v7, %v8801_v5  ;;  %v1693_v48 = vpop.f32.mrf.mxu0 }
 0x17a   : > { %v1399_v29 = vpop.f32.mrf.mxu1 }
 0x17b   : > { %v9107_v49 = vadd.f32 %v7349_v14, %v1444_v13  ;;  %v1442_v19 = vadd.f32 %v1399_v29, %v8804_v51  ;;  %v7350_v23 = vpop.f32.mrf.mxu0 }
 0x17c   : > { %v7316_v25 = vpop.f32.mrf.mxu1 }
 0x17d   : > { %10983 = vst [vmem:[#allocation19_spill] sm:$0xff] %v9107_v49  ;;  %v9110_v60 = vadd.f32 %v1693_v48, %v1442_v19  ;;  %v1445_v40 = vadd.f32 %v7316_v25, %v8812_v58  ;;  %v9113_v20 = vpop.f32.mrf.mxu0 }
 0x17e   : > { %10985 = vst [vmem:[#allocation21_spill] sm:$0xff] %v9113_v20  ;;  %v9115_v41 = vpop.f32.mrf.mxu1 }
 0x17f   : > { %10984 = vst [vmem:[#allocation20_spill] sm:$0xff] %v9110_v60  ;;  %v9119_v5 = vpop.f32.mrf.mxu0 }
 0x180   : > { %7518 = vmatmul.mubr.msk.bf16.gmra.mxu1 %vm431_vm1, %v8493_v52  ;;  %v9117_v52 = vadd.f32 %v7350_v23, %v1445_v40  ;;  %v7355_v61 = vpop.f32.mrf.mxu1 }
 0x181   : > { %7561 = vmatprep.mubr.msk.bf16.mxu1 %vm3199_vm2, %v3338_v30  ;;  %v9121_v4 = vpop.f32.mrf.mxu0 }
 0x182   : > { %10986 = vst [vmem:[#allocation22_spill] sm:$0xff] %v9117_v52  ;;  %v1875_v30 = vpop.f32.mrf.mxu1 }
 0x183   : > { %v9123_v14 = vpop.f32.mrf.mxu0 }
 0x184   : > { %v9125_v51 = vpop.f32.mrf.mxu1 }
 0x185   : > { %v9127_v7 = vpop.f32.mrf.mxu0 }
 0x186   : > { %v9129_v13 = vpop.f32.mrf.mxu1 }
 0x187   : > { %v9131_v58 = vpop.f32.mrf.mxu0 }
 0x188   : > { %v9133_v48 = vpop.f32.mrf.mxu1 }
 0x189   : > { %v9135_v29 = vpop.f32.mrf.mxu0 }
 0x18a   : > { %v9137_v19 = vpop.f32.mrf.mxu1 }
 0x18b   : > { %v9139_v23 = vpop.f32.mrf.mxu0 }
 0x18c   : > { %v9141_v25 = vpop.f32.mrf.mxu1 }
 0x18d   : > { %v9143_v40 = vpop.f32.mrf.mxu0 }
 0x18e   : > { %v9145_v20 = vpop.f32.mrf.mxu1 }
 0x18f   : > { %v9147_v52 = vpop.f32.mrf.mxu0 }
 0x190   : > { %v9149_v60 = vpop.f32.mrf.mxu1 }
 0x191   : > { %v9151_v49 = vpop.f32.mrf.mxu0 }
 0x192   : > { %v9153_v31 = vpop.f32.mrf.mxu1 }
 0x193   : > { %v9155_v45 = vpop.f32.mrf.mxu0 }
 0x194   : > { %10987 = vst [vmem:[#allocation23_spill] sm:$0xff] %v9155_v45  ;;  %v9162_v55 = vpop.f32.mrf.mxu1 }
 0x195   : > { %v9164_v22 = vpop.f32.mrf.mxu0 }
 0x196   : > { %10989 = vst [vmem:[#allocation25_spill] sm:$0xff] %v9164_v22  ;;  %v9167_v47 = vpop.f32.mrf.mxu1 }
 0x197   : > { %10990 = vst [vmem:[#allocation26_spill] sm:$0xff] %v9167_v47  ;;  %v9169_v62 = vpop.f32.mrf.mxu0 }
 0x198   : > { %10991 = vst [vmem:[#allocation27_spill] sm:$0xff] %v9169_v62  ;;  %v9171_v38 = vpop.f32.mrf.mxu1 }
 0x199   : > { %10992 = vst [vmem:[#allocation28_spill] sm:$0xff] %v9171_v38  ;;  %v9173_v15 = vpop.f32.mrf.mxu0 }
 0x19a   : > { %10993 = vst [vmem:[#allocation29_spill] sm:$0xff] %v9173_v15  ;;  %v9175_v63 = vpop.f32.mrf.mxu1 }
 0x19b   : > { %10994 = vst [vmem:[#allocation30_spill] sm:$0xff] %v9175_v63  ;;  %v9177_v56 = vpop.f32.mrf.mxu0 }
 0x19c   : > { %10995 = vst [vmem:[#allocation31_spill] sm:$0xff] %v9177_v56  ;;  %v9179_v1 = vpop.f32.mrf.mxu1 }
 0x19d   : > { %10996 = vst [vmem:[#allocation32_spill] sm:$0xff] %v9179_v1  ;;  %v9181_v8 = vpop.f32.mrf.mxu0 }
 0x19e   : > { %10997 = vst [vmem:[#allocation33_spill] sm:$0xff] %v9181_v8  ;;  %v9183_v45 = vpop.f32.mrf.mxu1 }
 0x19f   : > { %10998 = vst [vmem:[#allocation34_spill] sm:$0xff] %v9183_v45  ;;  %v9185_v22 = vpop.f32.mrf.mxu0 }
 0x1a0   : > { %10999 = vst [vmem:[#allocation35_spill] sm:$0xff] %v9185_v22  ;;  %v9187_v54 = vpop.f32.mrf.mxu1 }
 0x1a1   : > { %11000 = vst [vmem:[#allocation36_spill] sm:$0xff] %v9187_v54  ;;  %v9189_v47 = vpop.f32.mrf.mxu0 }
 0x1a2   : > { %11001 = vst [vmem:[#allocation37_spill] sm:$0xff] %v9189_v47  ;;  %v9191_v62 = vpop.f32.mrf.mxu1 }
 0x1a3   : > { %11002 = vst [vmem:[#allocation38_spill] sm:$0xff] %v9191_v62  ;;  %v9193_v38 = vpop.f32.mrf.mxu0 }
 0x1a4   : > { %11003 = vst [vmem:[#allocation39_spill] sm:$0xff] %v9193_v38  ;;  %v9195_v15 = vpop.f32.mrf.mxu1 }
 0x1a5   : > { %11004 = vst [vmem:[#allocation40_spill] sm:$0xff] %v9195_v15  ;;  %v9197_v63 = vpop.f32.mrf.mxu0 }
 0x1a6   : > { %11005 = vst [vmem:[#allocation41_spill] sm:$0xff] %v9197_v63  ;;  %v9199_v56 = vpop.f32.mrf.mxu1 }
 0x1a7   : > { %11006 = vst [vmem:[#allocation42_spill] sm:$0xff] %v9199_v56  ;;  %v9201_v1 = vpop.f32.mrf.mxu0 }
 0x1a8   : > { %11007 = vst [vmem:[#allocation43_spill] sm:$0xff] %v9201_v1  ;;  %v9203_v8 = vpop.f32.mrf.mxu1 }
 0x1a9   : > { %11008 = vst [vmem:[#allocation44_spill] sm:$0xff] %v9203_v8  ;;  %v9205_v45 = vpop.f32.mrf.mxu0 }
 0x1aa   : > { %11009 = vst [vmem:[#allocation45_spill] sm:$0xff] %v9205_v45  ;;  %v9207_v22 = vpop.f32.mrf.mxu1 }
 0x1ab   : > { %11010 = vst [vmem:[#allocation46_spill] sm:$0xff] %v9207_v22  ;;  %v9209_v54 = vpop.f32.mrf.mxu0 }
 0x1ac   : > { %11011 = vst [vmem:[#allocation47_spill] sm:$0xff] %v9209_v54  ;;  %v9211_v47 = vpop.f32.mrf.mxu1 }
 0x1ad   : > { %11012 = vst [vmem:[#allocation48_spill] sm:$0xff] %v9211_v47  ;;  %v9213_v62 = vpop.f32.mrf.mxu0 }
 0x1ae   : > { %11013 = vst [vmem:[#allocation49_spill] sm:$0xff] %v9213_v62  ;;  %v9215_v38 = vpop.f32.mrf.mxu1 }
 0x1af   : > { %11014 = vst [vmem:[#allocation50_spill] sm:$0xff] %v9215_v38  ;;  %v9217_v15 = vpop.f32.mrf.mxu0 }
 0x1b0   : > { %11015 = vst [vmem:[#allocation51_spill] sm:$0xff] %v9217_v15  ;;  %v9219_v63 = vpop.f32.mrf.mxu1 }
 0x1b1   : > { %11016 = vst [vmem:[#allocation52_spill] sm:$0xff] %v9219_v63  ;;  %v9221_v56 = vpop.f32.mrf.mxu0 }
 0x1b2   : > { %11017 = vst [vmem:[#allocation53_spill] sm:$0xff] %v9221_v56  ;;  %v9223_v1 = vpop.f32.mrf.mxu1  ;;  %v2004_v56 = vadd.f32 %v7355_v61, %v8822_v26  ;;  %v1136_v26 = vadd.f32 %v8741_v28, %v8746_v39  ;;  %v1140_v61 = vadd.f32 %v8765_v18, %v8770_v17  ;;  %v9271_v39 = vld [vmem:[%s10920_s2] ss:$0 sm:$0xff]  ;;  %v1713_v17 = vadd.f32 %v8960_v16, %v8965_v10 }
 0x1b3   : > { %11018 = vst [vmem:[#allocation54_spill] sm:$0xff] %v9223_v1  ;;  %v9225_v8 = vpop.f32.mrf.mxu0  ;;  %v9289_v16 = vld [vmem:[%s10921_s3] ss:$0 sm:$0xff] }
 0x1b4   : > { %11019 = vst [vmem:[#allocation55_spill] sm:$0xff] %v9225_v8  ;;  %v9227_v45 = vpop.f32.mrf.mxu1  ;;  %v2002_v8 = vadd.f32 %v1875_v30, %v8825_v3  ;;  %v1435_v28 = vadd.f32 %v9082_v33, %v1140_v61 }
 0x1b5   : > { %11020 = vst [vmem:[#allocation56_spill] sm:$0xff] %v9227_v45  ;;  %v9229_v22 = vpop.f32.mrf.mxu0 }
 0x1b6   : > { %11021 = vst [vmem:[#allocation57_spill] sm:$0xff] %v9229_v22  ;;  %v9231_v54 = vpop.f32.mrf.mxu1  ;;  %v2297_v30 = vadd.f32 %v9121_v4, %v2002_v8 }
 0x1b7   : > { %v9233_v47 = vpop.f32.mrf.mxu0 }
 0x1b8   : > { %11022 = vst [vmem:[#allocation58_spill] sm:$0xff] %v9233_v47  ;;  %v9235_v62 = vpop.f32.mrf.mxu1  ;;  %v1709_v47 = vadd.f32 %v8828_v53, %v8833_v35  ;;  %v1144_v53 = vadd.f32 %v8789_v6, %v8794_v2  ;;  %v1431_v35 = vadd.f32 %v9064_v21, %v1136_v26  ;;  %v2009_v21 = vadd.f32 %v9141_v25, %v8962_v57 }
 0x1b9   : > { %11023 = vst [vmem:[#allocation59_spill] sm:$0xff] %v9235_v62  ;;  %v9237_v38 = vpop.f32.mrf.mxu0  ;;  %v2299_v62 = vadd.f32 %v9119_v5, %v2004_v56  ;;  %v9301_v57 = vadd.f32 %v9080_v32, %v1435_v28  ;;  %v2012_v25 = vadd.f32 %v9149_v60, %v9011_v44 }
 0x1ba   : > { %11024 = vst [vmem:[#allocation60_spill] sm:$0xff] %v9237_v38  ;;  %v9239_v15 = vpop.f32.mrf.mxu1  ;;  %v2005_v38 = vadd.f32 %v9125_v51, %v8830_v0  ;;  %v1148_v0 = vadd.f32 %v8807_v42, %v8815_v12  ;;  %v9278_v42 = vadd.f32 %v9017_v34, %v9025_v9  ;;  %v2008_v12 = vadd.f32 %v9133_v48, %v8953_v46 }
 0x1bb   : > { %11025 = vst [vmem:[#allocation61_spill] sm:$0xff] %v9239_v15  ;;  %v9242_v63 = vpop.f32.mrf.mxu0  ;;  %v9295_v46 = vadd.f32 %v9039_v59, %v9044_v50  ;;  %v2304_v50 = vadd.f32 %v9139_v23, %v2009_v21 }
 0x1bc   : > { %11026 = vst [vmem:[#allocation62_spill] sm:$0xff] %v9242_v63  ;;  %v9244_v1 = vpop.f32.mrf.mxu1  ;;  %v2300_v8 = vadd.f32 %v9123_v14, %v2005_v38  ;;  %v2303_v51 = vadd.f32 %v9131_v58, %v2008_v12  ;;  %v2010_v58 = vadd.f32 %v9153_v31, %v9014_v36  ;;  %v9325_v44 = vadd.f32 %v9115_v41, %v1148_v0 }
 0x1bd   : > { %v9247_v45 = vpop.f32.mrf.mxu0 }
 0x1be   : > { %11027 = vst [vmem:[#allocation63_spill] sm:$0xff] %v9247_v45  ;;  %v9249_v22 = vpop.f32.mrf.mxu1  ;;  %v2003_v45 = vadd.f32 %v9129_v13, %v1709_v47  ;;  %v2006_v47 = vadd.f32 %v9137_v19, %v8957_v37  ;;  %v9298_v37 = vadd.f32 %v9057_v43, %v1431_v35  ;;  %v2007_v43 = vadd.f32 %v9145_v20, %v1713_v17 }
 0x1bf   : > { %11028 = vst [vmem:[#allocation64_spill] sm:$0xff] %v9249_v22  ;;  %v7457_v15 = vpop.f32.mrf.mxu0 }
 0x1c0   : > { %v7423_v3 = vpop.f32.mrf.mxu1  ;;  %v2301_v59 = vadd.f32 %v9135_v29, %v2006_v47  ;;  %v2013_v29 = vadd.f32 %v9162_v55, %v9022_v11  ;;  %v2302_v36 = vadd.f32 %v9143_v40, %v2007_v43 }
 0x1c1   : > { %v2593_v22 = vadd.f32 %v7423_v3, %v2299_v62  ;;  %v2758_v63 = vpop.f32.mrf.mxu0 }
 0x1c2   : > { %v2464_v18 = vpop.f32.mrf.mxu1 }
 0x1c3   : > { %v2887_v56 = vadd.f32 %v7457_v15, %v2593_v22  ;;  %v2591_v6 = vadd.f32 %v2464_v18, %v2297_v30  ;;  %v7458_v2 = vpop.f32.mrf.mxu0  ;;  %v2298_v15 = vadd.f32 %v9127_v7, %v2003_v45  ;;  %v1439_v22 = vadd.f32 %v9099_v27, %v1144_v53 }
 0x1c4   : > { %v7424_v10 = vpop.f32.mrf.mxu1 }
 0x1c5   : > { %v2926_v34 = vmul.f32 %v9271_v39, %v2887_v56  ;;  %v2885_v9 = vadd.f32 %v2758_v63, %v2591_v6  ;;  %v2594_v38 = vadd.f32 %v7424_v10, %v2300_v8  ;;  %v2761_v62 = vpop.f32.mrf.mxu0  ;;  %v9322_v35 = vadd.f32 %v9097_v24, %v1439_v22  ;;  %v11029_v56 = vld [vmem:[#allocation23_spill] sm:$0xff]  ;;  %v11030_v10 = vld [vmem:[#allocation26_spill] sm:$0xff] }
 0x1c6   : > { %v2467_v33 = vpop.f32.mrf.mxu1  ;;  %v2307_v8 = vadd.f32 %v9147_v52, %v2012_v25  ;;  %v2305_v24 = vadd.f32 %v9151_v49, %v2010_v58  ;;  %v2308_v6 = vadd.f32 %v11029_v56, %v2013_v29  ;;  %v11032_v52 = vld [vmem:[#allocation28_spill] sm:$0xff]  ;;  %v11033_v49 = vld [vmem:[#allocation11_spill] sm:$0xff] }
 0x1c7   : > { %v2965_v45 = vadd.f32 %v9289_v16, %v2926_v34  ;;  %v2924_v5 = vmul.f32 %v9271_v39, %v2885_v9  ;;  %v2888_v63 = vadd.f32 %v7458_v2, %v2594_v38  ;;  %v2592_v4 = vadd.f32 %v2467_v33, %v2298_v15  ;;  %v7461_v14 = vpop.f32.mrf.mxu0  ;;  %v11031_v34 = vld [vmem:[#allocation9_spill] sm:$0xff]  ;;  %v11034_v38 = vld [vmem:[#allocation30_spill] sm:$0xff] }
 0x1c8   : > { %v7427_v32 = vpop.f32.mrf.mxu1  ;;  %v2011_v15 = vadd.f32 %v11030_v10, %v9278_v42  ;;  %v2016_v9 = vadd.f32 %v11032_v52, %v11031_v34  ;;  %v11036_v42 = vld [vmem:[#allocation32_spill] sm:$0xff]  ;;  %v11047_v34 = vld [vmem:[#allocation38_spill] sm:$0xff] }
 0x1c9   : > { %v2997_v7 = vmax.f32 %v2965_v45, 0.0  ;;  %v2963_v27 = vadd.f32 %v9289_v16, %v2924_v5  ;;  %v2927_v13 = vmul.f32 %v9271_v39, %v2888_v63  ;;  %v2886_v48 = vadd.f32 %v2761_v62, %v2592_v4  ;;  %v2774_v19 = vpop.f32.mrf.mxu0 }
 0x1ca   : > { %v2597_v23 = vadd.f32 %v7427_v32, %v2303_v51  ;;  %v2480_v26 = vpop.f32.mrf.mxu1  ;;  %v2014_v62 = vadd.f32 %v11034_v38, %v11033_v49  ;;  %v11035_v51 = vld [vmem:[#allocation14_spill] sm:$0xff]  ;;  %v11038_v32 = vld [vmem:[#allocation16_spill] sm:$0xff] }
 0x1cb   : > { %3276 = vst.msk [vmem:[#allocation2 + $0x48] sm:$0xff] %vm3199_vm2, %v2997_v7  ;;  %v2995_v20 = vmax.f32 %v2963_v27, 0.0  ;;  %v2966_v61 = vadd.f32 %v9289_v16, %v2927_v13  ;;  %v2925_v3 = vmul.f32 %v9271_v39, %v2886_v48  ;;  %v2595_v30 = vadd.f32 %v2480_v26, %v2301_v59  ;;  %v7462_v53 = vpop.f32.mrf.mxu0  ;;  %v11039_v7 = vld [vmem:[#allocation36_spill] sm:$0xff]  ;;  %v11040_v26 = vld [vmem:[#allocation25_spill] sm:$0xff] }
 0x1cc   : > { %v2891_v11 = vadd.f32 %v7461_v14, %v2597_v23  ;;  %v7428_v55 = vpop.f32.mrf.mxu1  ;;  %v2017_v59 = vadd.f32 %v11036_v42, %v11035_v51  ;;  %v2020_v27 = vadd.f32 %v11039_v7, %v11038_v32  ;;  %v11049_v49 = vld [vmem:[#allocation40_spill] sm:$0xff] }
 0x1cd   : > { %3274 = vst.msk [vmem:[#allocation2 + $0x28] sm:$0xff] %vm3199_vm2, %v2995_v20  ;;  %v2998_v31 = vmax.f32 %v2966_v61, 0.0  ;;  %v2964_v60 = vadd.f32 %v9289_v16, %v2925_v3  ;;  %v2889_v28 = vadd.f32 %v2774_v19, %v2595_v30  ;;  %v2598_v18 = vadd.f32 %v7428_v55, %v2304_v50  ;;  %v2777_v17 = vpop.f32.mrf.mxu0  ;;  %v11037_v50 = vld [vmem:[#allocation34_spill] sm:$0xff]  ;;  %v11041_v61 = vld [vmem:[#allocation27_spill] sm:$0xff]  ;;  %v11042_v30 = vld [vmem:[#allocation29_spill] sm:$0xff] }
 0x1ce   : > { %v2930_v41 = vmul.f32 %v9271_v39, %v2891_v11  ;;  %v2483_v0 = vpop.f32.mrf.mxu1  ;;  %v2015_v43 = vadd.f32 %v11037_v50, %v9295_v46  ;;  %v2306_v20 = vadd.f32 %v11040_v26, %v2011_v15  ;;  %v2311_v3 = vadd.f32 %v11041_v61, %v2016_v9  ;;  %v11046_v15 = vld [vmem:[#allocation6_spill] sm:$0xff]  ;;  %v11048_v9 = vld [vmem:[#allocation8_spill] sm:$0xff] }
 0x1cf   : > { %3277 = vst.msk [vmem:[#allocation2 + $0x50] sm:$0xff] %vm3199_vm2, %v2998_v31  ;;  %v2996_v40 = vmax.f32 %v2964_v60, 0.0  ;;  %v2928_v2 = vmul.f32 %v9271_v39, %v2889_v28  ;;  %v2892_v12 = vadd.f32 %v7462_v53, %v2598_v18  ;;  %v2596_v47 = vadd.f32 %v2483_v0, %v2302_v36  ;;  %v7465_v21 = vpop.f32.mrf.mxu0  ;;  %v11043_v18 = vld [vmem:[#allocation31_spill] sm:$0xff] }
 0x1d0   : > { %v2969_v22 = vadd.f32 %v9289_v16, %v2930_v41  ;;  %v7431_v33 = vpop.f32.mrf.mxu1  ;;  %v2309_v53 = vadd.f32 %v11042_v30, %v2014_v62  ;;  %v11045_v41 = vld [vmem:[#allocation35_spill] sm:$0xff]  ;;  %v2018_v52 = vadd.f32 %v11047_v34, %v11046_v15  ;;  %v2021_v38 = vadd.f32 %v11049_v49, %v11048_v9  ;;  %v11050_v62 = vld [vmem:[#allocation42_spill] sm:$0xff] }
 0x1d1   : > { %3275 = vst.msk [vmem:[#allocation2 + $0x30] sm:$0xff] %vm3199_vm2, %v2996_v40  ;;  %v2967_v45 = vadd.f32 %v9289_v16, %v2928_v2  ;;  %v2931_v5 = vmul.f32 %v9271_v39, %v2892_v12  ;;  %v2890_v63 = vadd.f32 %v2777_v17, %v2596_v47  ;;  %v2601_v4 = vadd.f32 %v7431_v33, %v2307_v8  ;;  %v2790_v14 = vpop.f32.mrf.mxu0  ;;  %v11044_v8 = vld [vmem:[#allocation33_spill] sm:$0xff]  ;;  %v9419_v15 = vld [vmem:[%s10924_s6 + $0x48] sm:$0xff]  }
 0x1d2   : > { %v3001_v13 = vmax.f32 %v2969_v22, 0.0  ;;  %v2496_v48 = vpop.f32.mrf.mxu1  ;;  %v2312_v17 = vadd.f32 %v11043_v18, %v2017_v59  ;;  %v9363_v56 = vadd.f32 %v11044_v8, %v2015_v43  ;;  %v9366_v0 = vadd.f32 %v11045_v41, %v2020_v27  ;;  %v3310_v61 = vld [vmem:[#allocation2 + $0x47] sm:$0xff] }
 0x1d3   : > { %v2999_v19 = vmax.f32 %v2967_v45, 0.0  ;;  %v2970_v25 = vadd.f32 %v9289_v16, %v2931_v5  ;;  %v2929_v58 = vmul.f32 %v9271_v39, %v2890_v63  ;;  %v2895_v29 = vadd.f32 %v7465_v21, %v2601_v4  ;;  %v7466_v23 = vpop.f32.mrf.mxu0  ;;  %v3362_v4 = vld [vmem:[#allocation2 + $0x48] sm:$0xff] }
 0x1d4   : > { %3280 = vst.msk [vmem:[#allocation2 + $0x88] sm:$0xff] %vm3199_vm2, %v3001_v13  ;;  %v2599_v46 = vadd.f32 %v2496_v48, %v2305_v24  ;;  %v7432_v36 = vpop.f32.mrf.mxu1  ;;  %v2019_v22 = vadd.f32 %v11050_v62, %v9298_v37  ;;  %v3360_v43 = vld [vmem:[#allocation2 + $0x28] sm:$0xff]  ;;  %v11057_v62 = vld [vmem:[#allocation24_spill] sm:$0xff] }
 0x1d5   : > { %3278 = vst.msk [vmem:[#allocation2 + $0x68] sm:$0xff] %vm3199_vm2, %v2999_v19  ;;  %v3002_v11 = vmax.f32 %v2970_v25, 0.0  ;;  %v2968_v55 = vadd.f32 %v9289_v16, %v2929_v58  ;;  %v2934_v31 = vmul.f32 %v9271_v39, %v2895_v29  ;;  %v2602_v60 = vadd.f32 %v7432_v36, %v2308_v6  ;;  %v2793_v28 = vpop.f32.mrf.mxu0  ;;  %v3308_v32 = vld [vmem:[#allocation2 + $0x27] sm:$0xff]  ;;  %v11053_v36 = vld [vmem:[#allocation44_spill] sm:$0xff] }
 0x1d6   : > { %v2893_v40 = vadd.f32 %v2790_v14, %v2599_v46  ;;  %v2499_v24 = vpop.f32.mrf.mxu1  ;;  %v3363_v6 = vld [vmem:[#allocation2 + $0x50] sm:$0xff]  ;;  %v7906_v25 = vld [vmem:[%s10924_s6 + $0x20] sm:$0xff]  }
 0x1d7   : > { %3281 = vst.msk [vmem:[#allocation2 + $0x90] sm:$0xff] %vm3199_vm2, %v3002_v11  ;;  %v3000_v2 = vmax.f32 %v2968_v55, 0.0  ;;  %v2973_v12 = vadd.f32 %v9289_v16, %v2934_v31  ;;  %v2896_v47 = vadd.f32 %v7466_v23, %v2602_v60  ;;  %v2600_v21 = vadd.f32 %v2499_v24, %v2306_v20  ;;  %v7469_v10 = vpop.f32.mrf.mxu0  ;;  %v3311_v7 = vld [vmem:[#allocation2 + $0x4f] sm:$0xff]  ;;  %v11052_v46 = vld [vmem:[#allocation10_spill] sm:$0xff] }
 0x1d8   : > { %v2932_v33 = vmul.f32 %v9271_v39, %v2893_v40  ;;  %v7435_v45 = vpop.f32.mrf.mxu1  ;;  %v3361_v5 = vld [vmem:[#allocation2 + $0x30] sm:$0xff]  ;;  %v9384_v19 = vpack.c.bf16 %v3363_v6, %v3362_v4  ;;  %v2024_v11 = vadd.f32 %v11053_v36, %v11052_v46  ;;  %v9399_v60 = vpack.c.bf16 %v3311_v7, %v3310_v61  ;;  %v11054_v40 = vld [vmem:[#allocation7_spill] sm:$0xff]  ;;  %v11061_v4 = vld [vmem:[#allocation13_spill] sm:$0xff] }
 0x1d9   : > { %v3309_v63 = vld [vmem:[#allocation2 + $0x2f] sm:$0xff]  ;;  %3279 = vst.msk [vmem:[#allocation2 + $0x70] sm:$0xff] %vm3199_vm2, %v3000_v2  ;;  %v3005_v14 = vmax.f32 %v2973_v12, 0.0  ;;  %v2935_v51 = vmul.f32 %v9271_v39, %v2896_v47  ;;  %v2894_v42 = vadd.f32 %v2793_v28, %v2600_v21  ;;  %v2605_v59 = vadd.f32 %v7435_v45, %v2311_v3  ;;  %v2806_v50 = vpop.f32.mrf.mxu0  ;;  %v11051_v3 = vld [vmem:[#allocation37_spill] sm:$0xff] }
 0x1da   : > { %v2971_v27 = vadd.f32 %v9289_v16, %v2932_v33  ;;  %v2512_v37 = vpop.f32.mrf.mxu1  ;;  %v9380_v13 = vpack.c.bf16 %v3361_v5, %v3360_v43  ;;  %v9382_v48 = vpack.c.bf16 %v3309_v63, %v3308_v32  ;;  %v2313_v30 = vadd.f32 %v11051_v3, %v2018_v52  ;;  %v11055_v2 = vld [vmem:[#allocation39_spill] sm:$0xff]  ;;  %v11056_v47 = vld [vmem:[#allocation41_spill] sm:$0xff]  ;;  %v11059_v45 = vld [vmem:[#allocation12_spill] sm:$0xff] }
 0x1db   : > { %3284 = vst.msk [vmem:[#allocation2 + $0xc8] sm:$0xff] %vm3199_vm2, %v3005_v14  ;;  %v2974_v58 = vadd.f32 %v9289_v16, %v2935_v51  ;;  %v2933_v29 = vmul.f32 %v9271_v39, %v2894_v42  ;;  %v2899_v23 = vadd.f32 %v7469_v10, %v2605_v59  ;;  %v2603_v26 = vadd.f32 %v2512_v37, %v2309_v53  ;;  %v7470_v20 = vpop.f32.mrf.mxu0  ;;  %v7908_v53 = vld [vmem:[%s10924_s6 + $0x30] sm:$0xff]   ;;  %v11060_v5 = vld [vmem:[#allocation46_spill] sm:$0xff]  ;;  %v3366_v32 = vld [vmem:[#allocation2 + $0x88] sm:$0xff] }
 0x1dc   : > { %v3003_v55 = vmax.f32 %v2971_v27, 0.0  ;;  %7526 = vmatmul.mubr.msk.bf16.vlgmr.msra.gmra.mxu0 %vm3199_vm2, %v9380_v13  ;;  %7562 = vmatmul.mubr.msk.bf16.vlgmr.msra.gmra.mxu1 %vm3199_vm2, %v9382_v48  ;;  %v7436_v31 = vpop.f32.mrf.mxu1  ;;  %v2316_v12 = vadd.f32 %v11055_v2, %v2021_v38  ;;  %v9411_v21 = vadd.f32 %v11056_v47, %v2019_v22  ;;  %v11058_v22 = vld [vmem:[#allocation43_spill] sm:$0xff]  ;;  %v2022_v63 = vadd.f32 %v11060_v5, %v11059_v45  ;;  %v11062_v14 = vld [vmem:[#allocation48_spill] sm:$0xff] }
 0x1dd   : > { %v3006_v28 = vmax.f32 %v2974_v58, 0.0  ;;  %v2972_v18 = vadd.f32 %v9289_v16, %v2933_v29  ;;  %v2938_v8 = vmul.f32 %v9271_v39, %v2899_v23  ;;  %v2897_v41 = vadd.f32 %v2806_v50, %v2603_v26  ;;  %7594 = vmatpush3.bf16.msra.mxu0 %v11054_v40  ;;  %7529 = vmatprep.mubr.msk.bf16.mxu0 %vm3199_vm2, %v9384_v19  ;;  %v2809_v24 = vpop.f32.mrf.mxu0  ;;  %v3364_v29 = vld [vmem:[#allocation2 + $0x68] sm:$0xff] }
 0x1de   : > { %3282 = vst.msk [vmem:[#allocation2 + $0xa8] sm:$0xff] %vm3199_vm2, %v3003_v55  ;;  %v2606_v10 = vadd.f32 %v7436_v31, %v2312_v17  ;;  %7565 = vmatprep.mubr.msk.bf16.mxu1 %vm3199_vm2, %v9399_v60  ;;  %v2515_v6 = vpop.f32.mrf.mxu1  ;;  %7595 = vmatprep.subr.bf16.mxu0 %v7906_v25  ;;  %v3367_v38 = vld [vmem:[#allocation2 + $0x90] sm:$0xff]  ;;  %v9427_v33 = vadd.f32 %v11058_v22, %v2024_v11  ;;  %v3312_v23 = vld [vmem:[#allocation2 + $0x67] sm:$0xff] }
 0x1df   : > { %3285 = vst.msk [vmem:[#allocation2 + $0xd0] sm:$0xff] %vm3199_vm2, %v3006_v28  ;;  %v3004_v34 = vmax.f32 %v2972_v18, 0.0  ;;  %v2977_v52 = vadd.f32 %v9289_v16, %v2938_v8  ;;  %v2936_v9 = vmul.f32 %v9271_v39, %v2897_v41  ;;  %v2604_v49 = vadd.f32 %v2515_v6, %v9363_v56  ;;  %v7473_v17 = vpop.f32.mrf.mxu0  ;;  %7630 = vmatpush3.bf16.msra.mxu1 %v11057_v62  ;;  %v3315_v26 = vld [vmem:[#allocation2 + $0x8f] sm:$0xff]  ;;  %v3314_v18 = vld [vmem:[#allocation2 + $0x87] sm:$0xff]  ;;  %v11063_v8 = vld [vmem:[#allocation45_spill] sm:$0xff] }
 0x1e0   : > { %v2025_v51 = vadd.f32 %v11062_v14, %v11061_v4  ;;  %v2900_v42 = vadd.f32 %v7470_v20, %v2606_v10  ;;  %v7439_v59 = vpop.f32.mrf.mxu1  ;;  %v3365_v50 = vld [vmem:[#allocation2 + $0x70] sm:$0xff]  ;;  %7631 = vmatprep.subr.bf16.mxu1 %v7908_v53  ;;  %v9441_v36 = vpack.c.bf16 %v3367_v38, %v3366_v32  ;;  %v2317_v41 = vadd.f32 %v11063_v8, %v2022_v63  ;;  %v11070_v32 = vld [vmem:[#allocation18_spill] sm:$0xff] }
 0x1e1   : > { %v3313_v43 = vld [vmem:[#allocation2 + $0x6f] sm:$0xff]  ;;  %3283 = vst.msk [vmem:[#allocation2 + $0xb0] sm:$0xff] %vm3199_vm2, %v3004_v34  ;;  %v3009_v56 = vmax.f32 %v2977_v52, 0.0  ;;  %v2975_v7 = vadd.f32 %v9289_v16, %v2936_v9  ;;  %v2898_v27 = vadd.f32 %v2809_v24, %v2604_v49  ;;  %v2609_v37 = vadd.f32 %v7439_v59, %v9366_v0  ;;  %v2822_v58 = vpop.f32.mrf.mxu0  ;;  %7596 = vmatpush3.bf16.msra.mxu0 %v7906_v25  ;;  %v9447_v0 = vld [vmem:[%s10924_s6 + $0x58] sm:$0xff]   ;;  %v11065_v9 = vld [vmem:[#allocation50_spill] sm:$0xff] }
 0x1e2   : > { %v2939_v20 = vmul.f32 %v9271_v39, %v2900_v42  ;;  %v2528_v61 = vpop.f32.mrf.mxu1  ;;  %v9437_v3 = vpack.c.bf16 %v3365_v50, %v3364_v29  ;;  %v9439_v46 = vpack.c.bf16 %v3313_v43, %v3312_v23  ;;  %7665 = vmatprep.subr.bf16.mxu0 %v9419_v15  ;;  %v9457_v2 = vpack.c.bf16 %v3315_v26, %v3314_v18  ;;  %v11064_v34 = vld [vmem:[#allocation47_spill] sm:$0xff]  ;;  %v11067_v38 = vld [vmem:[#allocation52_spill] sm:$0xff]  ;;  %v11068_v59 = vld [vmem:[#allocation17_spill] sm:$0xff] }
 0x1e3   : > { %3288 = vst.msk [vmem:[#allocation2 + $0x108] sm:$0xff] %vm3199_vm2, %v3009_v56  ;;  %v3007_v11 = vmax.f32 %v2975_v7, 0.0  ;;  %v2937_v25 = vmul.f32 %v9271_v39, %v2898_v27  ;;  %v2903_v55 = vadd.f32 %v7473_v17, %v2609_v37  ;;  %v2607_v31 = vadd.f32 %v2528_v61, %v2313_v30  ;;  %v7474_v28 = vpop.f32.mrf.mxu0  ;;  %7632 = vmatpush3.bf16.msra.mxu1 %v7908_v53  ;;  %v11066_v17 = vld [vmem:[#allocation15_spill] sm:$0xff]  ;;  %v11069_v50 = vld [vmem:[#allocation54_spill] sm:$0xff]  ;;  %v11071_v56 = vld [vmem:[#allocation56_spill] sm:$0xff] }
 0x1e4   : > { %v2978_v40 = vadd.f32 %v9289_v16, %v2939_v20  ;;  %7530 = vmatmul.mubr.msk.bf16.gmra.mxu0 %vm3199_vm2, %v9437_v3  ;;  %7566 = vmatmul.mubr.msk.bf16.gmra.mxu1 %vm3199_vm2, %v9439_v46  ;;  %v7440_v24 = vpop.f32.mrf.mxu1  ;;  %v2320_v52 = vadd.f32 %v11064_v34, %v2025_v51  ;;  %v2023_v49 = vadd.f32 %v11065_v9, %v9301_v57  ;;  %v3370_v42 = vld [vmem:[#allocation2 + $0xc8] sm:$0xff]  ;;  %v11072_v34 = vld [vmem:[#allocation49_spill] sm:$0xff] }
 0x1e5   : > { %3286 = vst.msk [vmem:[#allocation2 + $0xe8] sm:$0xff] %vm3199_vm2, %v3007_v11  ;;  %v2976_v30 = vadd.f32 %v9289_v16, %v2937_v25  ;;  %v2942_v47 = vmul.f32 %v9271_v39, %v2903_v55  ;;  %v2901_v53 = vadd.f32 %v2822_v58, %v2607_v31  ;;  %v2610_v10 = vadd.f32 %v7440_v24, %v2316_v12  ;;  %v2825_v6 = vpop.f32.mrf.mxu0  ;;  %v3368_v55 = vld [vmem:[#allocation2 + $0xa8] sm:$0xff] }
 0x1e6   : > { %7533 = vmatprep.mubr.msk.bf16.mxu0 %vm3199_vm2, %v9441_v36  ;;  %v2028_v62 = vadd.f32 %v11067_v38, %v11066_v17  ;;  %v3010_v22 = vmax.f32 %v2978_v40, 0.0  ;;  %7569 = vmatprep.mubr.msk.bf16.mxu1 %vm3199_vm2, %v9457_v2  ;;  %v2531_v45 = vpop.f32.mrf.mxu1  ;;  %v3371_v5 = vld [vmem:[#allocation2 + $0xd0] sm:$0xff]  ;;  %v2026_v43 = vadd.f32 %v11069_v50, %v11068_v59  ;;  %v2029_v7 = vadd.f32 %v11071_v56, %v11070_v32  ;;  %v3316_v31 = vld [vmem:[#allocation2 + $0xa7] sm:$0xff] }
 0x1e7   : > { %7701 = vmatprep.subr.bf16.mxu1 %v9447_v0  ;;  %v3008_v12 = vmax.f32 %v2976_v30, 0.0  ;;  %v2981_v63 = vadd.f32 %v9289_v16, %v2942_v47  ;;  %v2940_v4 = vmul.f32 %v9271_v39, %v2901_v53  ;;  %v2904_v14 = vadd.f32 %v7474_v28, %v2610_v10  ;;  %v7477_v51 = vpop.f32.mrf.mxu0  ;;  %v3319_v57 = vld [vmem:[#allocation2 + $0xcf] sm:$0xff]  ;;  %v3318_v28 = vld [vmem:[#allocation2 + $0xc7] sm:$0xff] }
 0x1e8   : > { %3289 = vst.msk [vmem:[#allocation2 + $0x110] sm:$0xff] %vm3199_vm2, %v3010_v22  ;;  %v2608_v27 = vadd.f32 %v2531_v45, %v9411_v21  ;;  %v7443_v37 = vpop.f32.mrf.mxu1  ;;  %v3369_v58 = vld [vmem:[#allocation2 + $0xb0] sm:$0xff]  ;;  %v9480_v23 = vpack.c.bf16 %v3371_v5, %v3370_v42  ;;  %v9490_v24 = vpack.c.bf16 %v3319_v57, %v3318_v28  ;;  %v2318_v9 = vadd.f32 %v11072_v34, %v2023_v49  ;;  %v11073_v17 = vld [vmem:[#allocation51_spill] sm:$0xff] }
 0x1e9   : > { %v3317_v29 = vld [vmem:[#allocation2 + $0xaf] sm:$0xff]  ;;  %3287 = vst.msk [vmem:[#allocation2 + $0xf0] sm:$0xff] %vm3199_vm2, %v3008_v12  ;;  %v3013_v26 = vmax.f32 %v2981_v63, 0.0  ;;  %v2979_v20 = vadd.f32 %v9289_v16, %v2940_v4  ;;  %v2943_v61 = vmul.f32 %v9271_v39, %v2904_v14  ;;  %v2613_v11 = vadd.f32 %v7443_v37, %v9427_v33  ;;  %v2838_v25 = vpop.f32.mrf.mxu0 }
 0x1ea   : > { %v2902_v18 = vadd.f32 %v2825_v6, %v2608_v27  ;;  %v2544_v21 = vpop.f32.mrf.mxu1  ;;  %v9486_v8 = vpack.c.bf16 %v3369_v58, %v3368_v55  ;;  %v9488_v40 = vpack.c.bf16 %v3317_v29, %v3316_v31  ;;  %v2323_v38 = vadd.f32 %v11073_v17, %v2028_v62  ;;  %v11074_v62 = vld [vmem:[#allocation53_spill] sm:$0xff]  ;;  %v11075_v4 = vld [vmem:[#allocation55_spill] sm:$0xff] }
 0x1eb   : > { %3292 = vst.msk [vmem:[#allocation2 + $0x148] sm:$0xff] %vm3199_vm2, %v3013_v26  ;;  %v3011_v30 = vmax.f32 %v2979_v20, 0.0  ;;  %v2982_v47 = vadd.f32 %v9289_v16, %v2943_v61  ;;  %v2907_v53 = vadd.f32 %v7477_v51, %v2613_v11  ;;  %v2611_v10 = vadd.f32 %v2544_v21, %v2317_v41  ;;  %v7478_v33 = vpop.f32.mrf.mxu0  ;;  %v3374_v27 = vld [vmem:[#allocation2 + $0x108] sm:$0xff]  ;;  %v11078_v26 = vld [vmem:[#allocation20_spill] sm:$0xff] }
 0x1ec   : > { %v2941_v6 = vmul.f32 %v9271_v39, %v2902_v18  ;;  %7534 = vmatmul.mubr.msk.bf16.gmra.mxu0 %vm3199_vm2, %v9486_v8  ;;  %7570 = vmatmul.mubr.msk.bf16.gmra.mxu1 %vm3199_vm2, %v9488_v40  ;;  %v7444_v22 = vpop.f32.mrf.mxu1  ;;  %v2321_v63 = vadd.f32 %v11074_v62, %v2026_v43  ;;  %v2324_v14 = vadd.f32 %v11075_v4, %v2029_v7  ;;  %v11076_v58 = vld [vmem:[#allocation19_spill] sm:$0xff]  ;;  %v11081_v4 = vld [vmem:[#allocation22_spill] sm:$0xff] }
 0x1ed   : > { %3290 = vst.msk [vmem:[#allocation2 + $0x128] sm:$0xff] %vm3199_vm2, %v3011_v30  ;;  %v3014_v45 = vmax.f32 %v2982_v47, 0.0  ;;  %v2946_v5 = vmul.f32 %v9271_v39, %v2907_v53  ;;  %v2905_v41 = vadd.f32 %v2838_v25, %v2611_v10  ;;  %v2614_v12 = vadd.f32 %v7444_v22, %v2320_v52  ;;  %7537 = vmatprep.mubr.msk.bf16.mxu0 %vm3199_vm2, %v9480_v23  ;;  %v2841_v49 = vpop.f32.mrf.mxu0  ;;  %v11077_v7 = vld [vmem:[#allocation59_spill] sm:$0xff] }
 0x1ee   : > { %7573 = vmatprep.mubr.msk.bf16.mxu1 %vm3199_vm2, %v9490_v24  ;;  %v2027_v51 = vadd.f32 %v9231_v54, %v9322_v35  ;;  %v2980_v42 = vadd.f32 %v9289_v16, %v2941_v6  ;;  %v2547_v57 = vpop.f32.mrf.mxu1  ;;  %v2032_v29 = vadd.f32 %v11077_v7, %v11076_v58  ;;  %v11079_v54 = vld [vmem:[#allocation61_spill] sm:$0xff]  ;;  %v3372_v47 = vld [vmem:[#allocation2 + $0xe8] sm:$0xff] }
 0x1ef   : > { %3293 = vst.msk [vmem:[#allocation2 + $0x150] sm:$0xff] %vm3199_vm2, %v3014_v45  ;;  %v2985_v52 = vadd.f32 %v9289_v16, %v2946_v5  ;;  %v2944_v59 = vmul.f32 %v9271_v39, %v2905_v41  ;;  %v2908_v50 = vadd.f32 %v7478_v33, %v2614_v12  ;;  %v2612_v32 = vadd.f32 %v2547_v57, %v2318_v9  ;;  %v7481_v56 = vpop.f32.mrf.mxu0  ;;  %v3375_v37 = vld [vmem:[#allocation2 + $0x110] sm:$0xff]  ;;  %v3320_v53 = vld [vmem:[#allocation2 + $0xe7] sm:$0xff] }
 0x1f0   : > { %v3323_v43 = vld [vmem:[#allocation2 + $0x10f] sm:$0xff]  ;;  %v2030_v35 = vadd.f32 %v11079_v54, %v11078_v26  ;;  %v3012_v20 = vmax.f32 %v2980_v42, 0.0  ;;  %v7447_v61 = vpop.f32.mrf.mxu1  ;;  %v9519_v55 = vpack.c.bf16 %v3375_v37, %v3374_v27  ;;  %v3322_v10 = vld [vmem:[#allocation2 + $0x107] sm:$0xff] }
 0x1f1   : > { %v3373_v11 = vld [vmem:[#allocation2 + $0xf0] sm:$0xff]  ;;  %v3017_v31 = vmax.f32 %v2985_v52, 0.0  ;;  %v2983_v28 = vadd.f32 %v9289_v16, %v2944_v59  ;;  %v2947_v18 = vmul.f32 %v9271_v39, %v2908_v50  ;;  %v2906_v21 = vadd.f32 %v2841_v49, %v2612_v32  ;;  %v2854_v30 = vpop.f32.mrf.mxu0  ;;  %v11080_v49 = vld [vmem:[#allocation57_spill] sm:$0xff] }
 0x1f2   : > { %v3321_v25 = vld [vmem:[#allocation2 + $0xef] sm:$0xff]  ;;  %3291 = vst.msk [vmem:[#allocation2 + $0x130] sm:$0xff] %vm3199_vm2, %v3012_v20  ;;  %v2617_v33 = vadd.f32 %v7447_v61, %v2323_v38  ;;  %v2560_v34 = vpop.f32.mrf.mxu1  ;;  %v9524_v9 = vpack.c.bf16 %v3373_v11, %v3372_v47  ;;  %v9528_v6 = vpack.c.bf16 %v3323_v43, %v3322_v10  ;;  %v2322_v62 = vadd.f32 %v11080_v49, %v2027_v51  ;;  %v11082_v51 = vld [vmem:[#allocation21_spill] sm:$0xff] }
 0x1f3   : > { %v9526_v17 = vpack.c.bf16 %v3321_v25, %v3320_v53  ;;  %3296 = vst.msk [vmem:[#allocation2 + $0x188] sm:$0xff] %vm3199_vm2, %v3017_v31  ;;  %v3015_v22 = vmax.f32 %v2983_v28, 0.0  ;;  %v2986_v45 = vadd.f32 %v9289_v16, %v2947_v18  ;;  %v2945_v5 = vmul.f32 %v9271_v39, %v2906_v21  ;;  %v7482_v12 = vpop.f32.mrf.mxu0  ;;  %v11084_v37 = vld [vmem:[#allocation60_spill] sm:$0xff]  ;;  %v3378_v25 = vld [vmem:[#allocation2 + $0x148] sm:$0xff]  ;;  %v11085_v28 = vld [vmem:[#allocation62_spill] sm:$0xff] }
 0x1f4   : > { %v2615_v41 = vadd.f32 %v2560_v34, %v2321_v63  ;;  %v2033_v38 = vadd.f32 %v9244_v1, %v11081_v4  ;;  %v2911_v42 = vadd.f32 %v7481_v56, %v2617_v33  ;;  %7538 = vmatmul.mubr.msk.bf16.gmra.mxu0 %vm3199_vm2, %v9524_v9  ;;  %v7448_v57 = vpop.f32.mrf.mxu1  ;;  %v1737_v32 = vadd.f32 %v11082_v51, %v9325_v44  ;;  %v11083_v56 = vld [vmem:[#allocation58_spill] sm:$0xff]  ;;  %v11086_v18 = vld [vmem:[#allocation64_spill] sm:$0xff] }
 0x1f5   : > { %7574 = vmatmul.mubr.msk.bf16.gmra.mxu1 %vm3199_vm2, %v9526_v17  ;;  %3294 = vst.msk [vmem:[#allocation2 + $0x168] sm:$0xff] %vm3199_vm2, %v3015_v22  ;;  %v3018_v52 = vmax.f32 %v2986_v45, 0.0  ;;  %v2984_v59 = vadd.f32 %v9289_v16, %v2945_v5  ;;  %v2618_v50 = vadd.f32 %v7448_v57, %v2324_v14  ;;  %7541 = vmatprep.mubr.msk.bf16.mxu0 %vm3199_vm2, %v9519_v55  ;;  %v2857_v1 = vpop.f32.mrf.mxu0  ;;  %v3326_v53 = vld [vmem:[#allocation2 + $0x147] sm:$0xff] }
 0x1f6   : > { %v2909_v63 = vadd.f32 %v2854_v30, %v2615_v41  ;;  %7577 = vmatprep.mubr.msk.bf16.mxu1 %vm3199_vm2, %v9528_v6  ;;  %v2327_v27 = vadd.f32 %v11083_v56, %v2032_v29  ;;  %v2325_v43 = vadd.f32 %v11084_v37, %v2030_v35  ;;  %v2950_v58 = vmul.f32 %v9271_v39, %v2911_v42  ;;  %v2563_v7 = vpop.f32.mrf.mxu1  ;;  %v3379_v26 = vld [vmem:[#allocation2 + $0x150] sm:$0xff]  ;;  %v3376_v30 = vld [vmem:[#allocation2 + $0x128] sm:$0xff] }
 0x1f7   : > { %3297 = vst.msk [vmem:[#allocation2 + $0x190] sm:$0xff] %vm3199_vm2, %v3018_v52  ;;  %v3016_v14 = vmax.f32 %v2984_v59, 0.0  ;;  %v2912_v20 = vadd.f32 %v7482_v12, %v2618_v50  ;;  %v2616_v61 = vadd.f32 %v2563_v7, %v2322_v62  ;;  %v7485_v11 = vpop.f32.mrf.mxu0  ;;  %v3327_v31 = vld [vmem:[#allocation2 + $0x14f] sm:$0xff]  ;;  %v2328_v44 = vadd.f32 %v11085_v28, %v2033_v38  ;;  %v3324_v41 = vld [vmem:[#allocation2 + $0x127] sm:$0xff] }
 0x1f8   : > { %v2948_v54 = vmul.f32 %v9271_v39, %v2909_v63  ;;  %v2031_v29 = vadd.f32 %v11086_v18, %v1737_v32  ;;  %v2989_v35 = vadd.f32 %v9289_v16, %v2950_v58  ;;  %v7451_v21 = vpop.f32.mrf.mxu1  ;;  %v9556_v47 = vpack.c.bf16 %v3379_v26, %v3378_v25  ;;  %v11087_v50 = vld [vmem:[#allocation63_spill] sm:$0xff] }
 0x1f9   : > { %3295 = vst.msk [vmem:[#allocation2 + $0x170] sm:$0xff] %vm3199_vm2, %v3016_v14  ;;  %v2951_v33 = vmul.f32 %v9271_v39, %v2912_v20  ;;  %v2910_v34 = vadd.f32 %v2857_v1, %v2616_v61  ;;  %v2621_v22 = vadd.f32 %v7451_v21, %v2327_v27  ;;  %v2870_v45 = vpop.f32.mrf.mxu0  ;;  %v3377_v5 = vld [vmem:[#allocation2 + $0x130] sm:$0xff]  ;;  %v9565_v42 = vpack.c.bf16 %v3327_v31, %v3326_v53 }
 0x1fa   : > { %v2987_v10 = vadd.f32 %v9289_v16, %v2948_v54  ;;  %v3325_v12 = vld [vmem:[#allocation2 + $0x12f] sm:$0xff]  ;;  %v3021_v49 = vmax.f32 %v2989_v35, 0.0  ;;  %v2576_v62 = vpop.f32.mrf.mxu1  ;;  %v9561_v4 = vpack.c.bf16 %v3377_v5, %v3376_v30  ;;  %v2326_v1 = vadd.f32 %v11087_v50, %v2031_v29 }
 0x1fb   : > { %v9563_v38 = vpack.c.bf16 %v3325_v12, %v3324_v41  ;;  %v2990_v52 = vadd.f32 %v9289_v16, %v2951_v33  ;;  %v2949_v59 = vmul.f32 %v9271_v39, %v2910_v34  ;;  %v2915_v63 = vadd.f32 %v7485_v11, %v2621_v22  ;;  %v7486_v56 = vpop.f32.mrf.mxu0  ;;  %v3382_v22 = vld [vmem:[#allocation2 + $0x188] sm:$0xff] }
 0x1fc   : > { %v3019_v57 = vmax.f32 %v2987_v10, 0.0  ;;  %3300 = vst.msk [vmem:[#allocation2 + $0x1c8] sm:$0xff] %vm3199_vm2, %v3021_v49  ;;  %v2619_v51 = vadd.f32 %v2576_v62, %v2325_v43  ;;  %7542 = vmatmul.mubr.msk.bf16.gmra.mxu0 %vm3199_vm2, %v9561_v4  ;;  %v7452_v32 = vpop.f32.mrf.mxu1  ;;  %v3380_v11 = vld [vmem:[#allocation2 + $0x168] sm:$0xff] }
 0x1fd   : > { %7578 = vmatmul.mubr.msk.bf16.gmra.mxu1 %vm3199_vm2, %v9563_v38  ;;  %v3022_v27 = vmax.f32 %v2990_v52, 0.0  ;;  %v2988_v37 = vadd.f32 %v9289_v16, %v2949_v59  ;;  %v2954_v58 = vmul.f32 %v9271_v39, %v2915_v63  ;;  %v2622_v7 = vadd.f32 %v7452_v32, %v2328_v44  ;;  %7545 = vmatprep.mubr.msk.bf16.mxu0 %vm3199_vm2, %v9556_v47  ;;  %v2873_v28 = vpop.f32.mrf.mxu0  ;;  %v3328_v10 = vld [vmem:[#allocation2 + $0x167] sm:$0xff] }
 0x1fe   : > { %3298 = vst.msk [vmem:[#allocation2 + $0x1a8] sm:$0xff] %vm3199_vm2, %v3019_v57  ;;  %7581 = vmatprep.mubr.msk.bf16.mxu1 %vm3199_vm2, %v9565_v42  ;;  %v2913_v43 = vadd.f32 %v2870_v45, %v2619_v51  ;;  %v2579_v26 = vpop.f32.mrf.mxu1  ;;  %v3383_v25 = vld [vmem:[#allocation2 + $0x190] sm:$0xff]  ;;  %v3330_v45 = vld [vmem:[#allocation2 + $0x187] sm:$0xff] }
 0x1ff   : > { %3301 = vst.msk [vmem:[#allocation2 + $0x1d0] sm:$0xff] %vm3199_vm2, %v3022_v27  ;;  %v3020_v14 = vmax.f32 %v2988_v37, 0.0  ;;  %v2993_v54 = vadd.f32 %v9289_v16, %v2954_v58  ;;  %v2916_v20 = vadd.f32 %v7486_v56, %v2622_v7  ;;  %v2620_v61 = vadd.f32 %v2579_v26, %v2326_v1  ;;  %v3331_v29 = vld [vmem:[#allocation2 + $0x18f] sm:$0xff] }
 0x200   : > { %v2952_v31 = vmul.f32 %v9271_v39, %v2913_v43  ;;  %v3381_v44 = vld [vmem:[#allocation2 + $0x170] sm:$0xff]  ;;  %v9595_v12 = vpack.c.bf16 %v3383_v25, %v3382_v22  ;;  %v9597_v49 = vpack.c.bf16 %v3331_v29, %v3330_v45 }
 0x201   : > { %v3329_v18 = vld [vmem:[#allocation2 + $0x16f] sm:$0xff]  ;;  %3299 = vst.msk [vmem:[#allocation2 + $0x1b0] sm:$0xff] %vm3199_vm2, %v3020_v14  ;;  %v3025_v35 = vmax.f32 %v2993_v54, 0.0  ;;  %v2955_v21 = vmul.f32 %v9271_v39, %v2916_v20  ;;  %v2914_v30 = vadd.f32 %v2873_v28, %v2620_v61  ;;  %v9587_v53 = vpack.c.bf16 %v3381_v44, %v3380_v11 }
 0x202   : > { %v2991_v33 = vadd.f32 %v9289_v16, %v2952_v31  ;;  %v9590_v34 = vpack.c.bf16 %v3329_v18, %v3328_v10  ;;  %v3853_v43 = vld [vmem:[#allocation2 + $0x9] sm:$0xff]  ;;  %v3854_v26 = vld [vmem:[#allocation2 + $0x11] sm:$0xff]  ;;  %v9652_v10 = vpop.f32.mrf.mxu1 }
 0x203   : > { %3304 = vst.msk [vmem:[#allocation2 + $0x208] sm:$0xff] %vm3199_vm2, %v3025_v35  ;;  %v2994_v5 = vadd.f32 %v9289_v16, %v2955_v21  ;;  %v2953_v41 = vmul.f32 %v9271_v39, %v2914_v30  ;;  %v3386_v27 = vld [vmem:[#allocation2 + $0x1c8] sm:$0xff]  ;;  %v3885_v31 = vpack.c.bf16 %v3854_v26, %v3853_v43  ;;  %v3856_v44 = vld [vmem:[#allocation2 + $0x31] sm:$0xff]  ;;  %v7910_v21 = vld [vmem:[%s10924_s6 + $0x40] sm:$0xff]  }
 0x204   : > { %v3023_v62 = vmax.f32 %v2991_v33, 0.0  ;;  %7546 = vmatmul.mubr.msk.bf16.gmra.mxu0 %vm3199_vm2, %v9587_v53  ;;  %v3334_v37 = vld [vmem:[#allocation2 + $0x1c7] sm:$0xff]  ;;  %v3858_v29 = vld [vmem:[#allocation2 + $0x51] sm:$0xff] }
 0x205   : > { %7582 = vmatmul.mubr.msk.bf16.gmra.mxu1 %vm3199_vm2, %v9590_v34  ;;  %v3026_v57 = vmax.f32 %v2994_v5, 0.0  ;;  %v2992_v52 = vadd.f32 %v9289_v16, %v2953_v41  ;;  %7549 = vmatprep.mubr.msk.bf16.mxu0 %vm3199_vm2, %v9595_v12  ;;  %v3384_v59 = vld [vmem:[#allocation2 + $0x1a8] sm:$0xff]  ;;  %v3860_v22 = vld [vmem:[#allocation2 + $0x71] sm:$0xff] }
 0x206   : > { %7585 = vmatprep.mubr.msk.bf16.mxu1 %vm3199_vm2, %v9597_v49  ;;  %3302 = vst.msk [vmem:[#allocation2 + $0x1e8] sm:$0xff] %vm3199_vm2, %v3023_v62  ;;  %v3332_v63 = vld [vmem:[#allocation2 + $0x1a7] sm:$0xff]  ;;  %v3387_v50 = vld [vmem:[#allocation2 + $0x1d0] sm:$0xff] }
 0x207   : > { %3305 = vst.msk [vmem:[#allocation2 + $0x210] sm:$0xff] %vm3199_vm2, %v3026_v57  ;;  %v3024_v39 = vmax.f32 %v2992_v52, 0.0  ;;  %v3335_v32 = vld [vmem:[#allocation2 + $0x1cf] sm:$0xff]  ;;  %v9615_v58 = vpack.c.bf16 %v3387_v50, %v3386_v27 }
 0x208   : > { %v3385_v1 = vld [vmem:[#allocation2 + $0x1b0] sm:$0xff]  ;;  %v9617_v7 = vpack.c.bf16 %v3335_v32, %v3334_v37  ;;  %v9662_v33 = vld [vmem:[%s10924_s6 + $0x68] sm:$0xff]  }
 0x209   : > { %v3333_v51 = vld [vmem:[#allocation2 + $0x1af] sm:$0xff]  ;;  %3303 = vst.msk [vmem:[#allocation2 + $0x1f0] sm:$0xff] %vm3199_vm2, %v3024_v39  ;;  %v9611_v16 = vpack.c.bf16 %v3385_v1, %v3384_v59 }
 0x20a   : > { %v9613_v56 = vpack.c.bf16 %v3333_v51, %v3332_v63  ;;  %v3855_v28 = vld [vmem:[#allocation2 + $0x29] sm:$0xff]  ;;  %v3862_v5 = vld [vmem:[#allocation2 + $0x91] sm:$0xff] }
 0x20b   : > { %v3857_v18 = vld [vmem:[#allocation2 + $0x49] sm:$0xff]  ;;  %v9638_v35 = vpack.c.bf16 %v3856_v44, %v3855_v28  ;;  %v3864_v52 = vld [vmem:[#allocation2 + $0xb1] sm:$0xff] }
 0x20c   : > { %7550 = vmatmul.mubr.msk.bf16.gmra.mxu0 %vm3199_vm2, %v9611_v16  ;;  %v9643_v30 = vpack.c.bf16 %v3858_v29, %v3857_v18  ;;  %v3861_v45 = vld [vmem:[#allocation2 + $0x89] sm:$0xff]  ;;  %v3866_v59 = vld [vmem:[#allocation2 + $0xd1] sm:$0xff] }
 0x20d   : > { %7586 = vmatmul.mubr.msk.bf16.gmra.mxu1 %vm3199_vm2, %v9613_v56  ;;  %7553 = vmatprep.mubr.msk.bf16.mxu0 %vm3199_vm2, %v9615_v58  ;;  %v3388_v14 = vld [vmem:[#allocation2 + $0x1e8] sm:$0xff]  ;;  %v9675_v62 = vpack.c.bf16 %v3862_v5, %v3861_v45  ;;  %v3868_v51 = vld [vmem:[#allocation2 + $0xf1] sm:$0xff] }
 0x20e   : > { %7589 = vmatprep.mubr.msk.bf16.mxu1 %vm3199_vm2, %v9617_v7  ;;  %v3336_v20 = vld [vmem:[#allocation2 + $0x1e7] sm:$0xff]  ;;  %v3870_v27 = vld [vmem:[#allocation2 + $0x111] sm:$0xff] }
 0x20f   : > { %v3863_v57 = vld [vmem:[#allocation2 + $0xa9] sm:$0xff]  ;;  %v3876_v44 = vld [vmem:[#allocation2 + $0x171] sm:$0xff] }
 0x210   : > { %v3389_v54 = vld [vmem:[#allocation2 + $0x1f0] sm:$0xff]  ;;  %v9690_v50 = vpack.c.bf16 %v3864_v52, %v3863_v57 }
 0x211   : > { %v3337_v61 = vld [vmem:[#allocation2 + $0x1ef] sm:$0xff]  ;;  %v9627_v11 = vpack.c.bf16 %v3389_v54, %v3388_v14 }
 0x212   : > { %v9629_v25 = vpack.c.bf16 %v3337_v61, %v3336_v20  ;;  %v3865_v39 = vld [vmem:[#allocation2 + $0xc9] sm:$0xff]  ;;  %v3872_v14 = vld [vmem:[#allocation2 + $0x131] sm:$0xff] }
 0x213   : > { %v9692_v1 = vpack.c.bf16 %v3866_v59, %v3865_v39  ;;  %v3869_v32 = vld [vmem:[#allocation2 + $0x109] sm:$0xff]  ;;  %v3874_v20 = vld [vmem:[#allocation2 + $0x151] sm:$0xff] }
 0x214   : > { %7554 = vmatmul.mubr.msk.bf16.gmra.mxu0 %vm3199_vm2, %v9627_v11  ;;  %v9708_v26 = vpack.c.bf16 %v3870_v27, %v3869_v32  ;;  %v3873_v54 = vld [vmem:[#allocation2 + $0x149] sm:$0xff]  ;;  %v3878_v29 = vld [vmem:[#allocation2 + $0x191] sm:$0xff] }
 0x215   : > { %7590 = vmatmul.mubr.msk.bf16.gmra.mxu1 %vm3199_vm2, %v9629_v25  ;;  %7597 = vmatprep.mubr.msk.bf16.mxu0 %vm3199_vm2, %v3885_v31  ;;  %v9724_v28 = vpack.c.bf16 %v3874_v20, %v3873_v54  ;;  %v3877_v18 = vld [vmem:[#allocation2 + $0x189] sm:$0xff]  ;;  %v3882_v5 = vld [vmem:[#allocation2 + $0x1d1] sm:$0xff] }
 0x216   : > { %7633 = vmatprep.mubr.msk.bf16.mxu1 %vm3199_vm2, %v9382_v48  ;;  %v7912_v48 = vld [vmem:[%s10924_s6 + $0x50] sm:$0xff]   ;;  %v4189_v32 = vld [vmem:[#allocation2 + $0x207] sm:$0xff] }
 0x217   : > { %v3881_v45 = vld [vmem:[#allocation2 + $0x1c9] sm:$0xff]  ;;  %v3884_v59 = vld [vmem:[#allocation2 + $0x1f1] sm:$0xff] }
 0x218   : > { %v9756_v39 = vpack.c.bf16 %v3882_v5, %v3881_v45  ;;  %v5384_v20 = vld [vmem:[#allocation2 + $0x48] sm:$0xff] }
 0x219   : > { %v5082_v5 = vld [vmem:[#allocation2 + $0x87] sm:$0xff] }
 0x21c   : > { %7598 = vmatmul.mubr.msk.bf16.vlgmr.msra.gmra.mxu0 %vm3199_vm2, %v9638_v35 }
 0x21d   : > { %7634 = vmatmul.mubr.msk.bf16.vlgmr.msra.gmra.mxu1 %vm3199_vm2, %v9399_v60  ;;  %7666 = vmatpush3.bf16.msra.mxu0 %v9419_v15  ;;  %v3859_v60 = vld [vmem:[#allocation2 + $0x69] sm:$0xff]  ;;  %v9665_v15 = vpop.f32.mrf.mxu1 }
 0x21e   : > { %7601 = vmatprep.mubr.msk.bf16.mxu0 %vm3199_vm2, %v9643_v30  ;;  %7637 = vmatprep.mubr.msk.bf16.mxu1 %vm3199_vm2, %v9439_v46  ;;  %v9667_v41 = vpack.c.bf16 %v3860_v22, %v3859_v60  ;;  %v9673_v46 = vld [vmem:[%s10924_s6 + $0x78] sm:$0xff]   ;;  %v9740_v60 = vpack.c.bf16 %v3878_v29, %v3877_v18  ;;  %v5083_v29 = vld [vmem:[#allocation2 + $0x8f] sm:$0xff] }
 0x21f   : > { %7667 = vmatprep.subr.bf16.mxu0 %v7910_v21  ;;  %7702 = vmatpush3.bf16.msra.mxu1 %v9447_v0  ;;  %v9681_v0 = vpop.f32.mrf.mxu1  ;;  %v3880_v22 = vld [vmem:[#allocation2 + $0x1b1] sm:$0xff] }
 0x220   : > { %7703 = vmatprep.subr.bf16.mxu1 %v7912_v48 }
 0x221   : > { %7668 = vmatpush3.bf16.msra.mxu0 %v7910_v21  ;;  %v9688_v63 = vpop.f32.mrf.mxu1 }
 0x222   : > { %7737 = vmatprep.subr.bf16.mxu0 %v9662_v33 }
 0x223   : > { %7704 = vmatpush3.bf16.msra.mxu1 %v7912_v48 }
 0x224   : > { %7602 = vmatmul.mubr.msk.bf16.gmra.mxu0 %vm3199_vm2, %v9667_v41  ;;  %7773 = vmatprep.subr.bf16.mxu1 %v9673_v46 }
 0x225   : > { %7638 = vmatmul.mubr.msk.bf16.gmra.mxu1 %vm3199_vm2, %v9457_v2  ;;  %7605 = vmatprep.mubr.msk.bf16.mxu0 %vm3199_vm2, %v9675_v62  ;;  %v9698_v2 = vpop.f32.mrf.mxu1 }
 0x226   : > { %7641 = vmatprep.mubr.msk.bf16.mxu1 %vm3199_vm2, %v9488_v40  ;;  %v3867_v40 = vld [vmem:[#allocation2 + $0xe9] sm:$0xff] }
 0x227   : > { %v9704_v37 = vpop.f32.mrf.mxu1  ;;  %v9706_v43 = vpack.c.bf16 %v3868_v51, %v3867_v40  ;;  %v4190_v40 = vld [vmem:[#allocation2 + $0x20f] sm:$0xff] }
 0x22c   : > { %7606 = vmatmul.mubr.msk.bf16.gmra.mxu0 %vm3199_vm2, %v9690_v50 }
 0x22d   : > { %7642 = vmatmul.mubr.msk.bf16.gmra.mxu1 %vm3199_vm2, %v9490_v24  ;;  %7609 = vmatprep.mubr.msk.bf16.mxu0 %vm3199_vm2, %v9692_v1  ;;  %v9714_v24 = vpop.f32.mrf.mxu1 }
 0x22e   : > { %7645 = vmatprep.mubr.msk.bf16.mxu1 %vm3199_vm2, %v9526_v17  ;;  %v3871_v17 = vld [vmem:[#allocation2 + $0x129] sm:$0xff] }
 0x22f   : > { %v9720_v61 = vpop.f32.mrf.mxu1  ;;  %v9722_v31 = vpack.c.bf16 %v3872_v14, %v3871_v17  ;;  %v9770_v17 = vpack.c.bf16 %v4190_v40, %v4189_v32  ;;  %v7914_v14 = vld [vmem:[%s10924_s6 + $0x60] sm:$0xff]  }
 0x234   : > { %7610 = vmatmul.mubr.msk.bf16.gmra.mxu0 %vm3199_vm2, %v9706_v43 }
 0x235   : > { %7646 = vmatmul.mubr.msk.bf16.gmra.mxu1 %vm3199_vm2, %v9528_v6  ;;  %7613 = vmatprep.mubr.msk.bf16.mxu0 %vm3199_vm2, %v9708_v26  ;;  %v9730_v6 = vpop.f32.mrf.mxu1 }
 0x236   : > { %7649 = vmatprep.mubr.msk.bf16.mxu1 %vm3199_vm2, %v9563_v38  ;;  %v3875_v38 = vld [vmem:[#allocation2 + $0x169] sm:$0xff] }
 0x237   : > { %v9736_v21 = vpop.f32.mrf.mxu1  ;;  %v9738_v48 = vpack.c.bf16 %v3876_v44, %v3875_v38  ;;  %v5081_v38 = vld [vmem:[#allocation2 + $0x6f] sm:$0xff] }
 0x238   : > { %v5387_v44 = vld [vmem:[#allocation2 + $0x70] sm:$0xff] }
 0x23c   : > { %7614 = vmatmul.mubr.msk.bf16.gmra.mxu0 %vm3199_vm2, %v9722_v31 }
 0x23d   : > { %7650 = vmatmul.mubr.msk.bf16.gmra.mxu1 %vm3199_vm2, %v9565_v42  ;;  %7617 = vmatprep.mubr.msk.bf16.mxu0 %vm3199_vm2, %v9724_v28  ;;  %v9746_v42 = vpop.f32.mrf.mxu1 }
 0x23e   : > { %7653 = vmatprep.mubr.msk.bf16.mxu1 %vm3199_vm2, %v9590_v34  ;;  %v3879_v34 = vld [vmem:[#allocation2 + $0x1a9] sm:$0xff] }
 0x23f   : > { %v9752_v57 = vpop.f32.mrf.mxu1  ;;  %v9754_v52 = vpack.c.bf16 %v3880_v22, %v3879_v34  ;;  %v5389_v34 = vld [vmem:[#allocation2 + $0x90] sm:$0xff] }
 0x244   : > { %7618 = vmatmul.mubr.msk.bf16.gmra.mxu0 %vm3199_vm2, %v9738_v48 }
 0x245   : > { %7654 = vmatmul.mubr.msk.bf16.gmra.mxu1 %vm3199_vm2, %v9597_v49  ;;  %7621 = vmatprep.mubr.msk.bf16.mxu0 %vm3199_vm2, %v9740_v60  ;;  %v9762_v49 = vpop.f32.mrf.mxu1 }
 0x246   : > { %7657 = vmatprep.mubr.msk.bf16.mxu1 %vm3199_vm2, %v9613_v56  ;;  %11088 = vst [vmem:[#allocation23_spill] sm:$0xff] %v9762_v49  ;;  %v3883_v56 = vld [vmem:[#allocation2 + $0x1e9] sm:$0xff] }
 0x247   : > { %v9768_v51 = vpop.f32.mrf.mxu1  ;;  %v3900_v27 = vpack.c.bf16 %v3884_v59, %v3883_v56  ;;  %v5388_v56 = vld [vmem:[#allocation2 + $0x88] sm:$0xff] }
 0x248   : > { %11089 = vst [vmem:[#allocation26_spill] sm:$0xff] %v9768_v51  ;;  %v5418_v32 = vpack.c.bf16 %v5389_v34, %v5388_v56 }
 0x24c   : > { %7622 = vmatmul.mubr.msk.bf16.gmra.mxu0 %vm3199_vm2, %v9754_v52 }
 0x24d   : > { %7658 = vmatmul.mubr.msk.bf16.gmra.mxu1 %vm3199_vm2, %v9617_v7  ;;  %7625 = vmatprep.mubr.msk.bf16.mxu0 %vm3199_vm2, %v9756_v39  ;;  %v9775_v7 = vpop.f32.mrf.mxu1 }
 0x24e   : > { %7661 = vmatprep.mubr.msk.bf16.mxu1 %vm3199_vm2, %v9629_v25  ;;  %11090 = vst [vmem:[#allocation9_spill] sm:$0xff] %v9775_v7  ;;  %v5697_v7 = vld [vmem:[#allocation2 + $0xb1] sm:$0xff] }
 0x24f   : > { %v9781_v25 = vpop.f32.mrf.mxu1 }
 0x250   : > { %11091 = vst [vmem:[#allocation28_spill] sm:$0xff] %v9781_v25 }
 0x251   : > { %v9790_v54 = vpop.f32.mrf.mxu1 }
 0x252   : > { %11092 = vst [vmem:[#allocation11_spill] sm:$0xff] %v9790_v54 }
 0x254   : > { %7626 = vmatmul.mubr.msk.bf16.gmra.mxu0 %vm3199_vm2, %v3900_v27 }
 0x255   : > { %7662 = vmatmul.mubr.msk.bf16.gmra.mxu1 %vm3199_vm2, %v9770_v17  ;;  %7669 = vmatprep.mubr.msk.bf16.mxu0 %vm3199_vm2, %v9380_v13  ;;  %v7916_v13 = vld [vmem:[%s10924_s6 + $0x70] sm:$0xff]  }
 0x256   : > { %7705 = vmatprep.mubr.msk.bf16.mxu1 %vm3199_vm2, %v9638_v35  ;;  %v9806_v35 = vpop.f32.mrf.mxu1 }
 0x257   : > { %11093 = vst [vmem:[#allocation30_spill] sm:$0xff] %v9806_v35 }
 0x25c   : > { %7670 = vmatmul.mubr.msk.bf16.vlgmr.msra.gmra.mxu0 %vm3199_vm2, %v9384_v19  ;;  %v9803_v19 = vld [vmem:[%s10924_s6 + $0x88] sm:$0xff]  }
 0x25d   : > { %7706 = vmatmul.mubr.msk.bf16.vlgmr.msra.gmra.mxu1 %vm3199_vm2, %v9643_v30  ;;  %7738 = vmatpush3.bf16.msra.mxu0 %v9662_v33  ;;  %v4496_v33 = vld [vmem:[#allocation2 + $0x210] sm:$0xff] }
 0x25e   : > { %7673 = vmatprep.mubr.msk.bf16.mxu0 %vm3199_vm2, %v9437_v3  ;;  %7709 = vmatprep.mubr.msk.bf16.mxu1 %vm3199_vm2, %v9667_v41  ;;  %v9813_v3 = vpop.f32.mrf.mxu1  ;;  %v4802_v41 = vld [vmem:[#allocation2 + $0x211] sm:$0xff] }
 0x25f   : > { %7739 = vmatprep.subr.bf16.mxu0 %v7914_v14  ;;  %7774 = vmatpush3.bf16.msra.mxu1 %v9673_v46  ;;  %11094 = vst [vmem:[#allocation14_spill] sm:$0xff] %v9813_v3  ;;  %v5079_v46 = vld [vmem:[#allocation2 + $0x4f] sm:$0xff] }
 0x260   : > { %7775 = vmatprep.subr.bf16.mxu1 %v7916_v13  ;;  %v9819_v30 = vpop.f32.mrf.mxu1 }
 0x261   : > { %7740 = vmatpush3.bf16.msra.mxu0 %v7914_v14  ;;  %11095 = vst [vmem:[#allocation32_spill] sm:$0xff] %v9819_v30 }
 0x262   : > { %7809 = vmatprep.subr.bf16.mxu0 %v9803_v19 }
 0x263   : > { %7776 = vmatpush3.bf16.msra.mxu1 %v7916_v13 }
 0x264   : > { %7674 = vmatmul.mubr.msk.bf16.gmra.mxu0 %vm3199_vm2, %v9441_v36  ;;  %v9825_v36 = vpop.f32.mrf.mxu1 }
 0x265   : > { %7710 = vmatmul.mubr.msk.bf16.gmra.mxu1 %vm3199_vm2, %v9675_v62  ;;  %7677 = vmatprep.mubr.msk.bf16.mxu0 %vm3199_vm2, %v9486_v8  ;;  %11096 = vst [vmem:[#allocation34_spill] sm:$0xff] %v9825_v36  ;;  %v5385_v62 = vld [vmem:[#allocation2 + $0x50] sm:$0xff] }
 0x266   : > { %7713 = vmatprep.mubr.msk.bf16.mxu1 %vm3199_vm2, %v9690_v50  ;;  %v9831_v8 = vpop.f32.mrf.mxu1 }
 0x267   : > { %11097 = vst [vmem:[#allocation16_spill] sm:$0xff] %v9831_v8 }
 0x26c   : > { %7678 = vmatmul.mubr.msk.bf16.gmra.mxu0 %vm3199_vm2, %v9480_v23  ;;  %v9837_v23 = vpop.f32.mrf.mxu1 }
 0x26d   : > { %7714 = vmatmul.mubr.msk.bf16.gmra.mxu1 %vm3199_vm2, %v9692_v1  ;;  %7681 = vmatprep.mubr.msk.bf16.mxu0 %vm3199_vm2, %v9524_v9  ;;  %11098 = vst [vmem:[#allocation36_spill] sm:$0xff] %v9837_v23  ;;  %v4495_v1 = vld [vmem:[#allocation2 + $0x208] sm:$0xff]  ;;  %v5691_v23 = vld [vmem:[#allocation2 + $0x51] sm:$0xff] }
 0x26e   : > { %7717 = vmatprep.mubr.msk.bf16.mxu1 %vm3199_vm2, %v9706_v43  ;;  %v9843_v9 = vpop.f32.mrf.mxu1  ;;  %v9880_v43 = vpack.c.bf16 %v4496_v33, %v4495_v1  ;;  %v5087_v1 = vld [vmem:[#allocation2 + $0xcf] sm:$0xff] }
 0x26f   : > { %11099 = vst [vmem:[#allocation25_spill] sm:$0xff] %v9843_v9 }
 0x274   : > { %7682 = vmatmul.mubr.msk.bf16.gmra.mxu0 %vm3199_vm2, %v9519_v55  ;;  %v9849_v55 = vpop.f32.mrf.mxu1 }
 0x275   : > { %7718 = vmatmul.mubr.msk.bf16.gmra.mxu1 %vm3199_vm2, %v9708_v26  ;;  %7685 = vmatprep.mubr.msk.bf16.mxu0 %vm3199_vm2, %v9561_v4  ;;  %11100 = vst [vmem:[#allocation27_spill] sm:$0xff] %v9849_v55  ;;  %v5078_v26 = vld [vmem:[#allocation2 + $0x47] sm:$0xff] }
 0x276   : > { %7721 = vmatprep.mubr.msk.bf16.mxu1 %vm3199_vm2, %v9722_v31  ;;  %v9855_v4 = vpop.f32.mrf.mxu1  ;;  %v5110_v31 = vpack.c.bf16 %v5079_v46, %v5078_v26  ;;  %v5393_v26 = vld [vmem:[#allocation2 + $0xd0] sm:$0xff] }
 0x277   : > { %11101 = vst [vmem:[#allocation29_spill] sm:$0xff] %v9855_v4 }
 0x27c   : > { %7686 = vmatmul.mubr.msk.bf16.gmra.mxu0 %vm3199_vm2, %v9556_v47  ;;  %v9861_v47 = vpop.f32.mrf.mxu1 }
 0x27d   : > { %7722 = vmatmul.mubr.msk.bf16.gmra.mxu1 %vm3199_vm2, %v9724_v28  ;;  %7689 = vmatprep.mubr.msk.bf16.mxu0 %vm3199_vm2, %v9587_v53  ;;  %11102 = vst [vmem:[#allocation31_spill] sm:$0xff] %v9861_v47  ;;  %v5416_v28 = vpack.c.bf16 %v5385_v62, %v5384_v20  ;;  %v5102_v47 = vld [vmem:[#allocation2 + $0x1c7] sm:$0xff] }
 0x27e   : > { %7725 = vmatprep.mubr.msk.bf16.mxu1 %vm3199_vm2, %v9738_v48  ;;  %v9867_v53 = vpop.f32.mrf.mxu1  ;;  %v5080_v48 = vld [vmem:[#allocation2 + $0x67] sm:$0xff] }
 0x27f   : > { %11103 = vst [vmem:[#allocation33_spill] sm:$0xff] %v9867_v53  ;;  %v5111_v22 = vpack.c.bf16 %v5081_v38, %v5080_v48  ;;  %v5086_v48 = vld [vmem:[#allocation2 + $0xc7] sm:$0xff] }
 0x284   : > { %7690 = vmatmul.mubr.msk.bf16.gmra.mxu0 %vm3199_vm2, %v9595_v12  ;;  %v9873_v12 = vpop.f32.mrf.mxu1 }
 0x285   : > { %7726 = vmatmul.mubr.msk.bf16.gmra.mxu1 %vm3199_vm2, %v9740_v60  ;;  %7693 = vmatprep.mubr.msk.bf16.mxu0 %vm3199_vm2, %v9611_v16  ;;  %11104 = vst [vmem:[#allocation35_spill] sm:$0xff] %v9873_v12  ;;  %v4801_v16 = vld [vmem:[#allocation2 + $0x209] sm:$0xff] }
 0x286   : > { %7729 = vmatprep.mubr.msk.bf16.mxu1 %vm3199_vm2, %v9754_v52  ;;  %v9878_v50 = vpop.f32.mrf.mxu1  ;;  %v5386_v60 = vld [vmem:[#allocation2 + $0x68] sm:$0xff]  ;;  %v7918_v52 = vld [vmem:[%s10924_s6 + $0x80] sm:$0xff]  }
 0x287   : > { %11105 = vst [vmem:[#allocation6_spill] sm:$0xff] %v9878_v50  ;;  %v5417_v45 = vpack.c.bf16 %v5387_v44, %v5386_v60  ;;  %v5392_v60 = vld [vmem:[#allocation2 + $0xc8] sm:$0xff] }
 0x28c   : > { %7694 = vmatmul.mubr.msk.bf16.gmra.mxu0 %vm3199_vm2, %v9615_v58  ;;  %v9882_v58 = vpack.c.bf16 %v4802_v41, %v4801_v16  ;;  %v5085_v16 = vld [vmem:[#allocation2 + $0xaf] sm:$0xff] }
 0x28d   : > { %7730 = vmatmul.mubr.msk.bf16.gmra.mxu1 %vm3199_vm2, %v9756_v39  ;;  %7697 = vmatprep.mubr.msk.bf16.mxu0 %vm3199_vm2, %v9627_v11  ;;  %v9888_v11 = vpop.f32.mrf.mxu1  ;;  %v5112_v39 = vpack.c.bf16 %v5083_v29, %v5082_v5  ;;  %v5391_v41 = vld [vmem:[#allocation2 + $0xb0] sm:$0xff] }
 0x28e   : > { %7733 = vmatprep.mubr.msk.bf16.mxu1 %vm3199_vm2, %v3900_v27  ;;  %11106 = vst [vmem:[#allocation38_spill] sm:$0xff] %v9888_v11  ;;  %v5098_v11 = vld [vmem:[#allocation2 + $0x187] sm:$0xff] }
 0x28f   : > { %v9892_v18 = vpop.f32.mrf.mxu1 }
 0x290   : > { %11107 = vst [vmem:[#allocation8_spill] sm:$0xff] %v9892_v18 }
 0x294   : > { %7698 = vmatmul.mubr.msk.bf16.gmra.mxu0 %vm3199_vm2, %v9880_v43 }
 0x295   : > { %7734 = vmatmul.mubr.msk.bf16.gmra.mxu1 %vm3199_vm2, %v9882_v58  ;;  %7741 = vmatprep.mubr.msk.bf16.mxu0 %vm3199_vm2, %v5110_v31  ;;  %v5084_v31 = vld [vmem:[#allocation2 + $0xa7] sm:$0xff] }
 0x296   : > { %7777 = vmatprep.mubr.msk.bf16.mxu1 %vm3199_vm2, %v5416_v28  ;;  %v5390_v28 = vld [vmem:[#allocation2 + $0xa8] sm:$0xff]  ;;  %v5113_v44 = vpack.c.bf16 %v5085_v16, %v5084_v31 }
 0x297   : > { %v5419_v29 = vpack.c.bf16 %v5391_v41, %v5390_v28  ;;  %v5091_v41 = vld [vmem:[#allocation2 + $0x10f] sm:$0xff] }
 0x29c   : > { %v7527_v59 = vpop.f32.mrf.mxu0  ;;  %v7563_v40 = vpop.f32.mrf.mxu1  ;;  %7742 = vmatmul.mubr.msk.bf16.vlgmr.msra.gmra.mxu0 %vm3199_vm2, %v5111_v22  ;;  %v5114_v22 = vpack.c.bf16 %v5087_v1, %v5086_v48  ;;  %v5088_v1 = vld [vmem:[#allocation2 + $0xe7] sm:$0xff] }
 0x29d   : > { %7778 = vmatmul.mubr.msk.bf16.vlgmr.msra.gmra.mxu1 %vm3199_vm2, %v5417_v45  ;;  %v9899_v27 = vadd.f32 %v7563_v40, %v7527_v59  ;;  %7810 = vmatpush3.bf16.msra.mxu0 %v9803_v19  ;;  %v5420_v45 = vpack.c.bf16 %v5393_v26, %v5392_v60  ;;  %v5394_v26 = vld [vmem:[#allocation2 + $0xe8] sm:$0xff] }
 0x29e   : > { %7745 = vmatprep.mubr.msk.bf16.mxu0 %vm3199_vm2, %v5112_v39  ;;  %7781 = vmatprep.mubr.msk.bf16.mxu1 %vm3199_vm2, %v5418_v32  ;;  %v3505_v14 = vpop.f32.mrf.mxu0  ;;  %v3726_v13 = vpop.f32.mrf.mxu1  ;;  %v5089_v32 = vld [vmem:[#allocation2 + $0xef] sm:$0xff] }
 0x29f   : > { %7811 = vmatprep.subr.bf16.mxu0 %v7918_v52  ;;  %v9904_v33 = vadd.f32 %v3726_v13, %v3505_v14  ;;  %v5395_v14 = vld [vmem:[#allocation2 + $0xf0] sm:$0xff] }
 0x2a0   : > { %v7528_v46 = vpop.f32.mrf.mxu0  ;;  %v7564_v62 = vpop.f32.mrf.mxu1 }
 0x2a1   : > { %v9906_v20 = vadd.f32 %v7564_v62, %v7528_v46  ;;  %7812 = vmatpush3.bf16.msra.mxu0 %v7918_v52  ;;  %v5397_v46 = vld [vmem:[#allocation2 + $0x110] sm:$0xff] }
 0x2a2   : > { %v3508_v19 = vpop.f32.mrf.mxu0  ;;  %v3729_v38 = vpop.f32.mrf.mxu1 }
 0x2a3   : > { %v9908_v34 = vadd.f32 %v3729_v38, %v3508_v19  ;;  %v5115_v19 = vpack.c.bf16 %v5089_v32, %v5088_v1  ;;  %v5421_v38 = vpack.c.bf16 %v5395_v14, %v5394_v26  ;;  %v5093_v14 = vld [vmem:[#allocation2 + $0x12f] sm:$0xff] }
 0x2a4   : > { %v7531_v5 = vpop.f32.mrf.mxu0  ;;  %v7567_v39 = vpop.f32.mrf.mxu1  ;;  %7746 = vmatmul.mubr.msk.bf16.gmra.mxu0 %vm3199_vm2, %v5113_v44  ;;  %v5090_v44 = vld [vmem:[#allocation2 + $0x107] sm:$0xff]  ;;  %v5401_v1 = vld [vmem:[#allocation2 + $0x150] sm:$0xff] }
 0x2a5   : > { %7782 = vmatmul.mubr.msk.bf16.gmra.mxu1 %vm3199_vm2, %v5419_v29  ;;  %v9912_v56 = vadd.f32 %v7567_v39, %v7531_v5  ;;  %7749 = vmatprep.mubr.msk.bf16.mxu0 %vm3199_vm2, %v5114_v22  ;;  %v5396_v29 = vld [vmem:[#allocation2 + $0x108] sm:$0xff]  ;;  %v5116_v60 = vpack.c.bf16 %v5091_v41, %v5090_v44 }
 0x2a6   : > { %7785 = vmatprep.mubr.msk.bf16.mxu1 %vm3199_vm2, %v5420_v45  ;;  %v3521_v52 = vpop.f32.mrf.mxu0  ;;  %v3742_v59 = vpop.f32.mrf.mxu1  ;;  %v5422_v22 = vpack.c.bf16 %v5397_v46, %v5396_v29  ;;  %v5095_v46 = vld [vmem:[#allocation2 + $0x14f] sm:$0xff] }
 0x2a7   : > { %v9916_v40 = vadd.f32 %v3742_v59, %v3521_v52 }
 0x2a8   : > { %v7532_v13 = vpop.f32.mrf.mxu0  ;;  %v7568_v16 = vpop.f32.mrf.mxu1 }
 0x2a9   : > { %v9918_v62 = vadd.f32 %v7568_v16, %v7532_v13  ;;  %v5399_v13 = vld [vmem:[#allocation2 + $0x130] sm:$0xff] }
 0x2aa   : > { %v3524_v31 = vpop.f32.mrf.mxu0  ;;  %v3745_v28 = vpop.f32.mrf.mxu1 }
 0x2ab   : > { %v9920_v48 = vadd.f32 %v3745_v28, %v3524_v31  ;;  %v5092_v31 = vld [vmem:[#allocation2 + $0x127] sm:$0xff] }
 0x2ac   : > { %v7535_v45 = vpop.f32.mrf.mxu0  ;;  %v7571_v5 = vpop.f32.mrf.mxu1  ;;  %7750 = vmatmul.mubr.msk.bf16.gmra.mxu0 %vm3199_vm2, %v5115_v19  ;;  %v5398_v28 = vld [vmem:[#allocation2 + $0x128] sm:$0xff]  ;;  %v5117_v44 = vpack.c.bf16 %v5093_v14, %v5092_v31 }
 0x2ad   : > { %7786 = vmatmul.mubr.msk.bf16.gmra.mxu1 %vm3199_vm2, %v5421_v38  ;;  %v9924_v39 = vadd.f32 %v7571_v5, %v7535_v45  ;;  %7753 = vmatprep.mubr.msk.bf16.mxu0 %vm3199_vm2, %v5116_v60  ;;  %v5423_v29 = vpack.c.bf16 %v5399_v13, %v5398_v28  ;;  %v5094_v60 = vld [vmem:[#allocation2 + $0x147] sm:$0xff]  ;;  %v5097_v31 = vld [vmem:[#allocation2 + $0x16f] sm:$0xff] }
 0x2ae   : > { %7789 = vmatprep.mubr.msk.bf16.mxu1 %vm3199_vm2, %v5422_v22  ;;  %v3537_v52 = vpop.f32.mrf.mxu0  ;;  %v3758_v59 = vpop.f32.mrf.mxu1  ;;  %v5400_v22 = vld [vmem:[#allocation2 + $0x148] sm:$0xff]  ;;  %v5118_v5 = vpack.c.bf16 %v5095_v46, %v5094_v60  ;;  %v5403_v28 = vld [vmem:[#allocation2 + $0x170] sm:$0xff] }
 0x2af   : > { %v9928_v32 = vadd.f32 %v3758_v59, %v3537_v52  ;;  %v5424_v52 = vpack.c.bf16 %v5401_v1, %v5400_v22 }
 0x2b0   : > { %v7536_v16 = vpop.f32.mrf.mxu0  ;;  %v7572_v41 = vpop.f32.mrf.mxu1 }
 0x2b1   : > { %v9930_v26 = vadd.f32 %v7572_v41, %v7536_v16 }
 0x2b2   : > { %v3540_v19 = vpop.f32.mrf.mxu0  ;;  %v3761_v38 = vpop.f32.mrf.mxu1 }
 0x2b3   : > { %v9932_v45 = vadd.f32 %v3761_v38, %v3540_v19  ;;  %v5099_v19 = vld [vmem:[#allocation2 + $0x18f] sm:$0xff] }
 0x2b4   : > { %v7539_v59 = vpop.f32.mrf.mxu0  ;;  %7754 = vmatmul.mubr.msk.bf16.gmra.mxu0 %vm3199_vm2, %v5117_v44  ;;  %v5405_v38 = vld [vmem:[#allocation2 + $0x190] sm:$0xff]  ;;  %v5096_v44 = vld [vmem:[#allocation2 + $0x167] sm:$0xff] }
 0x2b5   : > { %v7575_v18 = vpop.f32.mrf.mxu1  ;;  %7790 = vmatmul.mubr.msk.bf16.gmra.mxu1 %vm3199_vm2, %v5423_v29  ;;  %7757 = vmatprep.mubr.msk.bf16.mxu0 %vm3199_vm2, %v5118_v5  ;;  %v5402_v29 = vld [vmem:[#allocation2 + $0x168] sm:$0xff] }
 0x2b6   : > { %v9936_v16 = vadd.f32 %v7575_v18, %v7539_v59  ;;  %7793 = vmatprep.mubr.msk.bf16.mxu1 %vm3199_vm2, %v5424_v52  ;;  %v3553_v14 = vpop.f32.mrf.mxu0  ;;  %v5119_v59 = vpack.c.bf16 %v5097_v31, %v5096_v44  ;;  %v5425_v5 = vpack.c.bf16 %v5403_v28, %v5402_v29  ;;  %v5404_v52 = vld [vmem:[#allocation2 + $0x188] sm:$0xff]  ;;  %v5407_v29 = vld [vmem:[#allocation2 + $0x1b0] sm:$0xff] }
 0x2b7   : > { %v3774_v13 = vpop.f32.mrf.mxu1  ;;  %v5101_v44 = vld [vmem:[#allocation2 + $0x1af] sm:$0xff] }
 0x2b8   : > { %v9940_v41 = vadd.f32 %v3774_v13, %v3553_v14  ;;  %v7540_v46 = vpop.f32.mrf.mxu0  ;;  %v5120_v14 = vpack.c.bf16 %v5099_v19, %v5098_v11  ;;  %v5426_v13 = vpack.c.bf16 %v5405_v38, %v5404_v52  ;;  %v5103_v38 = vld [vmem:[#allocation2 + $0x1cf] sm:$0xff] }
 0x2b9   : > { %v7576_v1 = vpop.f32.mrf.mxu1 }
 0x2ba   : > { %v9942_v60 = vadd.f32 %v7576_v1, %v7540_v46  ;;  %v3556_v18 = vpop.f32.mrf.mxu0 }
 0x2bb   : > { %v3777_v22 = vpop.f32.mrf.mxu1 }
 0x2bc   : > { %v9944_v50 = vadd.f32 %v3777_v22, %v3556_v18  ;;  %v7543_v12 = vpop.f32.mrf.mxu0  ;;  %7758 = vmatmul.mubr.msk.bf16.gmra.mxu0 %vm3199_vm2, %v5119_v59  ;;  %v5409_v18 = vld [vmem:[#allocation2 + $0x1d0] sm:$0xff]  ;;  %v5100_v59 = vld [vmem:[#allocation2 + $0x1a7] sm:$0xff] }
 0x2bd   : > { %v7579_v53 = vpop.f32.mrf.mxu1  ;;  %7794 = vmatmul.mubr.msk.bf16.gmra.mxu1 %vm3199_vm2, %v5425_v5  ;;  %7761 = vmatprep.mubr.msk.bf16.mxu0 %vm3199_vm2, %v5120_v14  ;;  %v5406_v5 = vld [vmem:[#allocation2 + $0x1a8] sm:$0xff]  ;;  %v5121_v52 = vpack.c.bf16 %v5101_v44, %v5100_v59 }
 0x2be   : > { %v9948_v46 = vadd.f32 %v7579_v53, %v7543_v12  ;;  %7797 = vmatprep.mubr.msk.bf16.mxu1 %vm3199_vm2, %v5426_v13  ;;  %v3569_v31 = vpop.f32.mrf.mxu0  ;;  %v5427_v14 = vpack.c.bf16 %v5407_v29, %v5406_v5  ;;  %v5408_v13 = vld [vmem:[#allocation2 + $0x1c8] sm:$0xff]  ;;  %v5411_v5 = vld [vmem:[#allocation2 + $0x1f0] sm:$0xff] }
 0x2bf   : > { %v3790_v28 = vpop.f32.mrf.mxu1  ;;  %v5105_v59 = vld [vmem:[#allocation2 + $0x1ef] sm:$0xff] }
 0x2c0   : > { %v9952_v1 = vadd.f32 %v3790_v28, %v3569_v31  ;;  %v7544_v11 = vpop.f32.mrf.mxu0  ;;  %v5122_v31 = vpack.c.bf16 %v5103_v38, %v5102_v47  ;;  %v5428_v28 = vpack.c.bf16 %v5409_v18, %v5408_v13 }
 0x2c1   : > { %v7580_v19 = vpop.f32.mrf.mxu1 }
 0x2c2   : > { %v9954_v22 = vadd.f32 %v7580_v19, %v7544_v11  ;;  %v3572_v53 = vpop.f32.mrf.mxu0 }
 0x2c3   : > { %v3793_v12 = vpop.f32.mrf.mxu1 }
 0x2c4   : > { %v9956_v4 = vadd.f32 %v3793_v12, %v3572_v53  ;;  %v7547_v55 = vpop.f32.mrf.mxu0  ;;  %7762 = vmatmul.mubr.msk.bf16.gmra.mxu0 %vm3199_vm2, %v5121_v52  ;;  %v5104_v53 = vld [vmem:[#allocation2 + $0x1e7] sm:$0xff] }
 0x2c5   : > { %v7583_v9 = vpop.f32.mrf.mxu1  ;;  %7798 = vmatmul.mubr.msk.bf16.gmra.mxu1 %vm3199_vm2, %v5427_v14  ;;  %7765 = vmatprep.mubr.msk.bf16.mxu0 %vm3199_vm2, %v5122_v31  ;;  %v5410_v12 = vld [vmem:[#allocation2 + $0x1e8] sm:$0xff] }
 0x2c6   : > { %v9960_v11 = vadd.f32 %v7583_v9, %v7547_v55  ;;  %7801 = vmatprep.mubr.msk.bf16.mxu1 %vm3199_vm2, %v5428_v28  ;;  %v3585_v44 = vpop.f32.mrf.mxu0  ;;  %v5123_v9 = vpack.c.bf16 %v5105_v59, %v5104_v53  ;;  %v5429_v55 = vpack.c.bf16 %v5411_v5, %v5410_v12  ;;  %v5414_v59 = vld [vmem:[#allocation2 + $0x228] sm:$0xff]  ;;  %v5415_v5 = vld [vmem:[#allocation2 + $0x230] sm:$0xff] }
 0x2c7   : > { %v3806_v29 = vpop.f32.mrf.mxu1 }
 0x2c8   : > { %v9964_v19 = vadd.f32 %v3806_v29, %v3585_v44  ;;  %v7548_v47 = vpop.f32.mrf.mxu0  ;;  %v5108_v44 = vld [vmem:[#allocation2 + $0x227] sm:$0xff] }
 0x2c9   : > { %v7584_v38 = vpop.f32.mrf.mxu1 }
 0x2ca   : > { %v9966_v18 = vadd.f32 %v7584_v38, %v7548_v47  ;;  %v3588_v52 = vpop.f32.mrf.mxu0  ;;  %v5109_v47 = vld [vmem:[#allocation2 + $0x22f] sm:$0xff] }
 0x2cb   : > { %v3809_v14 = vpop.f32.mrf.mxu1 }
 0x2cc   : > { %v9968_v13 = vadd.f32 %v3809_v14, %v3588_v52  ;;  %v7551_v31 = vpop.f32.mrf.mxu0  ;;  %7766 = vmatmul.mubr.msk.bf16.gmra.mxu0 %vm3199_vm2, %v5123_v9  ;;  %v5125_v9 = vpack.c.bf16 %v5109_v47, %v5108_v44 }
 0x2cd   : > { %v7587_v28 = vpop.f32.mrf.mxu1  ;;  %7802 = vmatmul.mubr.msk.bf16.gmra.mxu1 %vm3199_vm2, %v5429_v55  ;;  %7769 = vmatprep.mubr.msk.bf16.mxu0 %vm3199_vm2, %v9770_v17  ;;  %v5690_v55 = vld [vmem:[#allocation2 + $0x49] sm:$0xff] }
 0x2ce   : > { %v9972_v29 = vadd.f32 %v7587_v28, %v7551_v31  ;;  %7805 = vmatprep.mubr.msk.bf16.mxu1 %vm3199_vm2, %v9880_v43  ;;  %v3601_v38 = vpop.f32.mrf.mxu0  ;;  %v5431_v31 = vpack.c.bf16 %v5415_v5, %v5414_v59  ;;  %v5722_v43 = vpack.c.bf16 %v5691_v23, %v5690_v55  ;;  %v5692_v5 = vld [vmem:[#allocation2 + $0x69] sm:$0xff]  ;;  %v5695_v23 = vld [vmem:[#allocation2 + $0x91] sm:$0xff] }
 0x2cf   : > { %v3822_v53 = vpop.f32.mrf.mxu1 }
 0x2d0   : > { %v9978_v12 = vadd.f32 %v3822_v53, %v3601_v38  ;;  %v7552_v52 = vpop.f32.mrf.mxu0  ;;  %v5693_v53 = vld [vmem:[#allocation2 + $0x71] sm:$0xff] }
 0x2d1   : > { %v7588_v14 = vpop.f32.mrf.mxu1  ;;  %v5723_v35 = vpack.c.bf16 %v5693_v53, %v5692_v5 }
 0x2d2   : > { %v9980_v28 = vadd.f32 %v7588_v14, %v7552_v52  ;;  %v3604_v8 = vpop.f32.mrf.mxu0  ;;  %v5694_v14 = vld [vmem:[#allocation2 + $0x89] sm:$0xff] }
 0x2d3   : > { %v3825_v17 = vpop.f32.mrf.mxu1 }
 0x2d4   : > { %v9982_v36 = vadd.f32 %v3825_v17, %v3604_v8  ;;  %v7555_v30 = vpop.f32.mrf.mxu0  ;;  %7770 = vmatmul.mubr.msk.bf16.gmra.mxu0 %vm3199_vm2, %v5125_v9 }
 0x2d5   : > { %v7591_v3 = vpop.f32.mrf.mxu1  ;;  %7806 = vmatmul.mubr.msk.bf16.gmra.mxu1 %vm3199_vm2, %v5431_v31  ;;  %7813 = vmatprep.mubr.msk.bf16.mxu0 %vm3199_vm2, %v5722_v43 }
 0x2d6   : > { %v9986_v38 = vadd.f32 %v7591_v3, %v7555_v30  ;;  %v3617_v44 = vpop.f32.mrf.mxu0  ;;  %v5724_v3 = vpack.c.bf16 %v5695_v23, %v5694_v14  ;;  %v5699_v14 = vld [vmem:[#allocation2 + $0xd1] sm:$0xff] }
 0x2d7   : > { %v3838_v47 = vpop.f32.mrf.mxu1 }
 0x2d8   : > { %v9989_v59 = vadd.f32 %v3838_v47, %v3617_v44  ;;  %v7556_v52 = vpop.f32.mrf.mxu0 }
 0x2d9   : > { %v7592_v8 = vpop.f32.mrf.mxu1 }
 0x2da   : > { %v9991_v55 = vadd.f32 %v7592_v8, %v7556_v52  ;;  %v3620_v17 = vpop.f32.mrf.mxu0  ;;  %v5696_v8 = vld [vmem:[#allocation2 + $0xa9] sm:$0xff] }
 0x2db   : > { %v3841_v9 = vpop.f32.mrf.mxu1 }
 0x2dc   : > { %v9993_v31 = vadd.f32 %v3841_v9, %v3620_v17  ;;  %v7599_v30 = vpop.f32.mrf.mxu0  ;;  %7814 = vmatmul.mubr.msk.bf16.vlgmr.msra.gmra.mxu0 %vm3199_vm2, %v5723_v35  ;;  %v5698_v17 = vld [vmem:[#allocation2 + $0xc9] sm:$0xff] }
 0x2dd   : > { %v7635_v43 = vpop.f32.mrf.mxu1  ;;  %v4129_v44 = vadd.f32 %v7599_v30, %v9899_v27  ;;  %7817 = vmatprep.mubr.msk.bf16.mxu0 %vm3199_vm2, %v5724_v3  ;;  %v5725_v30 = vpack.c.bf16 %v5697_v7, %v5696_v8  ;;  %v5700_v8 = vld [vmem:[#allocation2 + $0xe9] sm:$0xff] }
 0x2de   : > { %v4000_v47 = vpop.f32.mrf.mxu0 }
 0x2df   : > { %v4306_v54 = vpop.f32.mrf.mxu1  ;;  %v9998_v25 = vadd.f32 %v7635_v43, %v4129_v44  ;;  %v4127_v52 = vadd.f32 %v4000_v47, %v9904_v33  ;;  %v5726_v44 = vpack.c.bf16 %v5699_v14, %v5698_v17  ;;  %v5702_v17 = vld [vmem:[#allocation2 + $0x109] sm:$0xff]  ;;  %v5703_v14 = vld [vmem:[#allocation2 + $0x111] sm:$0xff] }
 0x2e0   : > { %v7600_v5 = vpop.f32.mrf.mxu0 }
 0x2e1   : > { %v7636_v53 = vpop.f32.mrf.mxu1  ;;  %v10001_v23 = vadd.f32 %v4306_v54, %v4127_v52  ;;  %v4130_v35 = vadd.f32 %v7600_v5, %v9906_v20  ;;  %v5701_v5 = vld [vmem:[#allocation2 + $0xf1] sm:$0xff] }
 0x2e2   : > { %v4003_v9 = vpop.f32.mrf.mxu0 }
 0x2e3   : > { %v4309_v27 = vpop.f32.mrf.mxu1  ;;  %v10004_v3 = vadd.f32 %v7636_v53, %v4130_v35  ;;  %v4128_v43 = vadd.f32 %v4003_v9, %v9908_v34 }
 0x2e4   : > { %v7603_v51 = vpop.f32.mrf.mxu0  ;;  %7818 = vmatmul.mubr.msk.bf16.gmra.mxu0 %vm3199_vm2, %v5725_v30 }
 0x2e5   : > { %v7639_v33 = vpop.f32.mrf.mxu1  ;;  %v10008_v47 = vadd.f32 %v4309_v27, %v4128_v43  ;;  %v4133_v49 = vadd.f32 %v7603_v51, %v9912_v56  ;;  %7821 = vmatprep.mubr.msk.bf16.mxu0 %vm3199_vm2, %v5726_v44  ;;  %v5727_v56 = vpack.c.bf16 %v5701_v5, %v5700_v8  ;;  %v5728_v43 = vpack.c.bf16 %v5703_v14, %v5702_v17  ;;  %v5704_v5 = vld [vmem:[#allocation2 + $0x129] sm:$0xff]  ;;  %v5707_v14 = vld [vmem:[#allocation2 + $0x151] sm:$0xff] }
 0x2e6   : > { %v4016_v54 = vpop.f32.mrf.mxu0  ;;  %v5706_v17 = vld [vmem:[#allocation2 + $0x149] sm:$0xff] }
 0x2e7   : > { %v4322_v20 = vpop.f32.mrf.mxu1  ;;  %v10012_v52 = vadd.f32 %v7639_v33, %v4133_v49  ;;  %v4131_v7 = vadd.f32 %v4016_v54, %v9916_v40 }
 0x2e8   : > { %v7604_v34 = vpop.f32.mrf.mxu0 }
 0x2e9   : > { %v7640_v53 = vpop.f32.mrf.mxu1  ;;  %v10015_v35 = vadd.f32 %v4322_v20, %v4131_v7  ;;  %v4134_v9 = vadd.f32 %v7604_v34, %v9918_v62  ;;  %v5705_v34 = vld [vmem:[#allocation2 + $0x131] sm:$0xff] }
 0x2ea   : > { %v4019_v27 = vpop.f32.mrf.mxu0 }
 0x2eb   : > { %v4325_v51 = vpop.f32.mrf.mxu1  ;;  %v10018_v30 = vadd.f32 %v7640_v53, %v4134_v9  ;;  %v4132_v49 = vadd.f32 %v4019_v27, %v9920_v48 }
 0x2ec   : > { %v7607_v44 = vpop.f32.mrf.mxu0  ;;  %7822 = vmatmul.mubr.msk.bf16.gmra.mxu0 %vm3199_vm2, %v5727_v56  ;;  %v5729_v56 = vpack.c.bf16 %v5705_v34, %v5704_v5  ;;  %v5708_v34 = vld [vmem:[#allocation2 + $0x169] sm:$0xff] }
 0x2ed   : > { %v7643_v40 = vpop.f32.mrf.mxu1  ;;  %v10022_v33 = vadd.f32 %v4325_v51, %v4132_v49  ;;  %v4137_v54 = vadd.f32 %v7607_v44, %v9924_v39  ;;  %7825 = vmatprep.mubr.msk.bf16.mxu0 %vm3199_vm2, %v5728_v43  ;;  %v5730_v44 = vpack.c.bf16 %v5707_v14, %v5706_v17  ;;  %v5710_v17 = vld [vmem:[#allocation2 + $0x189] sm:$0xff]  ;;  %v5711_v14 = vld [vmem:[#allocation2 + $0x191] sm:$0xff] }
 0x2ee   : > { %v4032_v20 = vpop.f32.mrf.mxu0 }
 0x2ef   : > { %v4338_v62 = vpop.f32.mrf.mxu1  ;;  %v10026_v7 = vadd.f32 %v7643_v40, %v4137_v54  ;;  %v4135_v8 = vadd.f32 %v4032_v20, %v9928_v32 }
 0x2f0   : > { %v7608_v48 = vpop.f32.mrf.mxu0 }
 0x2f1   : > { %v7644_v53 = vpop.f32.mrf.mxu1  ;;  %v10029_v9 = vadd.f32 %v4338_v62, %v4135_v8  ;;  %v4138_v27 = vadd.f32 %v7608_v48, %v9930_v26  ;;  %v5709_v48 = vld [vmem:[#allocation2 + $0x171] sm:$0xff] }
 0x2f2   : > { %v4035_v51 = vpop.f32.mrf.mxu0 }
 0x2f3   : > { %v4341_v39 = vpop.f32.mrf.mxu1  ;;  %v10032_v49 = vadd.f32 %v7644_v53, %v4138_v27  ;;  %v4136_v43 = vadd.f32 %v4035_v51, %v9932_v45 }
 0x2f4   : > { %v7611_v40 = vpop.f32.mrf.mxu0  ;;  %7826 = vmatmul.mubr.msk.bf16.gmra.mxu0 %vm3199_vm2, %v5729_v56  ;;  %v5731_v56 = vpack.c.bf16 %v5709_v48, %v5708_v34  ;;  %v5712_v48 = vld [vmem:[#allocation2 + $0x1a9] sm:$0xff] }
 0x2f5   : > { %v7647_v32 = vpop.f32.mrf.mxu1  ;;  %v10036_v54 = vadd.f32 %v4341_v39, %v4136_v43  ;;  %v4141_v20 = vadd.f32 %v7611_v40, %v9936_v16  ;;  %7829 = vmatprep.mubr.msk.bf16.mxu0 %vm3199_vm2, %v5730_v44  ;;  %v5732_v40 = vpack.c.bf16 %v5711_v14, %v5710_v17  ;;  %v5714_v17 = vld [vmem:[#allocation2 + $0x1c9] sm:$0xff]  ;;  %v5715_v14 = vld [vmem:[#allocation2 + $0x1d1] sm:$0xff] }
 0x2f6   : > { %v4048_v62 = vpop.f32.mrf.mxu0 }
 0x2f7   : > { %v4354_v26 = vpop.f32.mrf.mxu1  ;;  %v10040_v8 = vadd.f32 %v7647_v32, %v4141_v20  ;;  %v4139_v5 = vadd.f32 %v4048_v62, %v9940_v41 }
 0x2f8   : > { %v7612_v45 = vpop.f32.mrf.mxu0 }
 0x2f9   : > { %v7648_v53 = vpop.f32.mrf.mxu1  ;;  %v10043_v27 = vadd.f32 %v4354_v26, %v4139_v5  ;;  %v4142_v51 = vadd.f32 %v7612_v45, %v9942_v60  ;;  %v5713_v45 = vld [vmem:[#allocation2 + $0x1b1] sm:$0xff] }
 0x2fa   : > { %v4051_v39 = vpop.f32.mrf.mxu0 }
 0x2fb   : > { %v4357_v16 = vpop.f32.mrf.mxu1  ;;  %v10046_v43 = vadd.f32 %v7648_v53, %v4142_v51  ;;  %v4140_v44 = vadd.f32 %v4051_v39, %v9944_v50 }
 0x2fc   : > { %v7615_v32 = vpop.f32.mrf.mxu0  ;;  %7830 = vmatmul.mubr.msk.bf16.gmra.mxu0 %vm3199_vm2, %v5731_v56  ;;  %v5733_v56 = vpack.c.bf16 %v5713_v45, %v5712_v48  ;;  %v5716_v45 = vld [vmem:[#allocation2 + $0x1e9] sm:$0xff] }
 0x2fd   : > { %v7651_v41 = vpop.f32.mrf.mxu1  ;;  %v10050_v20 = vadd.f32 %v4357_v16, %v4140_v44  ;;  %v4145_v62 = vadd.f32 %v7615_v32, %v9948_v46  ;;  %7833 = vmatprep.mubr.msk.bf16.mxu0 %vm3199_vm2, %v5732_v40  ;;  %v5734_v32 = vpack.c.bf16 %v5715_v14, %v5714_v17 }
 0x2fe   : > { %v4064_v26 = vpop.f32.mrf.mxu0 }
 0x2ff   : > { %v4370_v60 = vpop.f32.mrf.mxu1  ;;  %v10054_v5 = vadd.f32 %v7651_v41, %v4145_v62  ;;  %v4143_v34 = vadd.f32 %v4064_v26, %v9952_v1 }
 0x300   : > { %v7616_v50 = vpop.f32.mrf.mxu0 }
 0x301   : > { %v7652_v53 = vpop.f32.mrf.mxu1  ;;  %v10057_v51 = vadd.f32 %v4370_v60, %v4143_v34  ;;  %v4146_v39 = vadd.f32 %v7616_v50, %v9954_v22  ;;  %v5717_v50 = vld [vmem:[#allocation2 + $0x1f1] sm:$0xff] }
 0x302   : > { %v4067_v16 = vpop.f32.mrf.mxu0 }
 0x303   : > { %v4373_v46 = vpop.f32.mrf.mxu1  ;;  %v10060_v44 = vadd.f32 %v7652_v53, %v4146_v39  ;;  %v4144_v40 = vadd.f32 %v4067_v16, %v9956_v4 }
 0x304   : > { %v7619_v41 = vpop.f32.mrf.mxu0  ;;  %7834 = vmatmul.mubr.msk.bf16.gmra.mxu0 %vm3199_vm2, %v5733_v56 }
 0x305   : > { %v7655_v1 = vpop.f32.mrf.mxu1  ;;  %v10064_v62 = vadd.f32 %v4373_v46, %v4144_v40  ;;  %v4149_v26 = vadd.f32 %v7619_v41, %v9960_v11  ;;  %7837 = vmatprep.mubr.msk.bf16.mxu0 %vm3199_vm2, %v5734_v32  ;;  %v5735_v46 = vpack.c.bf16 %v5717_v50, %v5716_v45 }
 0x306   : > { %v4080_v60 = vpop.f32.mrf.mxu0 }
 0x307   : > { %v4386_v22 = vpop.f32.mrf.mxu1  ;;  %v10068_v34 = vadd.f32 %v7655_v1, %v4149_v26  ;;  %v4147_v48 = vadd.f32 %v4080_v60, %v9964_v19  ;;  %v5720_v1 = vld [vmem:[#allocation2 + $0x229] sm:$0xff] }
 0x308   : > { %v7620_v4 = vpop.f32.mrf.mxu0 }
 0x309   : > { %v7656_v53 = vpop.f32.mrf.mxu1  ;;  %v10071_v17 = vadd.f32 %v4386_v22, %v4147_v48  ;;  %v4150_v14 = vadd.f32 %v7620_v4, %v9966_v18  ;;  %v5721_v18 = vld [vmem:[#allocation2 + $0x231] sm:$0xff] }
 0x30a   : > { %v4083_v39 = vpop.f32.mrf.mxu0  ;;  %v5737_v50 = vpack.c.bf16 %v5721_v18, %v5720_v1 }
 0x30b   : > { %v4389_v16 = vpop.f32.mrf.mxu1  ;;  %v10074_v11 = vadd.f32 %v7656_v53, %v4150_v14  ;;  %v4148_v56 = vadd.f32 %v4083_v39, %v9968_v13 }
 0x30c   : > { %v7623_v40 = vpop.f32.mrf.mxu0  ;;  %7838 = vmatmul.mubr.msk.bf16.gmra.mxu0 %vm3199_vm2, %v5735_v46 }
 0x30d   : > { %v7659_v32 = vpop.f32.mrf.mxu1  ;;  %v10078_v19 = vadd.f32 %v4389_v16, %v4148_v56  ;;  %v4153_v41 = vadd.f32 %v7623_v40, %v9972_v29  ;;  %7841 = vmatprep.mubr.msk.bf16.mxu0 %vm3199_vm2, %v9882_v58 }
 0x30e   : > { %v4096_v26 = vpop.f32.mrf.mxu0 }
 0x30f   : > { %v4402_v60 = vpop.f32.mrf.mxu1  ;;  %v10083_v22 = vadd.f32 %v7659_v32, %v4153_v41  ;;  %v4151_v48 = vadd.f32 %v4096_v26, %v9978_v12 }
 0x310   : > { %v7624_v13 = vpop.f32.mrf.mxu0 }
 0x311   : > { %v7660_v45 = vpop.f32.mrf.mxu1  ;;  %v10086_v4 = vadd.f32 %v4402_v60, %v4151_v48  ;;  %v4154_v53 = vadd.f32 %v7624_v13, %v9980_v28 }
 0x312   : > { %v4099_v14 = vpop.f32.mrf.mxu0 }
 0x313   : > { %v4405_v29 = vpop.f32.mrf.mxu1  ;;  %v10089_v39 = vadd.f32 %v7660_v45, %v4154_v53  ;;  %v4152_v58 = vadd.f32 %v4099_v14, %v9982_v36 }
 0x314   : > { %v7627_v16 = vpop.f32.mrf.mxu0  ;;  %7842 = vmatmul.mubr.msk.bf16.gmra.mxu0 %vm3199_vm2, %v5737_v50 }
 0x315   : > { %v7663_v46 = vpop.f32.mrf.mxu1  ;;  %v10093_v56 = vadd.f32 %v4405_v29, %v4152_v58  ;;  %v4157_v12 = vadd.f32 %v7627_v16, %v9986_v38 }
 0x316   : > { %v4112_v40 = vpop.f32.mrf.mxu0 }
 0x317   : > { %v4418_v32 = vpop.f32.mrf.mxu1  ;;  %v10096_v41 = vadd.f32 %v7663_v46, %v4157_v12  ;;  %v4155_v28 = vadd.f32 %v4112_v40, %v9989_v59 }
 0x318   : > { %v7628_v1 = vpop.f32.mrf.mxu0 }
 0x319   : > { %v7664_v18 = vpop.f32.mrf.mxu1  ;;  %v10099_v26 = vadd.f32 %v4418_v32, %v4155_v28  ;;  %v4158_v36 = vadd.f32 %v7628_v1, %v9991_v55 }
 0x31a   : > { %v4115_v60 = vpop.f32.mrf.mxu0 }
 0x31b   : > { %v4421_v48 = vpop.f32.mrf.mxu1  ;;  %v10102_v13 = vadd.f32 %v7664_v18, %v4158_v36  ;;  %v4156_v45 = vadd.f32 %v4115_v60, %v9993_v31 }
 0x31c   : > { %v7671_v50 = vpop.f32.mrf.mxu0 }
 0x31d   : > { %v10105_v38 = vpop.f32.mrf.mxu1  ;;  %v10107_v53 = vadd.f32 %v4421_v48, %v4156_v45  ;;  %v10110_v14 = vadd.f32 %v7671_v50, %v9998_v25 }
 0x31e   : > { %v4612_v59 = vpop.f32.mrf.mxu0 }
 0x31f   : > { %v10112_v29 = vpop.f32.mrf.mxu1  ;;  %v10115_v58 = vadd.f32 %v4612_v59, %v10001_v23 }
 0x320   : > { %v7672_v55 = vpop.f32.mrf.mxu0 }
 0x321   : > { %v10117_v16 = vpop.f32.mrf.mxu1  ;;  %v10120_v46 = vadd.f32 %v7672_v55, %v10004_v3 }
 0x322   : > { %v4615_v31 = vpop.f32.mrf.mxu0 }
 0x323   : > { %v10122_v12 = vpop.f32.mrf.mxu1  ;;  %v10125_v40 = vadd.f32 %v4615_v31, %v10008_v47 }
 0x324   : > { %v7675_v25 = vpop.f32.mrf.mxu0 }
 0x325   : > { %v10127_v32 = vpop.f32.mrf.mxu1  ;;  %v10130_v28 = vadd.f32 %v7675_v25, %v10012_v52 }
 0x326   : > { %v4628_v23 = vpop.f32.mrf.mxu0 }
 0x327   : > { %v10132_v1 = vpop.f32.mrf.mxu1  ;;  %v10135_v18 = vadd.f32 %v4628_v23, %v10015_v35 }
 0x328   : > { %v7676_v3 = vpop.f32.mrf.mxu0 }
 0x329   : > { %v10137_v36 = vpop.f32.mrf.mxu1  ;;  %v10140_v60 = vadd.f32 %v7676_v3, %v10018_v30 }
 0x32a   : > { %v4631_v47 = vpop.f32.mrf.mxu0 }
 0x32b   : > { %v10142_v48 = vpop.f32.mrf.mxu1  ;;  %v10145_v45 = vadd.f32 %v4631_v47, %v10022_v33 }
 0x32c   : > { %v7679_v52 = vpop.f32.mrf.mxu0 }
 0x32d   : > { %v10147_v50 = vpop.f32.mrf.mxu1  ;;  %v10150_v59 = vadd.f32 %v7679_v52, %v10026_v7 }
 0x32e   : > { %v4644_v35 = vpop.f32.mrf.mxu0 }
 0x32f   : > { %v10152_v55 = vpop.f32.mrf.mxu1  ;;  %v10155_v31 = vadd.f32 %v4644_v35, %v10029_v9 }
 0x330   : > { %11108 = vst [vmem:[#allocation40_spill] sm:$0xff] %v10152_v55  ;;  %v7680_v30 = vpop.f32.mrf.mxu0 }
 0x331   : > { %v10157_v25 = vpop.f32.mrf.mxu1  ;;  %v10160_v23 = vadd.f32 %v7680_v30, %v10032_v49 }
 0x332   : > { %11109 = vst [vmem:[#allocation42_spill] sm:$0xff] %v10157_v25  ;;  %v4647_v33 = vpop.f32.mrf.mxu0 }
 0x333   : > { %v10162_v3 = vpop.f32.mrf.mxu1  ;;  %v10165_v47 = vadd.f32 %v4647_v33, %v10036_v54 }
 0x334   : > { %11110 = vst [vmem:[#allocation37_spill] sm:$0xff] %v10162_v3  ;;  %v7683_v7 = vpop.f32.mrf.mxu0 }
 0x335   : > { %v10167_v52 = vpop.f32.mrf.mxu1  ;;  %v10170_v55 = vadd.f32 %v7683_v7, %v10040_v8 }
 0x336   : > { %11111 = vst [vmem:[#allocation10_spill] sm:$0xff] %v10167_v52  ;;  %v4660_v9 = vpop.f32.mrf.mxu0 }
 0x337   : > { %v10172_v35 = vpop.f32.mrf.mxu1  ;;  %v10175_v25 = vadd.f32 %v4660_v9, %v10043_v27 }
 0x338   : > { %11112 = vst [vmem:[#allocation44_spill] sm:$0xff] %v10172_v35  ;;  %v7684_v49 = vpop.f32.mrf.mxu0 }
 0x339   : > { %v10177_v30 = vpop.f32.mrf.mxu1  ;;  %v10180_v3 = vadd.f32 %v7684_v49, %v10046_v43 }
 0x33a   : > { %11113 = vst [vmem:[#allocation7_spill] sm:$0xff] %v10177_v30  ;;  %v4663_v54 = vpop.f32.mrf.mxu0 }
 0x33b   : > { %v10182_v33 = vpop.f32.mrf.mxu1  ;;  %v10185_v52 = vadd.f32 %v4663_v54, %v10050_v20 }
 0x33c   : > { %11114 = vst [vmem:[#allocation39_spill] sm:$0xff] %v10182_v33  ;;  %v7687_v8 = vpop.f32.mrf.mxu0 }
 0x33d   : > { %v10187_v7 = vpop.f32.mrf.mxu1  ;;  %v10190_v35 = vadd.f32 %v7687_v8, %v10054_v5 }
 0x33e   : > { %11115 = vst [vmem:[#allocation41_spill] sm:$0xff] %v10187_v7  ;;  %v4676_v27 = vpop.f32.mrf.mxu0 }
 0x33f   : > { %v10192_v9 = vpop.f32.mrf.mxu1  ;;  %v10195_v30 = vadd.f32 %v4676_v27, %v10057_v51 }
 0x340   : > { %11116 = vst [vmem:[#allocation24_spill] sm:$0xff] %v10192_v9  ;;  %v7688_v43 = vpop.f32.mrf.mxu0 }
 0x341   : > { %v10197_v49 = vpop.f32.mrf.mxu1  ;;  %v10200_v33 = vadd.f32 %v7688_v43, %v10060_v44 }
 0x342   : > { %11117 = vst [vmem:[#allocation43_spill] sm:$0xff] %v10197_v49  ;;  %v4679_v20 = vpop.f32.mrf.mxu0 }
 0x343   : > { %v10202_v54 = vpop.f32.mrf.mxu1  ;;  %v10205_v7 = vadd.f32 %v4679_v20, %v10064_v62 }
 0x344   : > { %11118 = vst [vmem:[#allocation12_spill] sm:$0xff] %v10202_v54  ;;  %v7691_v5 = vpop.f32.mrf.mxu0 }
 0x345   : > { %v10207_v8 = vpop.f32.mrf.mxu1  ;;  %v10210_v9 = vadd.f32 %v7691_v5, %v10068_v34 }
 0x346   : > { %11119 = vst [vmem:[#allocation46_spill] sm:$0xff] %v10207_v8  ;;  %v4692_v51 = vpop.f32.mrf.mxu0 }
 0x347   : > { %v10212_v27 = vpop.f32.mrf.mxu1  ;;  %v10215_v49 = vadd.f32 %v4692_v51, %v10071_v17 }
 0x348   : > { %11120 = vst [vmem:[#allocation13_spill] sm:$0xff] %v10212_v27  ;;  %v7692_v44 = vpop.f32.mrf.mxu0 }
 0x349   : > { %v10217_v43 = vpop.f32.mrf.mxu1  ;;  %v10220_v54 = vadd.f32 %v7692_v44, %v10074_v11 }
 0x34a   : > { %11121 = vst [vmem:[#allocation48_spill] sm:$0xff] %v10217_v43  ;;  %v4695_v62 = vpop.f32.mrf.mxu0 }
 0x34b   : > { %v10222_v20 = vpop.f32.mrf.mxu1  ;;  %v10225_v8 = vadd.f32 %v4695_v62, %v10078_v19 }
 0x34c   : > { %11122 = vst [vmem:[#allocation45_spill] sm:$0xff] %v10222_v20  ;;  %v7695_v34 = vpop.f32.mrf.mxu0 }
 0x34d   : > { %v10227_v5 = vpop.f32.mrf.mxu1  ;;  %v10230_v27 = vadd.f32 %v7695_v34, %v10083_v22 }
 0x34e   : > { %11123 = vst [vmem:[#allocation47_spill] sm:$0xff] %v10227_v5  ;;  %v4708_v17 = vpop.f32.mrf.mxu0 }
 0x34f   : > { %v10232_v51 = vpop.f32.mrf.mxu1  ;;  %v10235_v43 = vadd.f32 %v4708_v17, %v10086_v4 }
 0x350   : > { %11124 = vst [vmem:[#allocation50_spill] sm:$0xff] %v10232_v51  ;;  %v7696_v11 = vpop.f32.mrf.mxu0 }
 0x351   : > { %11125 = vst [vmem:[#allocation15_spill] sm:$0xff] %v10235_v43  ;;  %v10237_v44 = vpop.f32.mrf.mxu1  ;;  %v10240_v20 = vadd.f32 %v7696_v11, %v10089_v39 }
 0x352   : > { %11126 = vst [vmem:[#allocation52_spill] sm:$0xff] %v10237_v44  ;;  %v4711_v19 = vpop.f32.mrf.mxu0 }
 0x353   : > { %11127 = vst [vmem:[#allocation17_spill] sm:$0xff] %v10240_v20  ;;  %v10242_v62 = vpop.f32.mrf.mxu1  ;;  %v10245_v5 = vadd.f32 %v4711_v19, %v10093_v56 }
 0x354   : > { %11128 = vst [vmem:[#allocation54_spill] sm:$0xff] %v10242_v62  ;;  %v7699_v22 = vpop.f32.mrf.mxu0 }
 0x355   : > { %11129 = vst [vmem:[#allocation18_spill] sm:$0xff] %v10245_v5  ;;  %v10247_v34 = vpop.f32.mrf.mxu1  ;;  %v10250_v51 = vadd.f32 %v7699_v22, %v10096_v41 }
 0x356   : > { %11130 = vst [vmem:[#allocation56_spill] sm:$0xff] %v10247_v34  ;;  %v4724_v4 = vpop.f32.mrf.mxu0 }
 0x357   : > { %11131 = vst [vmem:[#allocation49_spill] sm:$0xff] %v10250_v51  ;;  %v10252_v17 = vpop.f32.mrf.mxu1  ;;  %v10255_v44 = vadd.f32 %v4724_v4, %v10099_v26 }
 0x358   : > { %11132 = vst [vmem:[#allocation51_spill] sm:$0xff] %v10252_v17  ;;  %v7700_v39 = vpop.f32.mrf.mxu0 }
 0x359   : > { %11133 = vst [vmem:[#allocation53_spill] sm:$0xff] %v10255_v44  ;;  %v10257_v11 = vpop.f32.mrf.mxu1  ;;  %v10260_v62 = vadd.f32 %v7700_v39, %v10102_v13 }
 0x35a   : > { %11134 = vst [vmem:[#allocation55_spill] sm:$0xff] %v10257_v11  ;;  %v4727_v56 = vpop.f32.mrf.mxu0 }
 0x35b   : > { %11135 = vst [vmem:[#allocation19_spill] sm:$0xff] %v10260_v62  ;;  %v10262_v19 = vpop.f32.mrf.mxu1  ;;  %v10265_v34 = vadd.f32 %v4727_v56, %v10107_v53 }
 0x35c   : > { %11136 = vst [vmem:[#allocation59_spill] sm:$0xff] %v10262_v19  ;;  %v10267_v41 = vpop.f32.mrf.mxu0 }
 0x35d   : > { %11137 = vst [vmem:[#allocation20_spill] sm:$0xff] %v10265_v34  ;;  %v10269_v22 = vpop.f32.mrf.mxu1 }
 0x35e   : > { %v10271_v17 = vpop.f32.mrf.mxu0 }
 0x35f   : > { %v10273_v26 = vpop.f32.mrf.mxu1 }
 0x360   : > { %v10275_v4 = vpop.f32.mrf.mxu0 }
 0x361   : > { %v10279_v13 = vpop.f32.mrf.mxu1 }
 0x362   : > { %v10277_v11 = vpop.f32.mrf.mxu0 }
 0x363   : > { %v10285_v53 = vpop.f32.mrf.mxu1 }
 0x364   : > { %v10281_v39 = vpop.f32.mrf.mxu0  ;;  %11140 = vst [vmem:[#allocation22_spill] sm:$0xff] %v10285_v53 }
 0x365   : > { %11138 = vst [vmem:[#allocation61_spill] sm:$0xff] %v10281_v39  ;;  %v10291_v62 = vpop.f32.mrf.mxu1 }
 0x366   : > { %v10283_v19 = vpop.f32.mrf.mxu0  ;;  %11143 = vst [vmem:[#allocation60_spill] sm:$0xff] %v10291_v62 }
 0x367   : > { %11139 = vst [vmem:[#allocation57_spill] sm:$0xff] %v10283_v19  ;;  %v10297_v5 = vpop.f32.mrf.mxu1 }
 0x368   : > { %v10287_v56 = vpop.f32.mrf.mxu0  ;;  %11146 = vst [vmem:[#allocation63_spill] sm:$0xff] %v10297_v5 }
 0x369   : > { %11141 = vst [vmem:[#allocation21_spill] sm:$0xff] %v10287_v56  ;;  %v10303_v39 = vpop.f32.mrf.mxu1 }
 0x36a   : > { %v10289_v34 = vpop.f32.mrf.mxu0  ;;  %11149 = vst [vmem:[#allocation67_spill] sm:$0xff] %v10303_v39 }
 0x36b   : > { %11142 = vst [vmem:[#allocation58_spill] sm:$0xff] %v10289_v34  ;;  %v10309_v56 = vpop.f32.mrf.mxu1 }
 0x36c   : > { %v10293_v44 = vpop.f32.mrf.mxu0  ;;  %11152 = vst [vmem:[#allocation70_spill] sm:$0xff] %v10309_v56 }
 0x36d   : > { %11144 = vst [vmem:[#allocation62_spill] sm:$0xff] %v10293_v44  ;;  %v10315_v44 = vpop.f32.mrf.mxu1 }
 0x36e   : > { %v10295_v51 = vpop.f32.mrf.mxu0  ;;  %11155 = vst [vmem:[#allocation73_spill] sm:$0xff] %v10315_v44 }
 0x36f   : > { %11145 = vst [vmem:[#allocation64_spill] sm:$0xff] %v10295_v51 }
 0x370   : > { %v10299_v20 = vpop.f32.mrf.mxu0 }
 0x371   : > { %11147 = vst [vmem:[#allocation65_spill] sm:$0xff] %v10299_v20  ;;  %v10321_v20 = vpop.f32.mrf.mxu1 }
 0x372   : > { %v10301_v43 = vpop.f32.mrf.mxu0 }
 0x373   : > { %11148 = vst [vmem:[#allocation66_spill] sm:$0xff] %v10301_v43 }
 0x374   : > { %v10305_v19 = vpop.f32.mrf.mxu0 }
 0x375   : > { %11150 = vst [vmem:[#allocation68_spill] sm:$0xff] %v10305_v19  ;;  %v10327_v19 = vpop.f32.mrf.mxu1 }
 0x376   : > { %v10307_v53 = vpop.f32.mrf.mxu0 }
 0x377   : > { %11151 = vst [vmem:[#allocation69_spill] sm:$0xff] %v10307_v53 }
 0x378   : > { %v10311_v34 = vpop.f32.mrf.mxu0 }
 0x379   : > { %11153 = vst [vmem:[#allocation71_spill] sm:$0xff] %v10311_v34  ;;  %v10333_v34 = vpop.f32.mrf.mxu1 }
 0x37a   : > { %v10313_v62 = vpop.f32.mrf.mxu0 }
 0x37b   : > { %11154 = vst [vmem:[#allocation72_spill] sm:$0xff] %v10313_v62 }
 0x37c   : > { %v10317_v51 = vpop.f32.mrf.mxu0 }
 0x37d   : > { %11156 = vst [vmem:[#allocation74_spill] sm:$0xff] %v10317_v51  ;;  %v10339_v51 = vpop.f32.mrf.mxu1 }
 0x37e   : > { %v10319_v5 = vpop.f32.mrf.mxu0  ;;  %11164 = vst [vmem:[#allocation82_spill] sm:$0xff] %v10339_v51 }
 0x37f   : > { %11157 = vst [vmem:[#allocation75_spill] sm:$0xff] %v10319_v5 }
 0x380   : > { %v10323_v43 = vpop.f32.mrf.mxu0 }
 0x381   : > { %11158 = vst [vmem:[#allocation76_spill] sm:$0xff] %v10323_v43 }
 0x382   : > { %v10325_v39 = vpop.f32.mrf.mxu0 }
 0x383   : > { %11159 = vst [vmem:[#allocation77_spill] sm:$0xff] %v10325_v39  ;;  %v10346_v39 = vld [vmem:[%s10923_s5] ss:$0 sm:$0xff] }
 0x384   : > { %v10329_v53 = vpop.f32.mrf.mxu0  ;;  %11166 = vst [vmem:[#allocation84_spill] sm:$0xff] %v10346_v39  ;;  %v10368_v51 = vadd.f32 %v10346_v39, %v9688_v63  ;;  %v10388_v63 = vadd.f32 %v9730_v6, %v10346_v39 }
 0x385   : > { %11160 = vst [vmem:[#allocation78_spill] sm:$0xff] %v10329_v53  ;;  %v10350_v53 = vpop.f32.mrf.mxu1 }
 0x386   : > { %v10331_v56 = vpop.f32.mrf.mxu0  ;;  %11168 = vst [vmem:[#allocation86_spill] sm:$0xff] %v10350_v53  ;;  %11170 = vst [vmem:[#allocation88_spill] sm:$0xff] %v10388_v63  ;;  %v11178_v63 = vld [vmem:[#allocation26_spill] sm:$0xff] }
 0x387   : > { %11161 = vst [vmem:[#allocation79_spill] sm:$0xff] %v10331_v56  ;;  %v10354_v56 = vadd.f32 %v9652_v10, %v10346_v39  ;;  %v10376_v10 = vadd.f32 %v10346_v39, %v9704_v37  ;;  %v10398_v37 = vadd.f32 %v9746_v42, %v10346_v39  ;;  %v10408_v6 = vpop.f32.mrf.mxu1  ;;  %v11182_v42 = vld [vmem:[#allocation28_spill] sm:$0xff] }
 0x388   : > { %v10335_v62 = vpop.f32.mrf.mxu0  ;;  %11177 = vst [vmem:[#allocation93_spill] sm:$0xff] %v10408_v6 }
 0x389   : > { %11162 = vst [vmem:[#allocation80_spill] sm:$0xff] %v10335_v62  ;;  %11173 = vst [vmem:[#allocation91_spill] sm:$0xff] %v10398_v37  ;;  %v10420_v37 = vadd.f32 %v10346_v39, %v11182_v42  ;;  %v5047_v42 = vadd.f32 %v10105_v38, %v10110_v14  ;;  %v11200_v38 = vld [vmem:[#allocation27_spill] sm:$0xff] }
 0x38a   : > { %v10337_v44 = vpop.f32.mrf.mxu0  ;;  %v10462_v14 = vadd.f32 %v11200_v38, %v10346_v39  ;;  %v5046_v38 = vadd.f32 %v10122_v12, %v10125_v40  ;;  %v11208_v40 = vld [vmem:[#allocation42_spill] sm:$0xff] }
 0x38b   : > { %11163 = vst [vmem:[#allocation81_spill] sm:$0xff] %v10337_v44  ;;  %v10360_v44 = vadd.f32 %v10346_v39, %v9665_v15  ;;  %v10380_v15 = vadd.f32 %v9714_v24, %v10346_v39  ;;  %v10402_v24 = vadd.f32 %v10346_v39, %v9752_v57  ;;  %11183 = vst [vmem:[#allocation28_spill] sm:$0xff] %v10420_v37  ;;  %v11184_v57 = vld [vmem:[#allocation11_spill] sm:$0xff] }
 0x38c   : > { %v10341_v5 = vpop.f32.mrf.mxu0 }
 0x38d   : > { %11165 = vst [vmem:[#allocation83_spill] sm:$0xff] %v10341_v5  ;;  %v10364_v5 = vadd.f32 %v9681_v0, %v10346_v39  ;;  %v10384_v0 = vadd.f32 %v10346_v39, %v9720_v61  ;;  %11174 = vst [vmem:[#allocation92_spill] sm:$0xff] %v10402_v24  ;;  %v11175_v61 = vld [vmem:[#allocation23_spill] sm:$0xff]  ;;  %v10424_v24 = vadd.f32 %v11184_v57, %v10346_v39  ;;  %v11192_v57 = vld [vmem:[#allocation34_spill] sm:$0xff] }
 0x38e   : > { %v10348_v43 = vpop.f32.mrf.mxu0  ;;  %v10406_v53 = vadd.f32 %v11175_v61, %v10346_v39 }
 0x38f   : > { %11167 = vst [vmem:[#allocation85_spill] sm:$0xff] %v10348_v43  ;;  %v10372_v43 = vadd.f32 %v9698_v2, %v10346_v39  ;;  %v10394_v2 = vadd.f32 %v10346_v39, %v9736_v21  ;;  %v11180_v21 = vld [vmem:[#allocation9_spill] sm:$0xff]  ;;  %11185 = vst [vmem:[#allocation11_spill] sm:$0xff] %v10424_v24  ;;  %v10444_v24 = vadd.f32 %v11192_v57, %v10346_v39 }
 0x390   : > { %v10356_v62 = vpop.f32.mrf.mxu0  ;;  %11176 = vst [vmem:[#allocation23_spill] sm:$0xff] %v10406_v53  ;;  %v11187_v53 = vld [vmem:[#allocation30_spill] sm:$0xff]  ;;  %v11202_v57 = vld [vmem:[#allocation29_spill] sm:$0xff] }
 0x391   : > { %11169 = vst [vmem:[#allocation87_spill] sm:$0xff] %v10356_v62  ;;  %11172 = vst [vmem:[#allocation90_spill] sm:$0xff] %v10394_v2  ;;  %v10416_v2 = vadd.f32 %v11180_v21, %v10346_v39  ;;  %v10430_v6 = vadd.f32 %v10346_v39, %v11187_v53  ;;  %v11191_v21 = vld [vmem:[#allocation32_spill] sm:$0xff] }
 0x392   : > { %v10390_v62 = vpop.f32.mrf.mxu0  ;;  %11193 = vst [vmem:[#allocation32_spill] sm:$0xff] %v10444_v24  ;;  %v11195_v53 = vld [vmem:[#allocation36_spill] sm:$0xff]  ;;  %v10466_v24 = vadd.f32 %v10346_v39, %v11202_v57  ;;  %v5051_v57 = vadd.f32 %v10127_v32, %v10130_v28  ;;  %v10502_v32 = vadd.f32 %v11208_v40, %v10160_v23  ;;  %v11209_v28 = vld [vmem:[#allocation37_spill] sm:$0xff]  ;;  %v11213_v23 = vld [vmem:[#allocation7_spill] sm:$0xff] }
 0x393   : > { %11171 = vst [vmem:[#allocation89_spill] sm:$0xff] %v10390_v62  ;;  %v10412_v62 = vadd.f32 %v10346_v39, %v11178_v63  ;;  %11181 = vst [vmem:[#allocation9_spill] sm:$0xff] %v10416_v2  ;;  %v11189_v63 = vld [vmem:[#allocation14_spill] sm:$0xff]  ;;  %v10438_v2 = vadd.f32 %v10346_v39, %v11191_v21  ;;  %v11218_v40 = vld [vmem:[#allocation12_spill] sm:$0xff] }
 0x394   : > { %v10426_v61 = vpop.f32.mrf.mxu0  ;;  %11188 = vst [vmem:[#allocation30_spill] sm:$0xff] %v10430_v6  ;;  %v10452_v6 = vadd.f32 %v11195_v53, %v10346_v39  ;;  %11203 = vst [vmem:[#allocation27_spill] sm:$0xff] %v10466_v24  ;;  %v5354_v53 = vadd.f32 %v10267_v41, %v5047_v42  ;;  %v5050_v41 = vadd.f32 %v10142_v48, %v10145_v45  ;;  %v11212_v48 = vld [vmem:[#allocation44_spill] sm:$0xff] }
 0x395   : > { %11179 = vst [vmem:[#allocation26_spill] sm:$0xff] %v10412_v62  ;;  %11186 = vst [vmem:[#allocation94_spill] sm:$0xff] %v10426_v61  ;;  %v10434_v62 = vadd.f32 %v11189_v63, %v10346_v39  ;;  %v11194_v61 = vld [vmem:[#allocation16_spill] sm:$0xff]  ;;  %v11197_v63 = vld [vmem:[#allocation25_spill] sm:$0xff]  ;;  %v10516_v45 = vadd.f32 %v11212_v48, %v10175_v25 }
 0x396   : > { %v10448_v37 = vadd.f32 %v10346_v39, %v11194_v61  ;;  %11196 = vst [vmem:[#allocation34_spill] sm:$0xff] %v10452_v6  ;;  %v10458_v21 = vpop.f32.mrf.mxu0  ;;  %11201 = vst [vmem:[#allocation25_spill] sm:$0xff] %v10462_v14  ;;  %v5045_v61 = vadd.f32 %v10112_v29, %v10115_v58  ;;  %v10471_v6 = vpop.f32.mrf.mxu1  ;;  %v5049_v29 = vadd.f32 %v10132_v1, %v10135_v18  ;;  %v11216_v25 = vld [vmem:[#allocation24_spill] sm:$0xff]  ;;  %v11220_v48 = vld [vmem:[#allocation13_spill] sm:$0xff] }
 0x397   : > { %11190 = vst [vmem:[#allocation14_spill] sm:$0xff] %v10434_v62  ;;  %v10456_v62 = vadd.f32 %v10346_v39, %v11197_v63  ;;  %11199 = vst [vmem:[#allocation36_spill] sm:$0xff] %v10458_v21  ;;  %v11204_v63 = vld [vmem:[#allocation31_spill] sm:$0xff]  ;;  %v5048_v21 = vadd.f32 %v10117_v16, %v10120_v46  ;;  %v5052_v58 = vadd.f32 %v10137_v36, %v10140_v60  ;;  %v11207_v46 = vld [vmem:[#allocation40_spill] sm:$0xff] }
 0x398   : > { %v10483_v24 = vpop.f32.mrf.mxu0  ;;  %v5352_v42 = vadd.f32 %v10271_v17, %v5045_v61  ;;  %v10494_v16 = vadd.f32 %v10147_v50, %v10150_v59  ;;  %v10498_v12 = vadd.f32 %v11207_v46, %v10155_v31  ;;  %v10506_v1 = vadd.f32 %v11209_v28, %v10165_v47  ;;  %v11211_v36 = vld [vmem:[#allocation10_spill] sm:$0xff]  ;;  %v10520_v31 = vpop.f32.mrf.mxu1  ;;  %v11214_v17 = vld [vmem:[#allocation39_spill] sm:$0xff] }
 0x399   : > { %11198 = vst [vmem:[#allocation16_spill] sm:$0xff] %v10456_v62  ;;  %v10475_v62 = vadd.f32 %v11204_v63, %v10346_v39  ;;  %11206 = vst [vmem:[#allocation31_spill] sm:$0xff] %v10483_v24  ;;  %v10512_v60 = vadd.f32 %v11211_v36, %v10170_v55  ;;  %v5660_v50 = vadd.f32 %v10269_v22, %v5354_v53  ;;  %v11215_v55 = vld [vmem:[#allocation41_spill] sm:$0xff]  ;;  %v11219_v28 = vld [vmem:[#allocation46_spill] sm:$0xff] }
 0x39a   : > { %v10508_v18 = vpop.f32.mrf.mxu0  ;;  %v5355_v59 = vadd.f32 %v10275_v4, %v5048_v21  ;;  %v10524_v47 = vadd.f32 %v11213_v23, %v10180_v3  ;;  %v10528_v61 = vadd.f32 %v11214_v17, %v10185_v52  ;;  %v10532_v63 = vadd.f32 %v11215_v55, %v10190_v35  ;;  %v10541_v4 = vld [vmem:[%s10925_s7] ss:$0 sm:$0xff]  ;;  %v11217_v3 = vld [vmem:[#allocation43_spill] sm:$0xff] }
 0x39b   : > { %11205 = vst [vmem:[#allocation29_spill] sm:$0xff] %v10475_v62  ;;  %11210 = vst [vmem:[#allocation40_spill] sm:$0xff] %v10508_v18  ;;  %v10536_v46 = vadd.f32 %v11216_v25, %v10195_v30  ;;  %v10545_v21 = vadd.f32 %v11217_v3, %v10200_v33  ;;  %v5658_v52 = vadd.f32 %v10273_v26, %v5352_v42  ;;  %v11221_v33 = vld [vmem:[#allocation48_spill] sm:$0xff]  ;;  %v10575_v42 = vpop.f32.mrf.mxu1  ;;  %v11224_v25 = vld [vmem:[#allocation15_spill] sm:$0xff] }
 0x39c   : > { %v7815_v22 = vpop.f32.mrf.mxu0  ;;  %v5353_v53 = vadd.f32 %v10277_v11, %v5046_v38  ;;  %v10551_v30 = vadd.f32 %v11218_v40, %v10205_v7  ;;  %v10555_v36 = vadd.f32 %v11219_v28, %v10210_v9  ;;  %v10559_v23 = vadd.f32 %v11220_v48, %v10215_v49  ;;  %v10568_v11 = vld [vmem:[%s10926_s8] ss:$0 sm:$0xff]  ;;  %v11222_v7 = vld [vmem:[#allocation45_spill] sm:$0xff]  ;;  %v11227_v28 = vld [vmem:[#allocation52_spill] sm:$0xff] }
 0x39d   : > { %v5966_v35 = vadd.f32 %v7815_v22, %v5660_v50  ;;  %v10563_v17 = vadd.f32 %v11221_v33, %v10220_v54  ;;  %v10572_v38 = vadd.f32 %v11222_v7, %v10225_v8  ;;  %v5661_v9 = vadd.f32 %v10279_v13, %v5355_v59  ;;  %v11223_v54 = vld [vmem:[#allocation47_spill] sm:$0xff]  ;;  %v11225_v22 = vld [vmem:[#allocation50_spill] sm:$0xff]  ;;  %v11226_v40 = vld [vmem:[#allocation17_spill] sm:$0xff]  ;;  %v10605_v18 = vpop.f32.mrf.mxu1 }
 0x39e   : > { %v5837_v26 = vpop.f32.mrf.mxu0  ;;  %v10580_v55 = vadd.f32 %v11223_v54, %v10230_v27  ;;  %v10584_v3 = vadd.f32 %v11225_v22, %v11224_v25  ;;  %v10588_v8 = vadd.f32 %v11227_v28, %v11226_v40  ;;  %v11228_v48 = vld [vmem:[#allocation61_spill] sm:$0xff]  ;;  %v11229_v33 = vld [vmem:[#allocation22_spill] sm:$0xff]  ;;  %v11233_v22 = vld [vmem:[#allocation56_spill] sm:$0xff] }
 0x39f   : > { %v6005_v49 = vmul.f32 %v10541_v4, %v5966_v35  ;;  %v5964_v50 = vadd.f32 %v5837_v26, %v5658_v52  ;;  %v5358_v13 = vadd.f32 %v11228_v48, %v5051_v57  ;;  %v5659_v35 = vadd.f32 %v11229_v33, %v5353_v53  ;;  %v11230_v7 = vld [vmem:[#allocation18_spill] sm:$0xff]  ;;  %v11232_v25 = vld [vmem:[#allocation49_spill] sm:$0xff]  ;;  %v11238_v33 = vld [vmem:[#allocation51_spill] sm:$0xff] }
 0x3a0   : > { %v7816_v59 = vpop.f32.mrf.mxu0  ;;  %v11231_v54 = vld [vmem:[#allocation54_spill] sm:$0xff]  ;;  %v10601_v39 = vadd.f32 %v11233_v22, %v11232_v25  ;;  %v11235_v40 = vld [vmem:[#allocation57_spill] sm:$0xff]  ;;  %v11241_v25 = vld [vmem:[#allocation55_spill] sm:$0xff] }
 0x3a1   : > { %v6044_v52 = vadd.f32 %v10568_v11, %v6005_v49  ;;  %v6003_v27 = vmul.f32 %v10541_v4, %v5964_v50  ;;  %v5967_v26 = vadd.f32 %v7816_v59, %v5661_v9  ;;  %v10597_v62 = vadd.f32 %v11231_v54, %v11230_v7  ;;  %v11236_v57 = vld [vmem:[#allocation21_spill] sm:$0xff]  ;;  %v11240_v54 = vld [vmem:[#allocation19_spill] sm:$0xff] }
 0x3a2   : > { %11234 = vst [vmem:[#allocation42_spill] sm:$0xff] %v10601_v39  ;;  %v5356_v28 = vadd.f32 %v11235_v40, %v5049_v29  ;;  %v5359_v48 = vadd.f32 %v11236_v57, %v5052_v58  ;;  %v5840_v14 = vpop.f32.mrf.mxu0  ;;  %v11237_v59 = vld [vmem:[#allocation53_spill] sm:$0xff]  ;;  %v10617_v29 = vadd.f32 %v11241_v25, %v11240_v54  ;;  %v11243_v58 = vld [vmem:[#allocation60_spill] sm:$0xff]  ;;  %v11244_v40 = vld [vmem:[#allocation58_spill] sm:$0xff] }
 0x3a3   : > { %v6076_v53 = vmax.f32 %v6044_v52, 0.0  ;;  %v6042_v9 = vadd.f32 %v10568_v11, %v6003_v27  ;;  %v6006_v49 = vmul.f32 %v10541_v4, %v5967_v26  ;;  %v5965_v50 = vadd.f32 %v5840_v14, %v5659_v35  ;;  %v11245_v35 = vld [vmem:[#allocation63_spill] sm:$0xff] }
 0x3a4   : > { %v10613_v7 = vadd.f32 %v11238_v33, %v11237_v59  ;;  %11242 = vst [vmem:[#allocation10_spill] sm:$0xff] %v10617_v29  ;;  %v5664_v22 = vadd.f32 %v11243_v58, %v5358_v13  ;;  %v5357_v57 = vadd.f32 %v11244_v40, %v5050_v41  ;;  %v7819_v24 = vpop.f32.mrf.mxu0  ;;  %v5662_v26 = vadd.f32 %v11245_v35, %v5356_v28  ;;  %v11246_v59 = vld [vmem:[#allocation67_spill] sm:$0xff]  ;;  %v10628_v13 = vpop.f32.mrf.mxu1 }
 0x3a5   : > { %v6108_v52 = vadd.f32 %v6076_v53, %v10354_v56  ;;  %v6074_v39 = vmax.f32 %v6042_v9, 0.0  ;;  %v6045_v27 = vadd.f32 %v10568_v11, %v6006_v49  ;;  %v6004_v14 = vmul.f32 %v10541_v4, %v5965_v50  ;;  %v11248_v9 = vld [vmem:[#allocation70_spill] sm:$0xff]  ;;  %v11249_v50 = vld [vmem:[#allocation64_spill] sm:$0xff] }
 0x3a6   : > { %11239 = vst [vmem:[#allocation37_spill] sm:$0xff] %v10613_v7  ;;  %v5665_v33 = vadd.f32 %v11246_v59, %v5359_v48  ;;  %v11247_v7 = vld [vmem:[#allocation62_spill] sm:$0xff]  ;;  %v5970_v25 = vadd.f32 %v7819_v24, %v5664_v22  ;;  %v5853_v29 = vpop.f32.mrf.mxu0  ;;  %v5663_v49 = vadd.f32 %v11248_v9, %v5357_v57  ;;  %v5360_v28 = vadd.f32 %v11249_v50, %v10498_v12  ;;  %v11251_v57 = vld [vmem:[#allocation65_spill] sm:$0xff] }
 0x3a7   : > { %v5362_v54 = vadd.f32 %v11247_v7, %v10494_v16  ;;  %v6140_v41 = vmax.f32 %v6108_v52, 0.0  ;;  %v6106_v58 = vadd.f32 %v6074_v39, %v10360_v44  ;;  %v6077_v56 = vmax.f32 %v6045_v27, 0.0  ;;  %v11250_v7 = vld [vmem:[#allocation73_spill] sm:$0xff] }
 0x3a8   : > { %v6043_v53 = vadd.f32 %v10568_v11, %v6004_v14  ;;  %v6009_v48 = vmul.f32 %v10541_v4, %v5970_v25  ;;  %v5968_v40 = vadd.f32 %v5853_v29, %v5662_v26  ;;  %v7820_v35 = vpop.f32.mrf.mxu0  ;;  %v5363_v12 = vadd.f32 %v11251_v57, %v10502_v32  ;;  %v10646_v14 = vpop.f32.mrf.mxu1  ;;  %v11252_v25 = vld [vmem:[#allocation66_spill] sm:$0xff] }
 0x3a9   : > { %6172 = vst.msk [vmem:[%s10636_s23 + $0x10] sm:$0xff] %vm3199_vm2, %v6140_v41  ;;  %v6138_v24 = vmax.f32 %v6106_v58, 0.0  ;;  %v6109_v44 = vadd.f32 %v6077_v56, %v10364_v5  ;;  %v5971_v16 = vadd.f32 %v7820_v35, %v5665_v33  ;;  %v5668_v22 = vadd.f32 %v11250_v7, %v5362_v54  ;;  %v11254_v7 = vld [vmem:[#allocation69_spill] sm:$0xff] }
 0x3aa   : > { %v6075_v39 = vmax.f32 %v6043_v53, 0.0  ;;  %v6048_v29 = vadd.f32 %v10568_v11, %v6009_v48  ;;  %v6007_v52 = vmul.f32 %v10541_v4, %v5968_v40  ;;  %v5856_v27 = vpop.f32.mrf.mxu0  ;;  %v5666_v54 = vadd.f32 %v10321_v20, %v5360_v28  ;;  %v11253_v20 = vld [vmem:[#allocation68_spill] sm:$0xff]  ;;  %v10664_v35 = vpop.f32.mrf.mxu1 }
 0x3ab   : > { %6170 = vst.msk [vmem:[%s10636_s23] sm:$0xff] %vm3199_vm2, %v6138_v24  ;;  %v6141_v26 = vmax.f32 %v6109_v44, 0.0  ;;  %v6010_v59 = vmul.f32 %v10541_v4, %v5971_v16  ;;  %v5969_v33 = vadd.f32 %v5856_v27, %v5663_v49  ;;  %v5361_v32 = vadd.f32 %v11252_v25, %v10506_v1 }
 0x3ac   : > { %v6107_v5 = vadd.f32 %v6075_v39, %v10368_v51  ;;  %v6080_v41 = vmax.f32 %v6048_v29, 0.0  ;;  %v6046_v58 = vadd.f32 %v10568_v11, %v6007_v52  ;;  %v7823_v56 = vpop.f32.mrf.mxu0  ;;  %v5669_v49 = vadd.f32 %v10327_v19, %v5363_v12 }
 0x3ad   : > { %6173 = vst.msk [vmem:[%s10636_s23 + $0x18] sm:$0xff] %vm3199_vm2, %v6141_v26  ;;  %v6049_v9 = vadd.f32 %v10568_v11, %v6010_v59  ;;  %v6008_v51 = vmul.f32 %v10541_v4, %v5969_v33  ;;  %v5974_v50 = vadd.f32 %v7823_v56, %v5668_v22  ;;  %v5366_v28 = vadd.f32 %v11253_v20, %v10512_v60  ;;  %v11255_v26 = vld [vmem:[#allocation82_spill] sm:$0xff]  ;;  %v11256_v59 = vld [vmem:[#allocation71_spill] sm:$0xff]  ;;  %v11259_v20 = vld [vmem:[#allocation88_spill] sm:$0xff] }
 0x3ae   : > { %v6139_v53 = vmax.f32 %v6107_v5, 0.0  ;;  %v6112_v48 = vadd.f32 %v6080_v41, %v10372_v43  ;;  %v6078_v1 = vmax.f32 %v6046_v58, 0.0  ;;  %v5869_v40 = vpop.f32.mrf.mxu0  ;;  %v5667_v19 = vadd.f32 %v10333_v34, %v5361_v32  ;;  %v11257_v58 = vld [vmem:[#allocation86_spill] sm:$0xff] }
 0x3af   : > { %v6081_v24 = vmax.f32 %v6049_v9, 0.0  ;;  %v6047_v44 = vadd.f32 %v10568_v11, %v6008_v51  ;;  %v6013_v39 = vmul.f32 %v10541_v4, %v5974_v50  ;;  %v5972_v16 = vadd.f32 %v5869_v40, %v5666_v54  ;;  %v10682_v54 = vpop.f32.mrf.mxu1 }
 0x3b0   : > { %6171 = vst.msk [vmem:[%s10636_s23 + $0x8] sm:$0xff] %vm3199_vm2, %v6139_v53  ;;  %v5364_v60 = vadd.f32 %v11254_v7, %v10516_v45  ;;  %v6144_v22 = vmax.f32 %v6112_v48, 0.0  ;;  %v6110_v43 = vadd.f32 %v6078_v1, %v10376_v10  ;;  %v7824_v57 = vpop.f32.mrf.mxu0  ;;  %v5672_v5 = vadd.f32 %v11255_v26, %v5366_v28  ;;  %v11258_v53 = vld [vmem:[#allocation72_spill] sm:$0xff]  ;;  %v11260_v1 = vld [vmem:[#allocation93_spill] sm:$0xff] }
 0x3b1   : > { %v6113_v12 = vadd.f32 %v6081_v24, %v10380_v15  ;;  %v6079_v29 = vmax.f32 %v6047_v44, 0.0  ;;  %v6052_v52 = vadd.f32 %v10568_v11, %v6013_v39  ;;  %v6011_v27 = vmul.f32 %v10541_v4, %v5972_v16  ;;  %v11261_v24 = vld [vmem:[#allocation74_spill] sm:$0xff] }
 0x3b2   : > { %v5367_v34 = vadd.f32 %v11256_v59, %v10524_v47  ;;  %6176 = vst.msk [vmem:[%s10636_s23 + $0x30] sm:$0xff] %vm3199_vm2, %v6144_v22  ;;  %v6142_v45 = vmax.f32 %v6110_v43, 0.0  ;;  %v5975_v33 = vadd.f32 %v7824_v57, %v5669_v49  ;;  %v5872_v10 = vpop.f32.mrf.mxu0  ;;  %v5670_v56 = vadd.f32 %v11257_v58, %v5364_v60  ;;  %v11262_v60 = vld [vmem:[#allocation90_spill] sm:$0xff] }
 0x3b3   : > { %v6145_v15 = vmax.f32 %v6113_v12, 0.0  ;;  %v6111_v25 = vadd.f32 %v6079_v29, %v10384_v0  ;;  %v6084_v32 = vmax.f32 %v6052_v52, 0.0  ;;  %v6050_v41 = vadd.f32 %v10568_v11, %v6011_v27  ;;  %v11263_v29 = vld [vmem:[#allocation75_spill] sm:$0xff] }
 0x3b4   : > { %v5365_v9 = vadd.f32 %v11258_v53, %v10528_v61  ;;  %6174 = vst.msk [vmem:[%s10636_s23 + $0x20] sm:$0xff] %vm3199_vm2, %v6142_v45  ;;  %v6014_v47 = vmul.f32 %v10541_v4, %v5975_v33  ;;  %v5973_v51 = vadd.f32 %v5872_v10, %v5667_v19  ;;  %v7827_v50 = vpop.f32.mrf.mxu0  ;;  %v5673_v40 = vadd.f32 %v11260_v1, %v5367_v34  ;;  %v10700_v19 = vpop.f32.mrf.mxu1 }
 0x3b5   : > { %6177 = vst.msk [vmem:[%s10636_s23 + $0x38] sm:$0xff] %vm3199_vm2, %v6145_v15  ;;  %v6143_v49 = vmax.f32 %v6111_v25, 0.0  ;;  %v6116_v0 = vadd.f32 %v6084_v32, %v11259_v20  ;;  %v6082_v28 = vmax.f32 %v6050_v41, 0.0  ;;  %v5978_v48 = vadd.f32 %v7827_v50, %v5672_v5  ;;  %v11265_v15 = vld [vmem:[#allocation91_spill] sm:$0xff]  ;;  %v11267_v50 = vld [vmem:[#allocation92_spill] sm:$0xff] }
 0x3b6   : > { %v5370_v61 = vadd.f32 %v11261_v24, %v10532_v63  ;;  %v6053_v44 = vadd.f32 %v10568_v11, %v6014_v47  ;;  %v6012_v39 = vmul.f32 %v10541_v4, %v5973_v51  ;;  %v5885_v16 = vpop.f32.mrf.mxu0  ;;  %v5671_v12 = vadd.f32 %v10471_v6, %v5365_v9  ;;  %v11264_v6 = vld [vmem:[#allocation76_spill] sm:$0xff]  ;;  %v10718_v41 = vpop.f32.mrf.mxu1  ;;  %v11266_v47 = vld [vmem:[#allocation77_spill] sm:$0xff] }
 0x3b7   : > { %6175 = vst.msk [vmem:[%s10636_s23 + $0x28] sm:$0xff] %vm3199_vm2, %v6143_v49  ;;  %v6148_v7 = vmax.f32 %v6116_v0, 0.0  ;;  %v6114_v22 = vadd.f32 %v6082_v28, %v11262_v60  ;;  %v6017_v43 = vmul.f32 %v10541_v4, %v5978_v48  ;;  %v5976_v57 = vadd.f32 %v5885_v16, %v5670_v56  ;;  %v11268_v0 = vld [vmem:[#allocation23_spill] sm:$0xff]  ;;  %v11270_v60 = vld [vmem:[#allocation26_spill] sm:$0xff] }
 0x3b8   : > { %v5368_v63 = vadd.f32 %v11263_v29, %v10536_v46  ;;  %v6085_v52 = vmax.f32 %v6053_v44, 0.0  ;;  %v6051_v27 = vadd.f32 %v10568_v11, %v6012_v39  ;;  %v7828_v26 = vpop.f32.mrf.mxu0  ;;  %v5676_v33 = vadd.f32 %v10520_v31, %v5370_v61  ;;  %v11269_v61 = vld [vmem:[#allocation78_spill] sm:$0xff]  ;;  %v10736_v16 = vpop.f32.mrf.mxu1 }
 0x3b9   : > { %6180 = vst.msk [vmem:[%s10636_s23 + $0x50] sm:$0xff] %vm3199_vm2, %v6148_v7  ;;  %v6146_v5 = vmax.f32 %v6114_v22, 0.0  ;;  %v6056_v59 = vadd.f32 %v10568_v11, %v6017_v43  ;;  %v6015_v34 = vmul.f32 %v10541_v4, %v5976_v57  ;;  %v5979_v45 = vadd.f32 %v7828_v26, %v5673_v40  ;;  %v11272_v26 = vld [vmem:[#allocation9_spill] sm:$0xff] }
 0x3ba   : > { %v5371_v10 = vadd.f32 %v11264_v6, %v10545_v21  ;;  %v6117_v25 = vadd.f32 %v6085_v52, %v11265_v15  ;;  %v6083_v46 = vmax.f32 %v6051_v27, 0.0  ;;  %v5888_v32 = vpop.f32.mrf.mxu0  ;;  %v5674_v31 = vadd.f32 %v10575_v42, %v5368_v63  ;;  %v7804_v15 = vpop.f32.mrf.mxu1 }
 0x3bb   : > { %6178 = vst.msk [vmem:[%s10636_s23 + $0x40] sm:$0xff] %vm3199_vm2, %v6146_v5  ;;  %v6088_v58 = vmax.f32 %v6056_v59, 0.0  ;;  %v6054_v56 = vadd.f32 %v10568_v11, %v6015_v34  ;;  %v6018_v53 = vmul.f32 %v10541_v4, %v5979_v45  ;;  %v5977_v9 = vadd.f32 %v5888_v32, %v5671_v12 }
 0x3bc   : > { %v5369_v21 = vadd.f32 %v11266_v47, %v10551_v30  ;;  %v6149_v51 = vmax.f32 %v6117_v25, 0.0  ;;  %v6115_v49 = vadd.f32 %v6083_v46, %v11267_v50  ;;  %v7831_v20 = vpop.f32.mrf.mxu0  ;;  %v5677_v24 = vadd.f32 %v10605_v18, %v5371_v10  ;;  %v11271_v18 = vld [vmem:[#allocation79_spill] sm:$0xff]  ;;  %v11274_v46 = vld [vmem:[#allocation28_spill] sm:$0xff] }
 0x3bd   : > { %v6120_v28 = vadd.f32 %v6088_v58, %v11268_v0  ;;  %v6086_v48 = vmax.f32 %v6054_v56, 0.0  ;;  %v6057_v1 = vadd.f32 %v10568_v11, %v6018_v53  ;;  %v6016_v40 = vmul.f32 %v10541_v4, %v5977_v9  ;;  %v11275_v53 = vld [vmem:[#allocation81_spill] sm:$0xff] }
 0x3be   : > { %v5374_v42 = vadd.f32 %v11269_v61, %v10555_v36  ;;  %6181 = vst.msk [vmem:[%s10636_s23 + $0x58] sm:$0xff] %vm3199_vm2, %v6149_v51  ;;  %v6147_v30 = vmax.f32 %v6115_v49, 0.0  ;;  %v5982_v44 = vadd.f32 %v7831_v20, %v5676_v33  ;;  %v5901_v39 = vpop.f32.mrf.mxu0  ;;  %v5675_v12 = vadd.f32 %v10628_v13, %v5369_v21  ;;  %v11273_v13 = vld [vmem:[#allocation80_spill] sm:$0xff] }
 0x3bf   : > { %v6152_v7 = vmax.f32 %v6120_v28, 0.0  ;;  %v6118_v22 = vadd.f32 %v6086_v48, %v11270_v60  ;;  %v6089_v43 = vmax.f32 %v6057_v1, 0.0  ;;  %v6055_v57 = vadd.f32 %v10568_v11, %v6016_v40  ;;  %v11277_v28 = vld [vmem:[#allocation11_spill] sm:$0xff]  ;;  %v5630_v40 = vpop.f32.mrf.mxu1 }
 0x3c0   : > { %v5372_v29 = vadd.f32 %v11271_v18, %v10559_v23  ;;  %6179 = vst.msk [vmem:[%s10636_s23 + $0x48] sm:$0xff] %vm3199_vm2, %v6147_v30  ;;  %v6021_v36 = vmul.f32 %v10541_v4, %v5982_v44  ;;  %v5980_v63 = vadd.f32 %v5901_v39, %v5674_v31  ;;  %v7832_v52 = vpop.f32.mrf.mxu0  ;;  %v5680_v45 = vadd.f32 %v10646_v14, %v5374_v42 }
 0x3c1   : > { %6184 = vst.msk [vmem:[%s10636_s23 + $0x70] sm:$0xff] %vm3199_vm2, %v6152_v7  ;;  %v6150_v27 = vmax.f32 %v6118_v22, 0.0  ;;  %v6121_v5 = vadd.f32 %v6089_v43, %v11272_v26  ;;  %v6087_v59 = vmax.f32 %v6055_v57, 0.0  ;;  %v5983_v34 = vadd.f32 %v7832_v52, %v5677_v24  ;;  %v11279_v7 = vld [vmem:[#allocation30_spill] sm:$0xff]  ;;  %v7807_v43 = vpop.f32.mrf.mxu1 }
 0x3c2   : > { %v5375_v23 = vadd.f32 %v11273_v13, %v10563_v17  ;;  %v6060_v33 = vadd.f32 %v10568_v11, %v6021_v36  ;;  %v6019_v6 = vmul.f32 %v10541_v4, %v5980_v63  ;;  %v5904_v10 = vpop.f32.mrf.mxu0  ;;  %v5678_v14 = vadd.f32 %v10664_v35, %v5372_v29  ;;  %v11276_v35 = vld [vmem:[#allocation83_spill] sm:$0xff]  ;;  %v11280_v57 = vld [vmem:[#allocation14_spill] sm:$0xff] }
 0x3c3   : > { %6182 = vst.msk [vmem:[%s10636_s23 + $0x60] sm:$0xff] %vm3199_vm2, %v6150_v27  ;;  %v6153_v25 = vmax.f32 %v6121_v5, 0.0  ;;  %v6119_v32 = vadd.f32 %v6087_v59, %v11274_v46  ;;  %v6022_v58 = vmul.f32 %v10541_v4, %v5983_v34  ;;  %v5981_v56 = vadd.f32 %v5904_v10, %v5675_v12  ;;  %v5643_v10 = vpop.f32.mrf.mxu1 }
 0x3c4   : > { %v5373_v17 = vadd.f32 %v11275_v53, %v10572_v38  ;;  %v6092_v9 = vmax.f32 %v6060_v33, 0.0  ;;  %v6058_v31 = vadd.f32 %v10568_v11, %v6019_v6  ;;  %v7835_v47 = vpop.f32.mrf.mxu0  ;;  %v5681_v20 = vadd.f32 %v10682_v54, %v5375_v23  ;;  %v11278_v54 = vld [vmem:[#allocation85_spill] sm:$0xff] }
 0x3c5   : > { %6185 = vst.msk [vmem:[%s10636_s23 + $0x78] sm:$0xff] %vm3199_vm2, %v6153_v25  ;;  %v6151_v21 = vmax.f32 %v6119_v32, 0.0  ;;  %v6061_v51 = vadd.f32 %v10568_v11, %v6022_v58  ;;  %v6020_v50 = vmul.f32 %v10541_v4, %v5981_v56  ;;  %v5986_v49 = vadd.f32 %v7835_v47, %v5680_v45  ;;  %v11282_v23 = vld [vmem:[#allocation89_spill] sm:$0xff]  ;;  %v11284_v56 = vld [vmem:[#allocation20_spill] sm:$0xff] }
 0x3c6   : > { %v5378_v0 = vadd.f32 %v11276_v35, %v10580_v55  ;;  %v6124_v48 = vadd.f32 %v6092_v9, %v11277_v28  ;;  %v6090_v38 = vmax.f32 %v6058_v31, 0.0  ;;  %v5917_v1 = vpop.f32.mrf.mxu0  ;;  %v5679_v44 = vadd.f32 %v10700_v19, %v5373_v17  ;;  %v11281_v19 = vld [vmem:[#allocation87_spill] sm:$0xff] }
 0x3c7   : > { %6183 = vst.msk [vmem:[%s10636_s23 + $0x68] sm:$0xff] %vm3199_vm2, %v6151_v21  ;;  %v6093_v24 = vmax.f32 %v6061_v51, 0.0  ;;  %v6059_v61 = vadd.f32 %v10568_v11, %v6020_v50  ;;  %v6025_v42 = vmul.f32 %v10541_v4, %v5986_v49  ;;  %v5984_v30 = vadd.f32 %v5917_v1, %v5678_v14  ;;  %v11286_v49 = vld [vmem:[#allocation42_spill] sm:$0xff] }
 0x3c8   : > { %v5376_v39 = vadd.f32 %v11278_v54, %v10584_v3  ;;  %v6156_v55 = vmax.f32 %v6124_v48, 0.0  ;;  %v6122_v60 = vadd.f32 %v6090_v38, %v11279_v7  ;;  %v7836_v22 = vpop.f32.mrf.mxu0  ;;  %v5684_v63 = vadd.f32 %v10718_v41, %v5378_v0  ;;  %v7808_v48 = vpop.f32.mrf.mxu1 }
 0x3c9   : > { %v6125_v12 = vadd.f32 %v6093_v24, %v11280_v57  ;;  %v6091_v18 = vmax.f32 %v6059_v61, 0.0  ;;  %v6064_v29 = vadd.f32 %v10568_v11, %v6025_v42  ;;  %v6023_v36 = vmul.f32 %v10541_v4, %v5984_v30  ;;  %v11288_v61 = vld [vmem:[#allocation37_spill] sm:$0xff]  ;;  %v11289_v42 = vld [vmem:[#allocation36_spill] sm:$0xff]  ;;  %v11290_v30 = vld [vmem:[#allocation10_spill] sm:$0xff] }
 0x3ca   : > { %v5379_v52 = vadd.f32 %v11281_v19, %v10588_v8  ;;  %6188 = vst.msk [vmem:[%s10636_s23 + $0x90] sm:$0xff] %vm3199_vm2, %v6156_v55  ;;  %v6154_v3 = vmax.f32 %v6122_v60, 0.0  ;;  %v5987_v27 = vadd.f32 %v7836_v22, %v5681_v20  ;;  %v5920_v26 = vpop.f32.mrf.mxu0  ;;  %v5682_v13 = vadd.f32 %v10736_v16, %v5376_v39  ;;  %v11285_v16 = vld [vmem:[#allocation59_spill] sm:$0xff]  ;;  %v11287_v20 = vld [vmem:[#allocation94_spill] sm:$0xff] }
 0x3cb   : > { %v6157_v5 = vmax.f32 %v6125_v12, 0.0  ;;  %v6123_v59 = vadd.f32 %v6091_v18, %v10438_v2  ;;  %v6096_v34 = vmax.f32 %v6064_v29, 0.0  ;;  %v6062_v45 = vadd.f32 %v10568_v11, %v6023_v36  ;;  %v11283_v2 = vld [vmem:[#allocation32_spill] sm:$0xff]  ;;  %v11292_v39 = vld [vmem:[#allocation34_spill] sm:$0xff] }
 0x3cc   : > { %v5377_v41 = vadd.f32 %v11282_v23, %v10597_v62  ;;  %6186 = vst.msk [vmem:[%s10636_s23 + $0x80] sm:$0xff] %vm3199_vm2, %v6154_v3  ;;  %v6026_v8 = vmul.f32 %v10541_v4, %v5987_v27  ;;  %v5985_v33 = vadd.f32 %v5920_v26, %v5679_v44  ;;  %v7839_v6 = vpop.f32.mrf.mxu0  ;;  %v5074_v14 = vadd.f32 %v11285_v16, %v11284_v56  ;;  %v11291_v44 = vld [vmem:[#allocation31_spill] sm:$0xff]  ;;  %v11293_v36 = vld [vmem:[#allocation40_spill] sm:$0xff]  ;;  %v5646_v26 = vpop.f32.mrf.mxu1 }
 0x3cd   : > { %6189 = vst.msk [vmem:[%s10636_s23 + $0x98] sm:$0xff] %vm3199_vm2, %v6157_v5  ;;  %v6155_v25 = vmax.f32 %v6123_v59, 0.0  ;;  %v6128_v46 = vadd.f32 %v6096_v34, %v11283_v2  ;;  %v6094_v32 = vmax.f32 %v6062_v45, 0.0  ;;  %v5990_v58 = vadd.f32 %v7839_v6, %v5684_v63  ;;  %v11295_v5 = vld [vmem:[#allocation25_spill] sm:$0xff]  ;;  %v11298_v56 = vld [vmem:[#allocation84_spill] sm:$0xff] }
 0x3ce   : > { %v5685_v62 = vadd.f32 %v7804_v15, %v5379_v52  ;;  %v6065_v53 = vadd.f32 %v10568_v11, %v6026_v8  ;;  %v6024_v17 = vmul.f32 %v10541_v4, %v5985_v33  ;;  %v5933_v9 = vpop.f32.mrf.mxu0  ;;  %v5683_v50 = vadd.f32 %v5630_v40, %v5377_v41  ;;  %v11294_v52 = vld [vmem:[#allocation16_spill] sm:$0xff] }
 0x3cf   : > { %6187 = vst.msk [vmem:[%s10636_s23 + $0x88] sm:$0xff] %vm3199_vm2, %v6155_v25  ;;  %v6160_v31 = vmax.f32 %v6128_v46, 0.0  ;;  %v6126_v47 = vadd.f32 %v6094_v32, %v10448_v37  ;;  %v6029_v21 = vmul.f32 %v10541_v4, %v5990_v58  ;;  %v5988_v51 = vadd.f32 %v5933_v9, %v5682_v13  ;;  %v11296_v25 = vld [vmem:[#allocation27_spill] sm:$0xff]  ;;  %v11297_v58 = vld [vmem:[#allocation33_spill] sm:$0xff] }
 0x3d0   : > { %v5382_v35 = vadd.f32 %v11287_v20, %v11286_v49  ;;  %v6097_v0 = vmax.f32 %v6065_v53, 0.0  ;;  %v6063_v15 = vadd.f32 %v10568_v11, %v6024_v17  ;;  %v7840_v28 = vpop.f32.mrf.mxu0  ;;  %v5380_v40 = vadd.f32 %v11289_v42, %v11288_v61  ;;  %v11299_v9 = vld [vmem:[#allocation29_spill] sm:$0xff]  ;;  %v11301_v42 = vld [vmem:[#allocation6_spill] sm:$0xff] }
 0x3d1   : > { %6192 = vst.msk [vmem:[%s10636_s23 + $0xb0] sm:$0xff] %vm3199_vm2, %v6160_v31  ;;  %v6158_v38 = vmax.f32 %v6126_v47, 0.0  ;;  %v6068_v1 = vadd.f32 %v10568_v11, %v6029_v21  ;;  %v6027_v37 = vmul.f32 %v10541_v4, %v5988_v51  ;;  %v5991_v24 = vadd.f32 %v7840_v28, %v5685_v62  ;;  %v11300_v28 = vld [vmem:[#allocation35_spill] sm:$0xff] }
 0x3d2   : > { %v5383_v54 = vadd.f32 %v11291_v44, %v11290_v30  ;;  %v6129_v55 = vadd.f32 %v6097_v0, %v11292_v39  ;;  %v6095_v7 = vmax.f32 %v6063_v15, 0.0  ;;  %v5936_v60 = vpop.f32.mrf.mxu0  ;;  %v5688_v29 = vadd.f32 %v7807_v43, %v5382_v35 }
 0x3d3   : > { %6190 = vst.msk [vmem:[%s10636_s23 + $0xa0] sm:$0xff] %vm3199_vm2, %v6158_v38  ;;  %v6100_v22 = vmax.f32 %v6068_v1, 0.0  ;;  %v6066_v57 = vadd.f32 %v10568_v11, %v6027_v37  ;;  %v6030_v12 = vmul.f32 %v10541_v4, %v5991_v24  ;;  %v5989_v18 = vadd.f32 %v5936_v60, %v5683_v50 }
 0x3d4   : > { %v5381_v63 = vadd.f32 %v11293_v36, %v5074_v14  ;;  %v6161_v19 = vmax.f32 %v6129_v55, 0.0  ;;  %v6127_v3 = vadd.f32 %v6095_v7, %v11294_v52  ;;  %v7843_v27 = vpop.f32.mrf.mxu0  ;;  %v5686_v23 = vadd.f32 %v5643_v10, %v5380_v40 }
 0x3d5   : > { %v6132_v59 = vadd.f32 %v6100_v22, %v11295_v5  ;;  %v6098_v34 = vmax.f32 %v6066_v57, 0.0  ;;  %v6069_v45 = vadd.f32 %v10568_v11, %v6030_v12  ;;  %v6028_v13 = vmul.f32 %v10541_v4, %v5989_v18  ;;  %v11303_v57 = vld [vmem:[#allocation8_spill] sm:$0xff] }
 0x3d6   : > { %v5689_v41 = vadd.f32 %v7808_v48, %v5383_v54  ;;  %6193 = vst.msk [vmem:[%s10636_s23 + $0xb8] sm:$0xff] %vm3199_vm2, %v6161_v19  ;;  %v6159_v43 = vmax.f32 %v6127_v3, 0.0  ;;  %v5994_v8 = vadd.f32 %v7843_v27, %v5688_v29  ;;  %v5949_v33 = vpop.f32.mrf.mxu0  ;;  %v3172_v16 = vadd.f32 %v11298_v56, %v11297_v58  ;;  %v11302_v54 = vld [vmem:[#allocation38_spill] sm:$0xff] }
 0x3d7   : > { %v6164_v6 = vmax.f32 %v6132_v59, 0.0  ;;  %v6130_v2 = vadd.f32 %v6098_v34, %v11296_v25  ;;  %v6101_v46 = vmax.f32 %v6069_v45, 0.0  ;;  %v6067_v32 = vadd.f32 %v10568_v11, %v6028_v13 }
 0x3d8   : > { %v5687_v14 = vadd.f32 %v5646_v26, %v5381_v63  ;;  %6191 = vst.msk [vmem:[%s10636_s23 + $0xa8] sm:$0xff] %vm3199_vm2, %v6159_v43  ;;  %v6033_v10 = vmul.f32 %v10541_v4, %v5994_v8  ;;  %v5992_v62 = vadd.f32 %v5949_v33, %v5686_v23  ;;  %v7844_v53 = vpop.f32.mrf.mxu0  ;;  %v3193_v48 = vadd.f32 %v11300_v28, %v11298_v56 }
 0x3d9   : > { %6196 = vst.msk [vmem:[%s10636_s23 + $0xd0] sm:$0xff] %vm3199_vm2, %v6164_v6  ;;  %v6162_v17 = vmax.f32 %v6130_v2, 0.0  ;;  %v6133_v31 = vadd.f32 %v6101_v46, %v11299_v9  ;;  %v6099_v47 = vmax.f32 %v6067_v32, 0.0  ;;  %v5995_v21 = vadd.f32 %v7844_v53, %v5689_v41 }
 0x3da   : > { %v6072_v51 = vadd.f32 %v10568_v11, %v6033_v10  ;;  %v6031_v50 = vmul.f32 %v10541_v4, %v5992_v62  ;;  %v5952_v49 = vpop.f32.mrf.mxu0  ;;  %v3185_v40 = vadd.f32 %v11298_v56, %v11301_v42  ;;  %v3196_v39 = vadd.f32 %v11302_v54, %v11298_v56 }
 0x3db   : > { %6194 = vst.msk [vmem:[%s10636_s23 + $0xc0] sm:$0xff] %vm3199_vm2, %v6162_v17  ;;  %v6165_v20 = vmax.f32 %v6133_v31, 0.0  ;;  %v6131_v35 = vadd.f32 %v6099_v47, %v3172_v16  ;;  %v6034_v0 = vmul.f32 %v10541_v4, %v5995_v21  ;;  %v5993_v15 = vadd.f32 %v5952_v49, %v5687_v14 }
 0x3dc   : > { %v6104_v38 = vmax.f32 %v6072_v51, 0.0  ;;  %v6070_v1 = vadd.f32 %v10568_v11, %v6031_v50 }
 0x3dd   : > { %6197 = vst.msk [vmem:[%s10636_s23 + $0xd8] sm:$0xff] %vm3199_vm2, %v6165_v20  ;;  %v6163_v37 = vmax.f32 %v6131_v35, 0.0  ;;  %v6073_v24 = vadd.f32 %v10568_v11, %v6034_v0  ;;  %v6032_v61 = vmul.f32 %v10541_v4, %v5993_v15  ;;  %v3188_v4 = vadd.f32 %v11298_v56, %v11303_v57 }
 0x3de   : > { %v6136_v30 = vadd.f32 %v6104_v38, %v3193_v48  ;;  %v6102_v44 = vmax.f32 %v6070_v1, 0.0 }
 0x3df   : > { %6195 = vst.msk [vmem:[%s10636_s23 + $0xc8] sm:$0xff] %vm3199_vm2, %v6163_v37  ;;  %v6105_v55 = vmax.f32 %v6073_v24, 0.0  ;;  %v6071_v7 = vadd.f32 %v10568_v11, %v6032_v61 }
 0x3e0   : > { %v6168_v60 = vmax.f32 %v6136_v30, 0.0  ;;  %v6134_v22 = vadd.f32 %v6102_v44, %v3185_v40 }
 0x3e1   : > { %v6137_v12 = vadd.f32 %v6105_v55, %v3196_v39  ;;  %v6103_v18 = vmax.f32 %v6071_v7, 0.0 }
 0x3e2   : > { %6200 = vst.msk [vmem:[%s10636_s23 + $0xf0] sm:$0xff] %vm3199_vm2, %v6168_v60  ;;  %v6166_v29 = vmax.f32 %v6134_v22, 0.0 }
 0x3e3   : > { %v6169_v36 = vmax.f32 %v6137_v12, 0.0  ;;  %v6135_v63 = vadd.f32 %v6103_v18, %v3188_v4 }
 0x3e4   : > { %6198 = vst.msk [vmem:[%s10636_s23 + $0xe0] sm:$0xff] %vm3199_vm2, %v6166_v29 }
 0x3e5   : > { %6201 = vst.msk [vmem:[%s10636_s23 + $0xf8] sm:$0xff] %vm3199_vm2, %v6169_v36  ;;  %v6167_v11 = vmax.f32 %v6135_v63, 0.0 }
 0x3e7   : > { %6199 = vst.msk [vmem:[%s10636_s23 + $0xe8] sm:$0xff] %vm3199_vm2, %v6167_v11 }
 0x3e8   : > { %7932 = shalt.err (!%p7929_p3)
}
 0x3e9   : > { %s7933_s21 = scalar_lea.hbm %s10868_s27, 4096  ;;  %s7937_s24 = scalar_lea.hbm %s10927_s9, 8192 }
 0x3ea   : > { %p7934_p4 = scmp.ne.s32.totalorder %s10868_s27, %s7933_s21  ;;  %p7938_p9 = scmp.lt.s32.totalorder %s10868_s27, %s10927_s9 }
 0x3eb   : > { %p7939_p10 = scmp.lt.s32.totalorder %s7937_s24, %s7933_s21 }
 0x3ec   : > { %p7935_p7 = pnand %p7934_p4, %p8073_p5 }
 0x3ed   : > { %p7940_p11 = por %p7939_p10, %p7938_p9 }
 0x3ee   : > { %p7936_p8 = pneg %p7935_p7 }
 0x3f0   : > { %p7941_p12 = pnand %p7940_p11, %p7936_p8 }
 0x3f2   : > { %7944 = shalt.err (!%p7941_p12)
}
 0x3f3   : > { %s7983_s28 = smov 128   ;;  %s7984_s29 = smov 8  }
 0x3f4   : > { %7859 = dma.vmem_to_hbm [thread:$0]  (%p8073_p5), %s10870_s16, 4096, %s10868_s27, %s10878_s13, %s7983_s28, %s7983_s28, %s7984_s29  }
 0x3f5 PF: > { %p7865_p13 = scmp.ge.s32.totalorder %s7979_s12, 2  ;;  %s6231_s14 = sand.u32 1, %s7967_s30  }
 0x3f6   : > { %s6232_s17 = scalar_lea.sflag [#allocation4], %s6231_s14 }
 0x3f7   : > { %p7862_p0 = pnand %p7865_p13, %p8077_p6 }
 0x3f9   : > { %p7863_p1 = pneg %p7862_p0 }
 0x3fb   : > { %7962 = dma.done.wait (%p7863_p1), %s6232_s17, 4096  }
 0x3fc   : > { %7964 = vsyncadd (%p7863_p1), %s6232_s17, 4294963200  ;;  %p19_p2 = scmp.ge.s32.totalorder %s8060_s15, 4   ;;  %s11304_s30 = smov %s7971_s10 }
 0x3fd   : > { %s11305_s10 = smov %s7975_s11  ;;  %s11306_s11 = smov %s8071_s18 }
 0x3fe   : > { %s11307_s12 = smov %s8060_s15  ;;  %21 = sbr.rel (!%p19_p2) target bundleno = 3 (0x3), region = 111 }
 0x403   :  { %6237 = vsyncpa [#allocation4], 1 }
 0x404   :  { %6239 = vsyncpa [#allocation4 + $0x1], 1 }

</bundles_post_ra>
